<compile_context>
chip_gen: v7x
topology: tpu7x:2x2x1
jax: 0.10.0
libtpu: 0.0.40
codegen_flags: <defaults>
</compile_context>

<pallas_src>
import functools
import math

import jax
import jax.numpy as jnp
from jax import lax
from jax.experimental import pallas as pl
from jax.experimental.pallas import tpu as pltpu

# ----------------------------- config ---------------------------------------
B = 2
C = 3
IMG = 16
PATCH = 4
NP = (IMG // PATCH) * (IMG // PATCH)   # 16 patches
T = NP + 1                             # 17 tokens (CLS + patches)
TPAD = 24                              # tokens padded to a sublane multiple (3*8)
D = 32                                 # hidden dim (feat_dim)
NH = 4                                 # heads
HD = D // NH                           # head dim = 8
DEPTH = 2
MLP_HIDDEN = 4 * D                     # 128
NUM_CLASSES = 10
MLP_NUM = 1                            # head dims: [D]*MLP_NUM + [NUM_CLASSES]
CONTINUAL_INCREMENT = 5                # imagenet_r continual increment
DATA_NAME = "imagenet_r"               # exercises the class-masking branch
LN_EPS = 1e-6
ATTN_SCALE = 1.0 / math.sqrt(HD)
CPP = C * PATCH * PATCH                # 48 features per patch

# packed vector-slab layout (one lane-dense (VEC_ROWS, 128) f32 input)
VEC_W = 128
# per-layer rows (6 each): ln1_g, ln1_b, ln2_g, ln2_b, proj_b, fc2_b
VROW_LNF_G = 6 * DEPTH                 # 12
VROW_LNF_B = VROW_LNF_G + 1            # 13
VROW_H0B = VROW_LNF_G + 2              # 14
VROW_H1B = VROW_LNF_G + 3              # 15
VROW_QKVB = VROW_LNF_G + 4             # 16 (+ layer)
VROW_FC1B = VROW_QKVB + DEPTH          # 18 (+ layer)
VEC_ROWS = VROW_FC1B + DEPTH           # 20

_VMEM = pl.BlockSpec(memory_space=pltpu.MemorySpace.VMEM)
_SMEM = pl.BlockSpec(memory_space=pltpu.MemorySpace.SMEM)

_GELU_C = math.sqrt(2.0 / math.pi)


def _gelu(x):
    # tanh-approx GELU (== jax.nn.gelu(approximate=True)); lowers to EUP tanh.
    # TODO(synk): PyTorch nn.GELU defaults to the exact erf formulation.
    return 0.5 * x * (1.0 + jnp.tanh(_GELU_C * (x + 0.044715 * (x * x * x))))


def _layernorm(x, g, b):
    mu = jnp.mean(x, axis=-1, keepdims=True)
    xc = x - mu
    var = jnp.mean(xc * xc, axis=-1, keepdims=True)
    return xc * lax.rsqrt(var + LN_EPS) * g + b


# ----------------------------- fused Pallas kernel ---------------------------
def _vit_fused_kernel(
    task_ref,        # SMEM (1,) int32
    patches_ref,     # (B*TPAD, CPP) bf16  — CLS and pad rows are zero
    patch_w_ref,     # (CPP, D) bf16
    tok_add_ref,     # (B*TPAD, D) f32     — cls+pos / patch_b+pos / 0 pad rows
    vecs_ref,        # (VEC_ROWS, 128) f32 — packed gammas/betas/biases
    qkv_w_ref,       # (DEPTH, D, 3D) bf16 — attn scale pre-folded into q part
    proj_w_ref,      # (DEPTH, D, D) bf16
    fc1_w_ref,       # (DEPTH, D, MLP_HIDDEN) bf16
    fc2_w_ref,       # (DEPTH, MLP_HIDDEN, D) bf16
    head_w_ref,      # (2, D, D) bf16      — [0]=head0_w, [1]=head1_w zero-padded
    logits_ref,      # out (B, NUM_CLASSES) f32
    *, apply_mask: bool,
):
    f32 = jnp.float32
    bf16 = jnp.bfloat16

    vecs = vecs_ref[...]                                  # (VEC_ROWS, 128)

    def vrow(r, width):                                   # static row/lane slice
        return vecs[r:r + 1, 0:width]

    # ---- patch embedding + CLS/pos (single lane-dense matmul, all batches) --
    toks = jnp.dot(patches_ref[...], patch_w_ref[...],
                   preferred_element_type=f32) + tok_add_ref[...]   # (B*TPAD, D)

    # key-padding mask: columns >= T are padded keys (shared by layers/heads)
    col = lax.broadcasted_iota(jnp.int32, (TPAD, TPAD), 1)
    kv_keep = col < T

    # ---- transformer blocks (DEPTH=2 unrolled; spills negligible at this size)
    for l in range(DEPTH):
        base = 6 * l
        g1 = vrow(base + 0, D)
        b1 = vrow(base + 1, D)
        g2 = vrow(base + 2, D)
        b2 = vrow(base + 3, D)
        pb = vrow(base + 4, D)
        c2 = vrow(base + 5, D)
        qb = vrow(VROW_QKVB + l, 3 * D)
        c1 = vrow(VROW_FC1B + l, MLP_HIDDEN)

        xn = _layernorm(toks, g1, b1)                                # (B*TPAD, D)
        # fused QKV: one (B*TPAD, 3D) lane-dense matmul for both batches
        qkv = jnp.dot(xn.astype(bf16), qkv_w_ref[l],
                      preferred_element_type=f32) + qb               # (B*TPAD, 3D)

        o_rows = []
        for bi in range(B):
            qkv_b = qkv[bi * TPAD:(bi + 1) * TPAD, :]                # (TPAD, 3D)
            o_heads = []
            for h in range(NH):
                q = qkv_b[:, h * HD:(h + 1) * HD].astype(bf16)
                k = qkv_b[:, D + h * HD:D + (h + 1) * HD].astype(bf16)
                v = qkv_b[:, 2 * D + h * HD:2 * D + (h + 1) * HD].astype(bf16)
                # scores: contract shared last dim (no explicit k.T)
                s = lax.dot_general(q, k, (((1,), (1,)), ((), ())),
                                    preferred_element_type=f32)      # (TPAD, TPAD)
                s = jnp.where(kv_keep, s, f32(-1e9))                 # mask pad keys
                s = s - jnp.max(s, axis=-1, keepdims=True)
                p = jnp.exp(s)
                p = p * pl.reciprocal(jnp.sum(p, axis=-1, keepdims=True),
                                      approx=True)
                o_heads.append(jnp.dot(p.astype(bf16), v,
                                       preferred_element_type=f32))  # (TPAD, HD)
            o_rows.append(jnp.concatenate(o_heads, axis=-1))         # (TPAD, D)
        o_full = jnp.concatenate(o_rows, axis=0)                     # (B*TPAD, D)

        # fused output projection: one full-depth matmul for both batches
        toks = toks + jnp.dot(o_full.astype(bf16), proj_w_ref[l],
                              preferred_element_type=f32) + pb

        xn = _layernorm(toks, g2, b2)
        hmid = _gelu(jnp.dot(xn.astype(bf16), fc1_w_ref[l],
                             preferred_element_type=f32) + c1)       # (B*TPAD, 128)
        toks = toks + jnp.dot(hmid.astype(bf16), fc2_w_ref[l],
                              preferred_element_type=f32) + c2

    # ---- final LN (CLS rows only) + MLP head + continual class masking ------
    cls = jnp.concatenate(
        [toks[bi * TPAD:bi * TPAD + 1, :] for bi in range(B)], axis=0)  # (B, D)
    feat = _layernorm(cls, vrow(VROW_LNF_G, D), vrow(VROW_LNF_B, D))
    hh = jnp.maximum(jnp.dot(feat.astype(bf16), head_w_ref[0],
                             preferred_element_type=f32) + vrow(VROW_H0B, D), 0.0)
    lg = jnp.dot(hh.astype(bf16), head_w_ref[1],
                 preferred_element_type=f32)[:, 0:NUM_CLASSES]
    lg = lg + vrow(VROW_H1B, NUM_CLASSES)                             # (B, NC)

    if apply_mask:
        task_id = task_ref[0]
        off1 = task_id * CONTINUAL_INCREMENT
        off2 = off1 + CONTINUAL_INCREMENT
        cls_idx = lax.broadcasted_iota(jnp.int32, (B, NUM_CLASSES), 1)
        keep = (cls_idx >= off1) & (cls_idx < off2)
        lg = jnp.where(keep, lg, f32(-1e11))

    logits_ref[...] = lg                                              # single store


# ----------------------------- parameters ------------------------------------
def init_params(key):
    def nrm(k, shape, std=0.02):
        return jax.random.normal(k, shape, jnp.float32) * std

    keys = iter(jax.random.split(key, 32))
    params = {
        # Conv2d(C, D, PATCH, stride=PATCH) weight flattened (D,C,p,p)->(C*p*p,D)
        "patch_w": nrm(next(keys), (CPP, D)),
        "patch_b": jnp.zeros((1, D), jnp.float32),
        "cls_token": nrm(next(keys), (1, 1, D)),
        "pos_embed": nrm(next(keys), (1, T, D)),
        "ln1_g": jnp.ones((DEPTH, 1, D), jnp.float32),
        "ln1_b": jnp.zeros((DEPTH, 1, D), jnp.float32),
        "qkv_w": nrm(next(keys), (DEPTH, D, 3 * D)),
        "qkv_b": jnp.zeros((DEPTH, 1, 3 * D), jnp.float32),
        "proj_w": nrm(next(keys), (DEPTH, D, D)),
        "proj_b": jnp.zeros((DEPTH, 1, D), jnp.float32),
        "ln2_g": jnp.ones((DEPTH, 1, D), jnp.float32),
        "ln2_b": jnp.zeros((DEPTH, 1, D), jnp.float32),
        "fc1_w": nrm(next(keys), (DEPTH, D, MLP_HIDDEN)),
        "fc1_b": jnp.zeros((DEPTH, 1, MLP_HIDDEN), jnp.float32),
        "fc2_w": nrm(next(keys), (DEPTH, MLP_HIDDEN, D)),
        "fc2_b": jnp.zeros((DEPTH, 1, D), jnp.float32),
        "ln_g": jnp.ones((1, D), jnp.float32),
        "ln_b": jnp.zeros((1, D), jnp.float32),
        # head MLP dims [D] + [D]*MLP_NUM + [NUM_CLASSES]; special_bias on last
        "head0_w": nrm(next(keys), (D, D)),
        "head0_b": jnp.zeros((1, D), jnp.float32),
        "head1_w": nrm(next(keys), (D, NUM_CLASSES)),
        "head1_b": jnp.full((1, NUM_CLASSES),
                            -math.log((1.0 - 0.01) / 0.01), jnp.float32),
    }
    return params


# ----------------------------- forward wrapper --------------------------------
def vit_forward(params, x, task_id):
    """x: (B, C, H, W) float32 (NCHW). Returns (logits, reduce_sim, dist_loss)."""
    bsz = x.shape[0]
    assert bsz == B and x.shape[1] == C and x.shape[2] == IMG and x.shape[3] == IMG
    p = PATCH
    bf16 = jnp.bfloat16

    # ---- XLA-side layout plumbing (patchify + frozen-weight packing only) ----
    # patchify NCHW -> (B, NP, C*p*p), channel-major per patch (Conv2d layout);
    # row 0 per batch is the CLS slot, rows T..TPAD-1 are sublane padding.
    patches = x.reshape(bsz, C, IMG // p, p, IMG // p, p)
    patches = patches.transpose(0, 2, 4, 1, 3, 5).reshape(bsz, NP, CPP)
    patches = jnp.concatenate(
        [jnp.zeros((bsz, 1, CPP), jnp.float32), patches,
         jnp.zeros((bsz, TPAD - T, CPP), jnp.float32)], axis=1)
    patches = patches.reshape(bsz * TPAD, CPP).astype(bf16)          # (B*TPAD, CPP)

    # additive token term per batch: cls+pos0, patch_b+pos[1:], zeros for padding
    pos = params["pos_embed"][0]                                      # (T, D)
    tok_add_one = jnp.concatenate(
        [params["cls_token"][0] + pos[0:1],
         params["patch_b"] + pos[1:],
         jnp.zeros((TPAD - T, D), jnp.float32)], axis=0)              # (TPAD, D)
    tok_add = jnp.tile(tok_add_one, (bsz, 1))                         # (B*TPAD, D)

    # fold attention scale into the q columns of the frozen qkv weight/bias
    scale_vec = jnp.concatenate(
        [jnp.full((D,), ATTN_SCALE, jnp.float32),
         jnp.ones((2 * D,), jnp.float32)])                            # (3D,)
    qkv_w = (params["qkv_w"] * scale_vec).astype(bf16)                # (DEPTH, D, 3D)
    qkv_b = params["qkv_b"][:, 0, :] * scale_vec                      # (DEPTH, 3D) f32

    # pack every (1, width) gamma/beta/bias vector into one lane-dense slab
    def row(v):
        v = jnp.asarray(v, jnp.float32).reshape(1, -1)
        return jnp.pad(v, ((0, 0), (0, VEC_W - v.shape[1])))

    rows = []
    for l in range(DEPTH):
        rows += [row(params["ln1_g"][l]), row(params["ln1_b"][l]),
                 row(params["ln2_g"][l]), row(params["ln2_b"][l]),
                 row(params["proj_b"][l]), row(params["fc2_b"][l])]
    rows += [row(params["ln_g"]), row(params["ln_b"]),
             row(params["head0_b"]), row(params["head1_b"])]
    rows += [row(qkv_b[l]) for l in range(DEPTH)]
    rows += [row(params["fc1_b"][l]) for l in range(DEPTH)]
    vecs = jnp.concatenate(rows, axis=0)                              # (VEC_ROWS, 128)
    assert vecs.shape == (VEC_ROWS, VEC_W)

    # stacked head weights (head1_w zero-padded to D columns, sliced in-kernel)
    head_w = jnp.stack(
        [params["head0_w"],
         jnp.pad(params["head1_w"], ((0, 0), (0, D - NUM_CLASSES)))]).astype(bf16)

    task = jnp.asarray(task_id, jnp.int32).reshape(1)

    kernel = functools.partial(_vit_fused_kernel,
                               apply_mask=(DATA_NAME == "imagenet_r"))
    # TODO(synk): on v7x (2 TensorCores) a batch grid with
    # dimension_semantics=("parallel",) + constant weight index_maps would shard
    # the batch across cores; kept gridless here since v5e/v6e have one TC and
    # a grid is just a serial loop at this size.
    logits = pl.pallas_call(
        kernel,
        out_shape=jax.ShapeDtypeStruct((bsz, NUM_CLASSES), jnp.float32),
        in_specs=[_SMEM] + [_VMEM] * 9,
        out_specs=_VMEM,
    )(task, patches, params["patch_w"].astype(bf16), tok_add, vecs,
      qkv_w, params["proj_w"].astype(bf16),
      params["fc1_w"].astype(bf16), params["fc2_w"].astype(bf16), head_w)

    # TODO(synk): DAP prompt-pool reduce_sim / distillation losses require the
    # prompt-generator (pgvae) internals not present in this module; the
    # wrapper forwards scalar placeholders unchanged.
    reduce_sim = jnp.float32(0.0)
    dist_loss = jnp.float32(0.0)
    return logits, reduce_sim, dist_loss


# ----------------------------- pure-JAX reference ------------------------------
def vit_reference(params, x, task_id):
    bsz = x.shape[0]
    p = PATCH
    patches = x.reshape(bsz, C, IMG // p, p, IMG // p, p)
    patches = patches.transpose(0, 2, 4, 1, 3, 5).reshape(bsz, NP, CPP)
    emb = patches @ params["patch_w"] + params["patch_b"]
    cls = jnp.broadcast_to(params["cls_token"], (bsz, 1, D))
    tok = jnp.concatenate([cls, emb], axis=1) + params["pos_embed"]

    for l in range(DEPTH):
        xn = _layernorm(tok, params["ln1_g"][l], params["ln1_b"][l])
        qkv = xn @ params["qkv_w"][l] + params["qkv_b"][l]
        qkv = qkv.reshape(bsz, T, 3, NH, HD).transpose(2, 0, 3, 1, 4)
        q, k, v = qkv[0], qkv[1], qkv[2]
        s = jnp.einsum("bhqd,bhkd->bhqk", q, k) / math.sqrt(HD)
        pa = jax.nn.softmax(s, axis=-1)
        o = jnp.einsum("bhqk,bhkd->bhqd", pa, v)
        o = o.transpose(0, 2, 1, 3).reshape(bsz, T, D)
        tok = tok + o @ params["proj_w"][l] + params["proj_b"][l]
        xn = _layernorm(tok, params["ln2_g"][l], params["ln2_b"][l])
        hm = _gelu(xn @ params["fc1_w"][l] + params["fc1_b"][l])
        tok = tok + hm @ params["fc2_w"][l] + params["fc2_b"][l]

    tok = _layernorm(tok, params["ln_g"], params["ln_b"])
    feat = tok[:, 0]
    hh = jnp.maximum(feat @ params["head0_w"] + params["head0_b"], 0.0)
    logits = hh @ params["head1_w"] + params["head1_b"]
    off1 = task_id * CONTINUAL_INCREMENT
    off2 = (task_id + 1) * CONTINUAL_INCREMENT
    idx = jnp.arange(NUM_CLASSES)
    keep = (idx >= off1) & (idx < off2)
    return jnp.where(keep[None, :], logits, jnp.float32(-1e11))


# ----------------------------- main -------------------------------------------
if __name__ == "__main__":
    key = jax.random.PRNGKey(0)
    k_param, k_x = jax.random.split(key)
    params = init_params(k_param)
    x = jax.random.normal(k_x, (B, C, IMG, IMG), jnp.float32)
    task_id = jnp.int32(1)

    fwd = jax.jit(vit_forward)
    logits, reduce_sim, dist_loss = fwd(params, x, task_id)
    jax.block_until_ready((logits, reduce_sim, dist_loss))

    assert logits.shape == (B, NUM_CLASSES)
    ref_logits = vit_reference(params, x, task_id)
    assert jnp.allclose(logits, ref_logits, rtol=5e-2, atol=5e-2), (
        "Pallas output mismatch vs pure-JAX reference")
    print("KERNEL_OK")
</pallas_src>

<mosaic_0001>
module attributes {stable_mosaic.version = 11 : i64} {
  func.func @_vit_fused_kernel(%arg0: memref<1xi32, #tpu.memory_space<smem>>, %arg1: memref<48x48xbf16, #tpu.memory_space<vmem>>, %arg2: memref<48x32xbf16, #tpu.memory_space<vmem>>, %arg3: memref<48x32xf32, #tpu.memory_space<vmem>>, %arg4: memref<20x128xf32, #tpu.memory_space<vmem>>, %arg5: memref<2x32x96xbf16, #tpu.memory_space<vmem>>, %arg6: memref<2x32x32xbf16, #tpu.memory_space<vmem>>, %arg7: memref<2x32x128xbf16, #tpu.memory_space<vmem>>, %arg8: memref<2x128x32xbf16, #tpu.memory_space<vmem>>, %arg9: memref<2x32x32xbf16, #tpu.memory_space<vmem>>, %arg10: memref<2x10xf32, #tpu.memory_space<vmem>>) attributes {dimension_semantics = [], scalar_prefetch = 0 : i64, scratch_operands = 0 : i64, tpu.core_type = #tpu.core_type<tc>} {
    %c0 = arith.constant 0 : index
    %c0_0 = arith.constant 0 : index
    %0 = vector.load %arg4[%c0, %c0_0] : memref<20x128xf32, #tpu.memory_space<vmem>>, vector<20x128xf32>
    %c0_1 = arith.constant 0 : index
    %c0_2 = arith.constant 0 : index
    %1 = vector.load %arg1[%c0_1, %c0_2] : memref<48x48xbf16, #tpu.memory_space<vmem>>, vector<48x48xbf16>
    %c0_3 = arith.constant 0 : index
    %c0_4 = arith.constant 0 : index
    %2 = vector.load %arg2[%c0_3, %c0_4] : memref<48x32xbf16, #tpu.memory_space<vmem>>, vector<48x32xbf16>
    %cst = arith.constant dense<0.000000e+00> : vector<48x32xf32>
    %3 = tpu.matmul %1, %2, %cst {dimension_numbers = #tpu.dot_dimension_numbers<[1], [0], [0], [1], [0, 0, 1, 1], [], []>} : vector<48x48xbf16>, vector<48x32xbf16>, vector<48x32xf32> -> vector<48x32xf32>
    %c0_5 = arith.constant 0 : index
    %c0_6 = arith.constant 0 : index
    %4 = vector.load %arg3[%c0_5, %c0_6] : memref<48x32xf32, #tpu.memory_space<vmem>>, vector<48x32xf32>
    %5 = arith.addf %3, %4 : vector<48x32xf32>
    %6 = tpu.iota {dimensions = array<i32: 1>} : vector<24x24xi32>
    %c17_i32 = arith.constant 17 : i32
    %7 = vector.broadcast %c17_i32 : i32 to vector<24x24xi32>
    %8 = arith.cmpi slt, %6, %7 : vector<24x24xi32>
    %9 = vector.extract_strided_slice %0 {offsets = [0, 0], sizes = [1, 32], strides = [1, 1]} : vector<20x128xf32> to vector<1x32xf32>
    %10 = vector.extract_strided_slice %0 {offsets = [1, 0], sizes = [1, 32], strides = [1, 1]} : vector<20x128xf32> to vector<1x32xf32>
    %11 = vector.extract_strided_slice %0 {offsets = [2, 0], sizes = [1, 32], strides = [1, 1]} : vector<20x128xf32> to vector<1x32xf32>
    %12 = vector.extract_strided_slice %0 {offsets = [3, 0], sizes = [1, 32], strides = [1, 1]} : vector<20x128xf32> to vector<1x32xf32>
    %13 = vector.extract_strided_slice %0 {offsets = [4, 0], sizes = [1, 32], strides = [1, 1]} : vector<20x128xf32> to vector<1x32xf32>
    %14 = vector.extract_strided_slice %0 {offsets = [5, 0], sizes = [1, 32], strides = [1, 1]} : vector<20x128xf32> to vector<1x32xf32>
    %15 = vector.extract_strided_slice %0 {offsets = [16, 0], sizes = [1, 96], strides = [1, 1]} : vector<20x128xf32> to vector<1x96xf32>
    %16 = vector.extract_strided_slice %0 {offsets = [18, 0], sizes = [1, 128], strides = [1, 1]} : vector<20x128xf32> to vector<1x128xf32>
    %cst_7 = arith.constant dense<0.000000e+00> : vector<48xf32>
    %17 = vector.multi_reduction <add>, %5, %cst_7 [1] : vector<48x32xf32> to vector<48xf32>
    %18 = vector.shape_cast %17 : vector<48xf32> to vector<48x1xf32>
    %cst_8 = arith.constant 3.200000e+01 : f32
    %19 = vector.broadcast %cst_8 : f32 to vector<48x1xf32>
    %20 = arith.divf %18, %19 : vector<48x1xf32>
    %21 = vector.broadcast %20 : vector<48x1xf32> to vector<48x32xf32>
    %22 = arith.subf %5, %21 : vector<48x32xf32>
    %23 = arith.mulf %22, %22 : vector<48x32xf32>
    %cst_9 = arith.constant dense<0.000000e+00> : vector<48xf32>
    %24 = vector.multi_reduction <add>, %23, %cst_9 [1] : vector<48x32xf32> to vector<48xf32>
    %25 = vector.shape_cast %24 : vector<48xf32> to vector<48x1xf32>
    %cst_10 = arith.constant 3.200000e+01 : f32
    %26 = vector.broadcast %cst_10 : f32 to vector<48x1xf32>
    %27 = arith.divf %25, %26 : vector<48x1xf32>
    %cst_11 = arith.constant 9.99999997E-7 : f32
    %28 = vector.broadcast %cst_11 : f32 to vector<48x1xf32>
    %29 = arith.addf %27, %28 : vector<48x1xf32>
    %30 = math.rsqrt %29 : vector<48x1xf32>
    %31 = vector.broadcast %30 : vector<48x1xf32> to vector<48x32xf32>
    %32 = arith.mulf %22, %31 : vector<48x32xf32>
    %33 = vector.broadcast %9 : vector<1x32xf32> to vector<48x32xf32>
    %34 = arith.mulf %32, %33 : vector<48x32xf32>
    %35 = vector.broadcast %10 : vector<1x32xf32> to vector<48x32xf32>
    %36 = arith.addf %34, %35 : vector<48x32xf32>
    %37 = arith.truncf %36 : vector<48x32xf32> to vector<48x32xbf16>
    %c0_12 = arith.constant 0 : index
    %c0_13 = arith.constant 0 : index
    %c0_14 = arith.constant 0 : index
    %38 = vector.load %arg5[%c0_12, %c0_13, %c0_14] : memref<2x32x96xbf16, #tpu.memory_space<vmem>>, vector<1x32x96xbf16>
    %39 = vector.shape_cast %38 : vector<1x32x96xbf16> to vector<32x96xbf16>
    %cst_15 = arith.constant dense<0.000000e+00> : vector<48x96xf32>
    %40 = tpu.matmul %37, %39, %cst_15 {dimension_numbers = #tpu.dot_dimension_numbers<[1], [0], [0], [1], [0, 0, 1, 1], [], []>} : vector<48x32xbf16>, vector<32x96xbf16>, vector<48x96xf32> -> vector<48x96xf32>
    %41 = vector.broadcast %15 : vector<1x96xf32> to vector<48x96xf32>
    %42 = arith.addf %40, %41 : vector<48x96xf32>
    %43 = vector.extract_strided_slice %42 {offsets = [0, 0], sizes = [24, 96], strides = [1, 1]} : vector<48x96xf32> to vector<24x96xf32>
    %44 = vector.extract_strided_slice %43 {offsets = [0, 0], sizes = [24, 8], strides = [1, 1]} : vector<24x96xf32> to vector<24x8xf32>
    %45 = arith.truncf %44 : vector<24x8xf32> to vector<24x8xbf16>
    %46 = vector.extract_strided_slice %43 {offsets = [0, 32], sizes = [24, 8], strides = [1, 1]} : vector<24x96xf32> to vector<24x8xf32>
    %47 = arith.truncf %46 : vector<24x8xf32> to vector<24x8xbf16>
    %48 = vector.extract_strided_slice %43 {offsets = [0, 64], sizes = [24, 8], strides = [1, 1]} : vector<24x96xf32> to vector<24x8xf32>
    %49 = arith.truncf %48 : vector<24x8xf32> to vector<24x8xbf16>
    %cst_16 = arith.constant dense<0.000000e+00> : vector<24x24xf32>
    %50 = tpu.matmul %45, %47, %cst_16 {dimension_numbers = #tpu.dot_dimension_numbers<[1], [1], [0], [0], [0, 0, 1, 0], [], []>} : vector<24x8xbf16>, vector<24x8xbf16>, vector<24x24xf32> -> vector<24x24xf32>
    %cst_17 = arith.constant -1.000000e+09 : f32
    %51 = vector.broadcast %cst_17 : f32 to vector<24x24xf32>
    %52 = arith.select %8, %50, %51 : vector<24x24xi1>, vector<24x24xf32>
    %cst_18 = arith.constant dense<0xFF800000> : vector<24xf32>
    %53 = vector.multi_reduction <maximumf>, %52, %cst_18 [1] : vector<24x24xf32> to vector<24xf32>
    %54 = vector.shape_cast %53 : vector<24xf32> to vector<24x1xf32>
    %55 = vector.broadcast %54 : vector<24x1xf32> to vector<24x24xf32>
    %56 = arith.subf %52, %55 : vector<24x24xf32>
    %57 = math.exp %56 : vector<24x24xf32>
    %cst_19 = arith.constant dense<0.000000e+00> : vector<24xf32>
    %58 = vector.multi_reduction <add>, %57, %cst_19 [1] : vector<24x24xf32> to vector<24xf32>
    %59 = vector.shape_cast %58 : vector<24xf32> to vector<24x1xf32>
    %60 = tpu.reciprocal %59 {approx = true} : vector<24x1xf32> -> vector<24x1xf32>
    %61 = vector.broadcast %60 : vector<24x1xf32> to vector<24x24xf32>
    %62 = arith.mulf %57, %61 : vector<24x24xf32>
    %63 = arith.truncf %62 : vector<24x24xf32> to vector<24x24xbf16>
    %cst_20 = arith.constant dense<0.000000e+00> : vector<24x8xf32>
    %64 = tpu.matmul %63, %49, %cst_20 {dimension_numbers = #tpu.dot_dimension_numbers<[1], [0], [0], [1], [0, 0, 1, 1], [], []>} : vector<24x24xbf16>, vector<24x8xbf16>, vector<24x8xf32> -> vector<24x8xf32>
    %65 = vector.extract_strided_slice %43 {offsets = [0, 8], sizes = [24, 8], strides = [1, 1]} : vector<24x96xf32> to vector<24x8xf32>
    %66 = arith.truncf %65 : vector<24x8xf32> to vector<24x8xbf16>
    %67 = vector.extract_strided_slice %43 {offsets = [0, 40], sizes = [24, 8], strides = [1, 1]} : vector<24x96xf32> to vector<24x8xf32>
    %68 = arith.truncf %67 : vector<24x8xf32> to vector<24x8xbf16>
    %69 = vector.extract_strided_slice %43 {offsets = [0, 72], sizes = [24, 8], strides = [1, 1]} : vector<24x96xf32> to vector<24x8xf32>
    %70 = arith.truncf %69 : vector<24x8xf32> to vector<24x8xbf16>
    %cst_21 = arith.constant dense<0.000000e+00> : vector<24x24xf32>
    %71 = tpu.matmul %66, %68, %cst_21 {dimension_numbers = #tpu.dot_dimension_numbers<[1], [1], [0], [0], [0, 0, 1, 0], [], []>} : vector<24x8xbf16>, vector<24x8xbf16>, vector<24x24xf32> -> vector<24x24xf32>
    %cst_22 = arith.constant -1.000000e+09 : f32
    %72 = vector.broadcast %cst_22 : f32 to vector<24x24xf32>
    %73 = arith.select %8, %71, %72 : vector<24x24xi1>, vector<24x24xf32>
    %cst_23 = arith.constant dense<0xFF800000> : vector<24xf32>
    %74 = vector.multi_reduction <maximumf>, %73, %cst_23 [1] : vector<24x24xf32> to vector<24xf32>
    %75 = vector.shape_cast %74 : vector<24xf32> to vector<24x1xf32>
    %76 = vector.broadcast %75 : vector<24x1xf32> to vector<24x24xf32>
    %77 = arith.subf %73, %76 : vector<24x24xf32>
    %78 = math.exp %77 : vector<24x24xf32>
    %cst_24 = arith.constant dense<0.000000e+00> : vector<24xf32>
    %79 = vector.multi_reduction <add>, %78, %cst_24 [1] : vector<24x24xf32> to vector<24xf32>
    %80 = vector.shape_cast %79 : vector<24xf32> to vector<24x1xf32>
    %81 = tpu.reciprocal %80 {approx = true} : vector<24x1xf32> -> vector<24x1xf32>
    %82 = vector.broadcast %81 : vector<24x1xf32> to vector<24x24xf32>
    %83 = arith.mulf %78, %82 : vector<24x24xf32>
    %84 = arith.truncf %83 : vector<24x24xf32> to vector<24x24xbf16>
    %cst_25 = arith.constant dense<0.000000e+00> : vector<24x8xf32>
    %85 = tpu.matmul %84, %70, %cst_25 {dimension_numbers = #tpu.dot_dimension_numbers<[1], [0], [0], [1], [0, 0, 1, 1], [], []>} : vector<24x24xbf16>, vector<24x8xbf16>, vector<24x8xf32> -> vector<24x8xf32>
    %86 = vector.extract_strided_slice %43 {offsets = [0, 16], sizes = [24, 8], strides = [1, 1]} : vector<24x96xf32> to vector<24x8xf32>
    %87 = arith.truncf %86 : vector<24x8xf32> to vector<24x8xbf16>
    %88 = vector.extract_strided_slice %43 {offsets = [0, 48], sizes = [24, 8], strides = [1, 1]} : vector<24x96xf32> to vector<24x8xf32>
    %89 = arith.truncf %88 : vector<24x8xf32> to vector<24x8xbf16>
    %90 = vector.extract_strided_slice %43 {offsets = [0, 80], sizes = [24, 8], strides = [1, 1]} : vector<24x96xf32> to vector<24x8xf32>
    %91 = arith.truncf %90 : vector<24x8xf32> to vector<24x8xbf16>
    %cst_26 = arith.constant dense<0.000000e+00> : vector<24x24xf32>
    %92 = tpu.matmul %87, %89, %cst_26 {dimension_numbers = #tpu.dot_dimension_numbers<[1], [1], [0], [0], [0, 0, 1, 0], [], []>} : vector<24x8xbf16>, vector<24x8xbf16>, vector<24x24xf32> -> vector<24x24xf32>
    %cst_27 = arith.constant -1.000000e+09 : f32
    %93 = vector.broadcast %cst_27 : f32 to vector<24x24xf32>
    %94 = arith.select %8, %92, %93 : vector<24x24xi1>, vector<24x24xf32>
    %cst_28 = arith.constant dense<0xFF800000> : vector<24xf32>
    %95 = vector.multi_reduction <maximumf>, %94, %cst_28 [1] : vector<24x24xf32> to vector<24xf32>
    %96 = vector.shape_cast %95 : vector<24xf32> to vector<24x1xf32>
    %97 = vector.broadcast %96 : vector<24x1xf32> to vector<24x24xf32>
    %98 = arith.subf %94, %97 : vector<24x24xf32>
    %99 = math.exp %98 : vector<24x24xf32>
    %cst_29 = arith.constant dense<0.000000e+00> : vector<24xf32>
    %100 = vector.multi_reduction <add>, %99, %cst_29 [1] : vector<24x24xf32> to vector<24xf32>
    %101 = vector.shape_cast %100 : vector<24xf32> to vector<24x1xf32>
    %102 = tpu.reciprocal %101 {approx = true} : vector<24x1xf32> -> vector<24x1xf32>
    %103 = vector.broadcast %102 : vector<24x1xf32> to vector<24x24xf32>
    %104 = arith.mulf %99, %103 : vector<24x24xf32>
    %105 = arith.truncf %104 : vector<24x24xf32> to vector<24x24xbf16>
    %cst_30 = arith.constant dense<0.000000e+00> : vector<24x8xf32>
    %106 = tpu.matmul %105, %91, %cst_30 {dimension_numbers = #tpu.dot_dimension_numbers<[1], [0], [0], [1], [0, 0, 1, 1], [], []>} : vector<24x24xbf16>, vector<24x8xbf16>, vector<24x8xf32> -> vector<24x8xf32>
    %107 = vector.extract_strided_slice %43 {offsets = [0, 24], sizes = [24, 8], strides = [1, 1]} : vector<24x96xf32> to vector<24x8xf32>
    %108 = arith.truncf %107 : vector<24x8xf32> to vector<24x8xbf16>
    %109 = vector.extract_strided_slice %43 {offsets = [0, 56], sizes = [24, 8], strides = [1, 1]} : vector<24x96xf32> to vector<24x8xf32>
    %110 = arith.truncf %109 : vector<24x8xf32> to vector<24x8xbf16>
    %111 = vector.extract_strided_slice %43 {offsets = [0, 88], sizes = [24, 8], strides = [1, 1]} : vector<24x96xf32> to vector<24x8xf32>
    %112 = arith.truncf %111 : vector<24x8xf32> to vector<24x8xbf16>
    %cst_31 = arith.constant dense<0.000000e+00> : vector<24x24xf32>
    %113 = tpu.matmul %108, %110, %cst_31 {dimension_numbers = #tpu.dot_dimension_numbers<[1], [1], [0], [0], [0, 0, 1, 0], [], []>} : vector<24x8xbf16>, vector<24x8xbf16>, vector<24x24xf32> -> vector<24x24xf32>
    %cst_32 = arith.constant -1.000000e+09 : f32
    %114 = vector.broadcast %cst_32 : f32 to vector<24x24xf32>
    %115 = arith.select %8, %113, %114 : vector<24x24xi1>, vector<24x24xf32>
    %cst_33 = arith.constant dense<0xFF800000> : vector<24xf32>
    %116 = vector.multi_reduction <maximumf>, %115, %cst_33 [1] : vector<24x24xf32> to vector<24xf32>
    %117 = vector.shape_cast %116 : vector<24xf32> to vector<24x1xf32>
    %118 = vector.broadcast %117 : vector<24x1xf32> to vector<24x24xf32>
    %119 = arith.subf %115, %118 : vector<24x24xf32>
    %120 = math.exp %119 : vector<24x24xf32>
    %cst_34 = arith.constant dense<0.000000e+00> : vector<24xf32>
    %121 = vector.multi_reduction <add>, %120, %cst_34 [1] : vector<24x24xf32> to vector<24xf32>
    %122 = vector.shape_cast %121 : vector<24xf32> to vector<24x1xf32>
    %123 = tpu.reciprocal %122 {approx = true} : vector<24x1xf32> -> vector<24x1xf32>
    %124 = vector.broadcast %123 : vector<24x1xf32> to vector<24x24xf32>
    %125 = arith.mulf %120, %124 : vector<24x24xf32>
    %126 = arith.truncf %125 : vector<24x24xf32> to vector<24x24xbf16>
    %cst_35 = arith.constant dense<0.000000e+00> : vector<24x8xf32>
    %127 = tpu.matmul %126, %112, %cst_35 {dimension_numbers = #tpu.dot_dimension_numbers<[1], [0], [0], [1], [0, 0, 1, 1], [], []>} : vector<24x24xbf16>, vector<24x8xbf16>, vector<24x8xf32> -> vector<24x8xf32>
    %128 = tpu.concatenate %64, %85, %106, %127 in 1 : vector<24x8xf32>, vector<24x8xf32>, vector<24x8xf32>, vector<24x8xf32> -> vector<24x32xf32>
    %129 = vector.extract_strided_slice %42 {offsets = [24, 0], sizes = [24, 96], strides = [1, 1]} : vector<48x96xf32> to vector<24x96xf32>
    %130 = vector.extract_strided_slice %129 {offsets = [0, 0], sizes = [24, 8], strides = [1, 1]} : vector<24x96xf32> to vector<24x8xf32>
    %131 = arith.truncf %130 : vector<24x8xf32> to vector<24x8xbf16>
    %132 = vector.extract_strided_slice %129 {offsets = [0, 32], sizes = [24, 8], strides = [1, 1]} : vector<24x96xf32> to vector<24x8xf32>
    %133 = arith.truncf %132 : vector<24x8xf32> to vector<24x8xbf16>
    %134 = vector.extract_strided_slice %129 {offsets = [0, 64], sizes = [24, 8], strides = [1, 1]} : vector<24x96xf32> to vector<24x8xf32>
    %135 = arith.truncf %134 : vector<24x8xf32> to vector<24x8xbf16>
    %cst_36 = arith.constant dense<0.000000e+00> : vector<24x24xf32>
    %136 = tpu.matmul %131, %133, %cst_36 {dimension_numbers = #tpu.dot_dimension_numbers<[1], [1], [0], [0], [0, 0, 1, 0], [], []>} : vector<24x8xbf16>, vector<24x8xbf16>, vector<24x24xf32> -> vector<24x24xf32>
    %cst_37 = arith.constant -1.000000e+09 : f32
    %137 = vector.broadcast %cst_37 : f32 to vector<24x24xf32>
    %138 = arith.select %8, %136, %137 : vector<24x24xi1>, vector<24x24xf32>
    %cst_38 = arith.constant dense<0xFF800000> : vector<24xf32>
    %139 = vector.multi_reduction <maximumf>, %138, %cst_38 [1] : vector<24x24xf32> to vector<24xf32>
    %140 = vector.shape_cast %139 : vector<24xf32> to vector<24x1xf32>
    %141 = vector.broadcast %140 : vector<24x1xf32> to vector<24x24xf32>
    %142 = arith.subf %138, %141 : vector<24x24xf32>
    %143 = math.exp %142 : vector<24x24xf32>
    %cst_39 = arith.constant dense<0.000000e+00> : vector<24xf32>
    %144 = vector.multi_reduction <add>, %143, %cst_39 [1] : vector<24x24xf32> to vector<24xf32>
    %145 = vector.shape_cast %144 : vector<24xf32> to vector<24x1xf32>
    %146 = tpu.reciprocal %145 {approx = true} : vector<24x1xf32> -> vector<24x1xf32>
    %147 = vector.broadcast %146 : vector<24x1xf32> to vector<24x24xf32>
    %148 = arith.mulf %143, %147 : vector<24x24xf32>
    %149 = arith.truncf %148 : vector<24x24xf32> to vector<24x24xbf16>
    %cst_40 = arith.constant dense<0.000000e+00> : vector<24x8xf32>
    %150 = tpu.matmul %149, %135, %cst_40 {dimension_numbers = #tpu.dot_dimension_numbers<[1], [0], [0], [1], [0, 0, 1, 1], [], []>} : vector<24x24xbf16>, vector<24x8xbf16>, vector<24x8xf32> -> vector<24x8xf32>
    %151 = vector.extract_strided_slice %129 {offsets = [0, 8], sizes = [24, 8], strides = [1, 1]} : vector<24x96xf32> to vector<24x8xf32>
    %152 = arith.truncf %151 : vector<24x8xf32> to vector<24x8xbf16>
    %153 = vector.extract_strided_slice %129 {offsets = [0, 40], sizes = [24, 8], strides = [1, 1]} : vector<24x96xf32> to vector<24x8xf32>
    %154 = arith.truncf %153 : vector<24x8xf32> to vector<24x8xbf16>
    %155 = vector.extract_strided_slice %129 {offsets = [0, 72], sizes = [24, 8], strides = [1, 1]} : vector<24x96xf32> to vector<24x8xf32>
    %156 = arith.truncf %155 : vector<24x8xf32> to vector<24x8xbf16>
    %cst_41 = arith.constant dense<0.000000e+00> : vector<24x24xf32>
    %157 = tpu.matmul %152, %154, %cst_41 {dimension_numbers = #tpu.dot_dimension_numbers<[1], [1], [0], [0], [0, 0, 1, 0], [], []>} : vector<24x8xbf16>, vector<24x8xbf16>, vector<24x24xf32> -> vector<24x24xf32>
    %cst_42 = arith.constant -1.000000e+09 : f32
    %158 = vector.broadcast %cst_42 : f32 to vector<24x24xf32>
    %159 = arith.select %8, %157, %158 : vector<24x24xi1>, vector<24x24xf32>
    %cst_43 = arith.constant dense<0xFF800000> : vector<24xf32>
    %160 = vector.multi_reduction <maximumf>, %159, %cst_43 [1] : vector<24x24xf32> to vector<24xf32>
    %161 = vector.shape_cast %160 : vector<24xf32> to vector<24x1xf32>
    %162 = vector.broadcast %161 : vector<24x1xf32> to vector<24x24xf32>
    %163 = arith.subf %159, %162 : vector<24x24xf32>
    %164 = math.exp %163 : vector<24x24xf32>
    %cst_44 = arith.constant dense<0.000000e+00> : vector<24xf32>
    %165 = vector.multi_reduction <add>, %164, %cst_44 [1] : vector<24x24xf32> to vector<24xf32>
    %166 = vector.shape_cast %165 : vector<24xf32> to vector<24x1xf32>
    %167 = tpu.reciprocal %166 {approx = true} : vector<24x1xf32> -> vector<24x1xf32>
    %168 = vector.broadcast %167 : vector<24x1xf32> to vector<24x24xf32>
    %169 = arith.mulf %164, %168 : vector<24x24xf32>
    %170 = arith.truncf %169 : vector<24x24xf32> to vector<24x24xbf16>
    %cst_45 = arith.constant dense<0.000000e+00> : vector<24x8xf32>
    %171 = tpu.matmul %170, %156, %cst_45 {dimension_numbers = #tpu.dot_dimension_numbers<[1], [0], [0], [1], [0, 0, 1, 1], [], []>} : vector<24x24xbf16>, vector<24x8xbf16>, vector<24x8xf32> -> vector<24x8xf32>
    %172 = vector.extract_strided_slice %129 {offsets = [0, 16], sizes = [24, 8], strides = [1, 1]} : vector<24x96xf32> to vector<24x8xf32>
    %173 = arith.truncf %172 : vector<24x8xf32> to vector<24x8xbf16>
    %174 = vector.extract_strided_slice %129 {offsets = [0, 48], sizes = [24, 8], strides = [1, 1]} : vector<24x96xf32> to vector<24x8xf32>
    %175 = arith.truncf %174 : vector<24x8xf32> to vector<24x8xbf16>
    %176 = vector.extract_strided_slice %129 {offsets = [0, 80], sizes = [24, 8], strides = [1, 1]} : vector<24x96xf32> to vector<24x8xf32>
    %177 = arith.truncf %176 : vector<24x8xf32> to vector<24x8xbf16>
    %cst_46 = arith.constant dense<0.000000e+00> : vector<24x24xf32>
    %178 = tpu.matmul %173, %175, %cst_46 {dimension_numbers = #tpu.dot_dimension_numbers<[1], [1], [0], [0], [0, 0, 1, 0], [], []>} : vector<24x8xbf16>, vector<24x8xbf16>, vector<24x24xf32> -> vector<24x24xf32>
    %cst_47 = arith.constant -1.000000e+09 : f32
    %179 = vector.broadcast %cst_47 : f32 to vector<24x24xf32>
    %180 = arith.select %8, %178, %179 : vector<24x24xi1>, vector<24x24xf32>
    %cst_48 = arith.constant dense<0xFF800000> : vector<24xf32>
    %181 = vector.multi_reduction <maximumf>, %180, %cst_48 [1] : vector<24x24xf32> to vector<24xf32>
    %182 = vector.shape_cast %181 : vector<24xf32> to vector<24x1xf32>
    %183 = vector.broadcast %182 : vector<24x1xf32> to vector<24x24xf32>
    %184 = arith.subf %180, %183 : vector<24x24xf32>
    %185 = math.exp %184 : vector<24x24xf32>
    %cst_49 = arith.constant dense<0.000000e+00> : vector<24xf32>
    %186 = vector.multi_reduction <add>, %185, %cst_49 [1] : vector<24x24xf32> to vector<24xf32>
    %187 = vector.shape_cast %186 : vector<24xf32> to vector<24x1xf32>
    %188 = tpu.reciprocal %187 {approx = true} : vector<24x1xf32> -> vector<24x1xf32>
    %189 = vector.broadcast %188 : vector<24x1xf32> to vector<24x24xf32>
    %190 = arith.mulf %185, %189 : vector<24x24xf32>
    %191 = arith.truncf %190 : vector<24x24xf32> to vector<24x24xbf16>
    %cst_50 = arith.constant dense<0.000000e+00> : vector<24x8xf32>
    %192 = tpu.matmul %191, %177, %cst_50 {dimension_numbers = #tpu.dot_dimension_numbers<[1], [0], [0], [1], [0, 0, 1, 1], [], []>} : vector<24x24xbf16>, vector<24x8xbf16>, vector<24x8xf32> -> vector<24x8xf32>
    %193 = vector.extract_strided_slice %129 {offsets = [0, 24], sizes = [24, 8], strides = [1, 1]} : vector<24x96xf32> to vector<24x8xf32>
    %194 = arith.truncf %193 : vector<24x8xf32> to vector<24x8xbf16>
    %195 = vector.extract_strided_slice %129 {offsets = [0, 56], sizes = [24, 8], strides = [1, 1]} : vector<24x96xf32> to vector<24x8xf32>
    %196 = arith.truncf %195 : vector<24x8xf32> to vector<24x8xbf16>
    %197 = vector.extract_strided_slice %129 {offsets = [0, 88], sizes = [24, 8], strides = [1, 1]} : vector<24x96xf32> to vector<24x8xf32>
    %198 = arith.truncf %197 : vector<24x8xf32> to vector<24x8xbf16>
    %cst_51 = arith.constant dense<0.000000e+00> : vector<24x24xf32>
    %199 = tpu.matmul %194, %196, %cst_51 {dimension_numbers = #tpu.dot_dimension_numbers<[1], [1], [0], [0], [0, 0, 1, 0], [], []>} : vector<24x8xbf16>, vector<24x8xbf16>, vector<24x24xf32> -> vector<24x24xf32>
    %cst_52 = arith.constant -1.000000e+09 : f32
    %200 = vector.broadcast %cst_52 : f32 to vector<24x24xf32>
    %201 = arith.select %8, %199, %200 : vector<24x24xi1>, vector<24x24xf32>
    %cst_53 = arith.constant dense<0xFF800000> : vector<24xf32>
    %202 = vector.multi_reduction <maximumf>, %201, %cst_53 [1] : vector<24x24xf32> to vector<24xf32>
    %203 = vector.shape_cast %202 : vector<24xf32> to vector<24x1xf32>
    %204 = vector.broadcast %203 : vector<24x1xf32> to vector<24x24xf32>
    %205 = arith.subf %201, %204 : vector<24x24xf32>
    %206 = math.exp %205 : vector<24x24xf32>
    %cst_54 = arith.constant dense<0.000000e+00> : vector<24xf32>
    %207 = vector.multi_reduction <add>, %206, %cst_54 [1] : vector<24x24xf32> to vector<24xf32>
    %208 = vector.shape_cast %207 : vector<24xf32> to vector<24x1xf32>
    %209 = tpu.reciprocal %208 {approx = true} : vector<24x1xf32> -> vector<24x1xf32>
    %210 = vector.broadcast %209 : vector<24x1xf32> to vector<24x24xf32>
    %211 = arith.mulf %206, %210 : vector<24x24xf32>
    %212 = arith.truncf %211 : vector<24x24xf32> to vector<24x24xbf16>
    %cst_55 = arith.constant dense<0.000000e+00> : vector<24x8xf32>
    %213 = tpu.matmul %212, %198, %cst_55 {dimension_numbers = #tpu.dot_dimension_numbers<[1], [0], [0], [1], [0, 0, 1, 1], [], []>} : vector<24x24xbf16>, vector<24x8xbf16>, vector<24x8xf32> -> vector<24x8xf32>
    %214 = tpu.concatenate %150, %171, %192, %213 in 1 : vector<24x8xf32>, vector<24x8xf32>, vector<24x8xf32>, vector<24x8xf32> -> vector<24x32xf32>
    %215 = tpu.concatenate %128, %214 in 0 : vector<24x32xf32>, vector<24x32xf32> -> vector<48x32xf32>
    %216 = arith.truncf %215 : vector<48x32xf32> to vector<48x32xbf16>
    %c0_56 = arith.constant 0 : index
    %c0_57 = arith.constant 0 : index
    %c0_58 = arith.constant 0 : index
    %217 = vector.load %arg6[%c0_56, %c0_57, %c0_58] : memref<2x32x32xbf16, #tpu.memory_space<vmem>>, vector<1x32x32xbf16>
    %218 = vector.shape_cast %217 : vector<1x32x32xbf16> to vector<32x32xbf16>
    %cst_59 = arith.constant dense<0.000000e+00> : vector<48x32xf32>
    %219 = tpu.matmul %216, %218, %cst_59 {dimension_numbers = #tpu.dot_dimension_numbers<[1], [0], [0], [1], [0, 0, 1, 1], [], []>} : vector<48x32xbf16>, vector<32x32xbf16>, vector<48x32xf32> -> vector<48x32xf32>
    %220 = arith.addf %5, %219 : vector<48x32xf32>
    %221 = vector.broadcast %13 : vector<1x32xf32> to vector<48x32xf32>
    %222 = arith.addf %220, %221 : vector<48x32xf32>
    %cst_60 = arith.constant dense<0.000000e+00> : vector<48xf32>
    %223 = vector.multi_reduction <add>, %222, %cst_60 [1] : vector<48x32xf32> to vector<48xf32>
    %224 = vector.shape_cast %223 : vector<48xf32> to vector<48x1xf32>
    %cst_61 = arith.constant 3.200000e+01 : f32
    %225 = vector.broadcast %cst_61 : f32 to vector<48x1xf32>
    %226 = arith.divf %224, %225 : vector<48x1xf32>
    %227 = vector.broadcast %226 : vector<48x1xf32> to vector<48x32xf32>
    %228 = arith.subf %222, %227 : vector<48x32xf32>
    %229 = arith.mulf %228, %228 : vector<48x32xf32>
    %cst_62 = arith.constant dense<0.000000e+00> : vector<48xf32>
    %230 = vector.multi_reduction <add>, %229, %cst_62 [1] : vector<48x32xf32> to vector<48xf32>
    %231 = vector.shape_cast %230 : vector<48xf32> to vector<48x1xf32>
    %cst_63 = arith.constant 3.200000e+01 : f32
    %232 = vector.broadcast %cst_63 : f32 to vector<48x1xf32>
    %233 = arith.divf %231, %232 : vector<48x1xf32>
    %cst_64 = arith.constant 9.99999997E-7 : f32
    %234 = vector.broadcast %cst_64 : f32 to vector<48x1xf32>
    %235 = arith.addf %233, %234 : vector<48x1xf32>
    %236 = math.rsqrt %235 : vector<48x1xf32>
    %237 = vector.broadcast %236 : vector<48x1xf32> to vector<48x32xf32>
    %238 = arith.mulf %228, %237 : vector<48x32xf32>
    %239 = vector.broadcast %11 : vector<1x32xf32> to vector<48x32xf32>
    %240 = arith.mulf %238, %239 : vector<48x32xf32>
    %241 = vector.broadcast %12 : vector<1x32xf32> to vector<48x32xf32>
    %242 = arith.addf %240, %241 : vector<48x32xf32>
    %243 = arith.truncf %242 : vector<48x32xf32> to vector<48x32xbf16>
    %c0_65 = arith.constant 0 : index
    %c0_66 = arith.constant 0 : index
    %c0_67 = arith.constant 0 : index
    %244 = vector.load %arg7[%c0_65, %c0_66, %c0_67] : memref<2x32x128xbf16, #tpu.memory_space<vmem>>, vector<1x32x128xbf16>
    %245 = vector.shape_cast %244 : vector<1x32x128xbf16> to vector<32x128xbf16>
    %cst_68 = arith.constant dense<0.000000e+00> : vector<48x128xf32>
    %246 = tpu.matmul %243, %245, %cst_68 {dimension_numbers = #tpu.dot_dimension_numbers<[1], [0], [0], [1], [0, 0, 1, 1], [], []>} : vector<48x32xbf16>, vector<32x128xbf16>, vector<48x128xf32> -> vector<48x128xf32>
    %247 = vector.broadcast %16 : vector<1x128xf32> to vector<48x128xf32>
    %248 = arith.addf %246, %247 : vector<48x128xf32>
    %cst_69 = arith.constant 5.000000e-01 : f32
    %249 = vector.broadcast %cst_69 : f32 to vector<48x128xf32>
    %250 = arith.mulf %249, %248 : vector<48x128xf32>
    %251 = arith.mulf %248, %248 : vector<48x128xf32>
    %252 = arith.mulf %251, %248 : vector<48x128xf32>
    %cst_70 = arith.constant 4.471500e-02 : f32
    %253 = vector.broadcast %cst_70 : f32 to vector<48x128xf32>
    %254 = arith.mulf %253, %252 : vector<48x128xf32>
    %255 = arith.addf %248, %254 : vector<48x128xf32>
    %cst_71 = arith.constant 0.797884583 : f32
    %256 = vector.broadcast %cst_71 : f32 to vector<48x128xf32>
    %257 = arith.mulf %256, %255 : vector<48x128xf32>
    %258 = math.tanh %257 : vector<48x128xf32>
    %cst_72 = arith.constant 1.000000e+00 : f32
    %259 = vector.broadcast %cst_72 : f32 to vector<48x128xf32>
    %260 = arith.addf %259, %258 : vector<48x128xf32>
    %261 = arith.mulf %250, %260 : vector<48x128xf32>
    %262 = arith.truncf %261 : vector<48x128xf32> to vector<48x128xbf16>
    %c0_73 = arith.constant 0 : index
    %c0_74 = arith.constant 0 : index
    %c0_75 = arith.constant 0 : index
    %263 = vector.load %arg8[%c0_73, %c0_74, %c0_75] : memref<2x128x32xbf16, #tpu.memory_space<vmem>>, vector<1x128x32xbf16>
    %264 = vector.shape_cast %263 : vector<1x128x32xbf16> to vector<128x32xbf16>
    %cst_76 = arith.constant dense<0.000000e+00> : vector<48x32xf32>
    %265 = tpu.matmul %262, %264, %cst_76 {dimension_numbers = #tpu.dot_dimension_numbers<[1], [0], [0], [1], [0, 0, 1, 1], [], []>} : vector<48x128xbf16>, vector<128x32xbf16>, vector<48x32xf32> -> vector<48x32xf32>
    %266 = arith.addf %222, %265 : vector<48x32xf32>
    %267 = vector.broadcast %14 : vector<1x32xf32> to vector<48x32xf32>
    %268 = arith.addf %266, %267 : vector<48x32xf32>
    %269 = vector.extract_strided_slice %0 {offsets = [6, 0], sizes = [1, 32], strides = [1, 1]} : vector<20x128xf32> to vector<1x32xf32>
    %270 = vector.extract_strided_slice %0 {offsets = [7, 0], sizes = [1, 32], strides = [1, 1]} : vector<20x128xf32> to vector<1x32xf32>
    %271 = vector.extract_strided_slice %0 {offsets = [8, 0], sizes = [1, 32], strides = [1, 1]} : vector<20x128xf32> to vector<1x32xf32>
    %272 = vector.extract_strided_slice %0 {offsets = [9, 0], sizes = [1, 32], strides = [1, 1]} : vector<20x128xf32> to vector<1x32xf32>
    %273 = vector.extract_strided_slice %0 {offsets = [10, 0], sizes = [1, 32], strides = [1, 1]} : vector<20x128xf32> to vector<1x32xf32>
    %274 = vector.extract_strided_slice %0 {offsets = [11, 0], sizes = [1, 32], strides = [1, 1]} : vector<20x128xf32> to vector<1x32xf32>
    %275 = vector.extract_strided_slice %0 {offsets = [17, 0], sizes = [1, 96], strides = [1, 1]} : vector<20x128xf32> to vector<1x96xf32>
    %276 = vector.extract_strided_slice %0 {offsets = [19, 0], sizes = [1, 128], strides = [1, 1]} : vector<20x128xf32> to vector<1x128xf32>
    %cst_77 = arith.constant dense<0.000000e+00> : vector<48xf32>
    %277 = vector.multi_reduction <add>, %268, %cst_77 [1] : vector<48x32xf32> to vector<48xf32>
    %278 = vector.shape_cast %277 : vector<48xf32> to vector<48x1xf32>
    %cst_78 = arith.constant 3.200000e+01 : f32
    %279 = vector.broadcast %cst_78 : f32 to vector<48x1xf32>
    %280 = arith.divf %278, %279 : vector<48x1xf32>
    %281 = vector.broadcast %280 : vector<48x1xf32> to vector<48x32xf32>
    %282 = arith.subf %268, %281 : vector<48x32xf32>
    %283 = arith.mulf %282, %282 : vector<48x32xf32>
    %cst_79 = arith.constant dense<0.000000e+00> : vector<48xf32>
    %284 = vector.multi_reduction <add>, %283, %cst_79 [1] : vector<48x32xf32> to vector<48xf32>
    %285 = vector.shape_cast %284 : vector<48xf32> to vector<48x1xf32>
    %cst_80 = arith.constant 3.200000e+01 : f32
    %286 = vector.broadcast %cst_80 : f32 to vector<48x1xf32>
    %287 = arith.divf %285, %286 : vector<48x1xf32>
    %cst_81 = arith.constant 9.99999997E-7 : f32
    %288 = vector.broadcast %cst_81 : f32 to vector<48x1xf32>
    %289 = arith.addf %287, %288 : vector<48x1xf32>
    %290 = math.rsqrt %289 : vector<48x1xf32>
    %291 = vector.broadcast %290 : vector<48x1xf32> to vector<48x32xf32>
    %292 = arith.mulf %282, %291 : vector<48x32xf32>
    %293 = vector.broadcast %269 : vector<1x32xf32> to vector<48x32xf32>
    %294 = arith.mulf %292, %293 : vector<48x32xf32>
    %295 = vector.broadcast %270 : vector<1x32xf32> to vector<48x32xf32>
    %296 = arith.addf %294, %295 : vector<48x32xf32>
    %297 = arith.truncf %296 : vector<48x32xf32> to vector<48x32xbf16>
    %c1 = arith.constant 1 : index
    %c0_82 = arith.constant 0 : index
    %c0_83 = arith.constant 0 : index
    %298 = vector.load %arg5[%c1, %c0_82, %c0_83] : memref<2x32x96xbf16, #tpu.memory_space<vmem>>, vector<1x32x96xbf16>
    %299 = vector.shape_cast %298 : vector<1x32x96xbf16> to vector<32x96xbf16>
    %cst_84 = arith.constant dense<0.000000e+00> : vector<48x96xf32>
    %300 = tpu.matmul %297, %299, %cst_84 {dimension_numbers = #tpu.dot_dimension_numbers<[1], [0], [0], [1], [0, 0, 1, 1], [], []>} : vector<48x32xbf16>, vector<32x96xbf16>, vector<48x96xf32> -> vector<48x96xf32>
    %301 = vector.broadcast %275 : vector<1x96xf32> to vector<48x96xf32>
    %302 = arith.addf %300, %301 : vector<48x96xf32>
    %303 = vector.extract_strided_slice %302 {offsets = [0, 0], sizes = [24, 96], strides = [1, 1]} : vector<48x96xf32> to vector<24x96xf32>
    %304 = vector.extract_strided_slice %303 {offsets = [0, 0], sizes = [24, 8], strides = [1, 1]} : vector<24x96xf32> to vector<24x8xf32>
    %305 = arith.truncf %304 : vector<24x8xf32> to vector<24x8xbf16>
    %306 = vector.extract_strided_slice %303 {offsets = [0, 32], sizes = [24, 8], strides = [1, 1]} : vector<24x96xf32> to vector<24x8xf32>
    %307 = arith.truncf %306 : vector<24x8xf32> to vector<24x8xbf16>
    %308 = vector.extract_strided_slice %303 {offsets = [0, 64], sizes = [24, 8], strides = [1, 1]} : vector<24x96xf32> to vector<24x8xf32>
    %309 = arith.truncf %308 : vector<24x8xf32> to vector<24x8xbf16>
    %cst_85 = arith.constant dense<0.000000e+00> : vector<24x24xf32>
    %310 = tpu.matmul %305, %307, %cst_85 {dimension_numbers = #tpu.dot_dimension_numbers<[1], [1], [0], [0], [0, 0, 1, 0], [], []>} : vector<24x8xbf16>, vector<24x8xbf16>, vector<24x24xf32> -> vector<24x24xf32>
    %cst_86 = arith.constant -1.000000e+09 : f32
    %311 = vector.broadcast %cst_86 : f32 to vector<24x24xf32>
    %312 = arith.select %8, %310, %311 : vector<24x24xi1>, vector<24x24xf32>
    %cst_87 = arith.constant dense<0xFF800000> : vector<24xf32>
    %313 = vector.multi_reduction <maximumf>, %312, %cst_87 [1] : vector<24x24xf32> to vector<24xf32>
    %314 = vector.shape_cast %313 : vector<24xf32> to vector<24x1xf32>
    %315 = vector.broadcast %314 : vector<24x1xf32> to vector<24x24xf32>
    %316 = arith.subf %312, %315 : vector<24x24xf32>
    %317 = math.exp %316 : vector<24x24xf32>
    %cst_88 = arith.constant dense<0.000000e+00> : vector<24xf32>
    %318 = vector.multi_reduction <add>, %317, %cst_88 [1] : vector<24x24xf32> to vector<24xf32>
    %319 = vector.shape_cast %318 : vector<24xf32> to vector<24x1xf32>
    %320 = tpu.reciprocal %319 {approx = true} : vector<24x1xf32> -> vector<24x1xf32>
    %321 = vector.broadcast %320 : vector<24x1xf32> to vector<24x24xf32>
    %322 = arith.mulf %317, %321 : vector<24x24xf32>
    %323 = arith.truncf %322 : vector<24x24xf32> to vector<24x24xbf16>
    %cst_89 = arith.constant dense<0.000000e+00> : vector<24x8xf32>
    %324 = tpu.matmul %323, %309, %cst_89 {dimension_numbers = #tpu.dot_dimension_numbers<[1], [0], [0], [1], [0, 0, 1, 1], [], []>} : vector<24x24xbf16>, vector<24x8xbf16>, vector<24x8xf32> -> vector<24x8xf32>
    %325 = vector.extract_strided_slice %303 {offsets = [0, 8], sizes = [24, 8], strides = [1, 1]} : vector<24x96xf32> to vector<24x8xf32>
    %326 = arith.truncf %325 : vector<24x8xf32> to vector<24x8xbf16>
    %327 = vector.extract_strided_slice %303 {offsets = [0, 40], sizes = [24, 8], strides = [1, 1]} : vector<24x96xf32> to vector<24x8xf32>
    %328 = arith.truncf %327 : vector<24x8xf32> to vector<24x8xbf16>
    %329 = vector.extract_strided_slice %303 {offsets = [0, 72], sizes = [24, 8], strides = [1, 1]} : vector<24x96xf32> to vector<24x8xf32>
    %330 = arith.truncf %329 : vector<24x8xf32> to vector<24x8xbf16>
    %cst_90 = arith.constant dense<0.000000e+00> : vector<24x24xf32>
    %331 = tpu.matmul %326, %328, %cst_90 {dimension_numbers = #tpu.dot_dimension_numbers<[1], [1], [0], [0], [0, 0, 1, 0], [], []>} : vector<24x8xbf16>, vector<24x8xbf16>, vector<24x24xf32> -> vector<24x24xf32>
    %cst_91 = arith.constant -1.000000e+09 : f32
    %332 = vector.broadcast %cst_91 : f32 to vector<24x24xf32>
    %333 = arith.select %8, %331, %332 : vector<24x24xi1>, vector<24x24xf32>
    %cst_92 = arith.constant dense<0xFF800000> : vector<24xf32>
    %334 = vector.multi_reduction <maximumf>, %333, %cst_92 [1] : vector<24x24xf32> to vector<24xf32>
    %335 = vector.shape_cast %334 : vector<24xf32> to vector<24x1xf32>
    %336 = vector.broadcast %335 : vector<24x1xf32> to vector<24x24xf32>
    %337 = arith.subf %333, %336 : vector<24x24xf32>
    %338 = math.exp %337 : vector<24x24xf32>
    %cst_93 = arith.constant dense<0.000000e+00> : vector<24xf32>
    %339 = vector.multi_reduction <add>, %338, %cst_93 [1] : vector<24x24xf32> to vector<24xf32>
    %340 = vector.shape_cast %339 : vector<24xf32> to vector<24x1xf32>
    %341 = tpu.reciprocal %340 {approx = true} : vector<24x1xf32> -> vector<24x1xf32>
    %342 = vector.broadcast %341 : vector<24x1xf32> to vector<24x24xf32>
    %343 = arith.mulf %338, %342 : vector<24x24xf32>
    %344 = arith.truncf %343 : vector<24x24xf32> to vector<24x24xbf16>
    %cst_94 = arith.constant dense<0.000000e+00> : vector<24x8xf32>
    %345 = tpu.matmul %344, %330, %cst_94 {dimension_numbers = #tpu.dot_dimension_numbers<[1], [0], [0], [1], [0, 0, 1, 1], [], []>} : vector<24x24xbf16>, vector<24x8xbf16>, vector<24x8xf32> -> vector<24x8xf32>
    %346 = vector.extract_strided_slice %303 {offsets = [0, 16], sizes = [24, 8], strides = [1, 1]} : vector<24x96xf32> to vector<24x8xf32>
    %347 = arith.truncf %346 : vector<24x8xf32> to vector<24x8xbf16>
    %348 = vector.extract_strided_slice %303 {offsets = [0, 48], sizes = [24, 8], strides = [1, 1]} : vector<24x96xf32> to vector<24x8xf32>
    %349 = arith.truncf %348 : vector<24x8xf32> to vector<24x8xbf16>
    %350 = vector.extract_strided_slice %303 {offsets = [0, 80], sizes = [24, 8], strides = [1, 1]} : vector<24x96xf32> to vector<24x8xf32>
    %351 = arith.truncf %350 : vector<24x8xf32> to vector<24x8xbf16>
    %cst_95 = arith.constant dense<0.000000e+00> : vector<24x24xf32>
    %352 = tpu.matmul %347, %349, %cst_95 {dimension_numbers = #tpu.dot_dimension_numbers<[1], [1], [0], [0], [0, 0, 1, 0], [], []>} : vector<24x8xbf16>, vector<24x8xbf16>, vector<24x24xf32> -> vector<24x24xf32>
    %cst_96 = arith.constant -1.000000e+09 : f32
    %353 = vector.broadcast %cst_96 : f32 to vector<24x24xf32>
    %354 = arith.select %8, %352, %353 : vector<24x24xi1>, vector<24x24xf32>
    %cst_97 = arith.constant dense<0xFF800000> : vector<24xf32>
    %355 = vector.multi_reduction <maximumf>, %354, %cst_97 [1] : vector<24x24xf32> to vector<24xf32>
    %356 = vector.shape_cast %355 : vector<24xf32> to vector<24x1xf32>
    %357 = vector.broadcast %356 : vector<24x1xf32> to vector<24x24xf32>
    %358 = arith.subf %354, %357 : vector<24x24xf32>
    %359 = math.exp %358 : vector<24x24xf32>
    %cst_98 = arith.constant dense<0.000000e+00> : vector<24xf32>
    %360 = vector.multi_reduction <add>, %359, %cst_98 [1] : vector<24x24xf32> to vector<24xf32>
    %361 = vector.shape_cast %360 : vector<24xf32> to vector<24x1xf32>
    %362 = tpu.reciprocal %361 {approx = true} : vector<24x1xf32> -> vector<24x1xf32>
    %363 = vector.broadcast %362 : vector<24x1xf32> to vector<24x24xf32>
    %364 = arith.mulf %359, %363 : vector<24x24xf32>
    %365 = arith.truncf %364 : vector<24x24xf32> to vector<24x24xbf16>
    %cst_99 = arith.constant dense<0.000000e+00> : vector<24x8xf32>
    %366 = tpu.matmul %365, %351, %cst_99 {dimension_numbers = #tpu.dot_dimension_numbers<[1], [0], [0], [1], [0, 0, 1, 1], [], []>} : vector<24x24xbf16>, vector<24x8xbf16>, vector<24x8xf32> -> vector<24x8xf32>
    %367 = vector.extract_strided_slice %303 {offsets = [0, 24], sizes = [24, 8], strides = [1, 1]} : vector<24x96xf32> to vector<24x8xf32>
    %368 = arith.truncf %367 : vector<24x8xf32> to vector<24x8xbf16>
    %369 = vector.extract_strided_slice %303 {offsets = [0, 56], sizes = [24, 8], strides = [1, 1]} : vector<24x96xf32> to vector<24x8xf32>
    %370 = arith.truncf %369 : vector<24x8xf32> to vector<24x8xbf16>
    %371 = vector.extract_strided_slice %303 {offsets = [0, 88], sizes = [24, 8], strides = [1, 1]} : vector<24x96xf32> to vector<24x8xf32>
    %372 = arith.truncf %371 : vector<24x8xf32> to vector<24x8xbf16>
    %cst_100 = arith.constant dense<0.000000e+00> : vector<24x24xf32>
    %373 = tpu.matmul %368, %370, %cst_100 {dimension_numbers = #tpu.dot_dimension_numbers<[1], [1], [0], [0], [0, 0, 1, 0], [], []>} : vector<24x8xbf16>, vector<24x8xbf16>, vector<24x24xf32> -> vector<24x24xf32>
    %cst_101 = arith.constant -1.000000e+09 : f32
    %374 = vector.broadcast %cst_101 : f32 to vector<24x24xf32>
    %375 = arith.select %8, %373, %374 : vector<24x24xi1>, vector<24x24xf32>
    %cst_102 = arith.constant dense<0xFF800000> : vector<24xf32>
    %376 = vector.multi_reduction <maximumf>, %375, %cst_102 [1] : vector<24x24xf32> to vector<24xf32>
    %377 = vector.shape_cast %376 : vector<24xf32> to vector<24x1xf32>
    %378 = vector.broadcast %377 : vector<24x1xf32> to vector<24x24xf32>
    %379 = arith.subf %375, %378 : vector<24x24xf32>
    %380 = math.exp %379 : vector<24x24xf32>
    %cst_103 = arith.constant dense<0.000000e+00> : vector<24xf32>
    %381 = vector.multi_reduction <add>, %380, %cst_103 [1] : vector<24x24xf32> to vector<24xf32>
    %382 = vector.shape_cast %381 : vector<24xf32> to vector<24x1xf32>
    %383 = tpu.reciprocal %382 {approx = true} : vector<24x1xf32> -> vector<24x1xf32>
    %384 = vector.broadcast %383 : vector<24x1xf32> to vector<24x24xf32>
    %385 = arith.mulf %380, %384 : vector<24x24xf32>
    %386 = arith.truncf %385 : vector<24x24xf32> to vector<24x24xbf16>
    %cst_104 = arith.constant dense<0.000000e+00> : vector<24x8xf32>
    %387 = tpu.matmul %386, %372, %cst_104 {dimension_numbers = #tpu.dot_dimension_numbers<[1], [0], [0], [1], [0, 0, 1, 1], [], []>} : vector<24x24xbf16>, vector<24x8xbf16>, vector<24x8xf32> -> vector<24x8xf32>
    %388 = tpu.concatenate %324, %345, %366, %387 in 1 : vector<24x8xf32>, vector<24x8xf32>, vector<24x8xf32>, vector<24x8xf32> -> vector<24x32xf32>
    %389 = vector.extract_strided_slice %302 {offsets = [24, 0], sizes = [24, 96], strides = [1, 1]} : vector<48x96xf32> to vector<24x96xf32>
    %390 = vector.extract_strided_slice %389 {offsets = [0, 0], sizes = [24, 8], strides = [1, 1]} : vector<24x96xf32> to vector<24x8xf32>
    %391 = arith.truncf %390 : vector<24x8xf32> to vector<24x8xbf16>
    %392 = vector.extract_strided_slice %389 {offsets = [0, 32], sizes = [24, 8], strides = [1, 1]} : vector<24x96xf32> to vector<24x8xf32>
    %393 = arith.truncf %392 : vector<24x8xf32> to vector<24x8xbf16>
    %394 = vector.extract_strided_slice %389 {offsets = [0, 64], sizes = [24, 8], strides = [1, 1]} : vector<24x96xf32> to vector<24x8xf32>
    %395 = arith.truncf %394 : vector<24x8xf32> to vector<24x8xbf16>
    %cst_105 = arith.constant dense<0.000000e+00> : vector<24x24xf32>
    %396 = tpu.matmul %391, %393, %cst_105 {dimension_numbers = #tpu.dot_dimension_numbers<[1], [1], [0], [0], [0, 0, 1, 0], [], []>} : vector<24x8xbf16>, vector<24x8xbf16>, vector<24x24xf32> -> vector<24x24xf32>
    %cst_106 = arith.constant -1.000000e+09 : f32
    %397 = vector.broadcast %cst_106 : f32 to vector<24x24xf32>
    %398 = arith.select %8, %396, %397 : vector<24x24xi1>, vector<24x24xf32>
    %cst_107 = arith.constant dense<0xFF800000> : vector<24xf32>
    %399 = vector.multi_reduction <maximumf>, %398, %cst_107 [1] : vector<24x24xf32> to vector<24xf32>
    %400 = vector.shape_cast %399 : vector<24xf32> to vector<24x1xf32>
    %401 = vector.broadcast %400 : vector<24x1xf32> to vector<24x24xf32>
    %402 = arith.subf %398, %401 : vector<24x24xf32>
    %403 = math.exp %402 : vector<24x24xf32>
    %cst_108 = arith.constant dense<0.000000e+00> : vector<24xf32>
    %404 = vector.multi_reduction <add>, %403, %cst_108 [1] : vector<24x24xf32> to vector<24xf32>
    %405 = vector.shape_cast %404 : vector<24xf32> to vector<24x1xf32>
    %406 = tpu.reciprocal %405 {approx = true} : vector<24x1xf32> -> vector<24x1xf32>
    %407 = vector.broadcast %406 : vector<24x1xf32> to vector<24x24xf32>
    %408 = arith.mulf %403, %407 : vector<24x24xf32>
    %409 = arith.truncf %408 : vector<24x24xf32> to vector<24x24xbf16>
    %cst_109 = arith.constant dense<0.000000e+00> : vector<24x8xf32>
    %410 = tpu.matmul %409, %395, %cst_109 {dimension_numbers = #tpu.dot_dimension_numbers<[1], [0], [0], [1], [0, 0, 1, 1], [], []>} : vector<24x24xbf16>, vector<24x8xbf16>, vector<24x8xf32> -> vector<24x8xf32>
    %411 = vector.extract_strided_slice %389 {offsets = [0, 8], sizes = [24, 8], strides = [1, 1]} : vector<24x96xf32> to vector<24x8xf32>
    %412 = arith.truncf %411 : vector<24x8xf32> to vector<24x8xbf16>
    %413 = vector.extract_strided_slice %389 {offsets = [0, 40], sizes = [24, 8], strides = [1, 1]} : vector<24x96xf32> to vector<24x8xf32>
    %414 = arith.truncf %413 : vector<24x8xf32> to vector<24x8xbf16>
    %415 = vector.extract_strided_slice %389 {offsets = [0, 72], sizes = [24, 8], strides = [1, 1]} : vector<24x96xf32> to vector<24x8xf32>
    %416 = arith.truncf %415 : vector<24x8xf32> to vector<24x8xbf16>
    %cst_110 = arith.constant dense<0.000000e+00> : vector<24x24xf32>
    %417 = tpu.matmul %412, %414, %cst_110 {dimension_numbers = #tpu.dot_dimension_numbers<[1], [1], [0], [0], [0, 0, 1, 0], [], []>} : vector<24x8xbf16>, vector<24x8xbf16>, vector<24x24xf32> -> vector<24x24xf32>
    %cst_111 = arith.constant -1.000000e+09 : f32
    %418 = vector.broadcast %cst_111 : f32 to vector<24x24xf32>
    %419 = arith.select %8, %417, %418 : vector<24x24xi1>, vector<24x24xf32>
    %cst_112 = arith.constant dense<0xFF800000> : vector<24xf32>
    %420 = vector.multi_reduction <maximumf>, %419, %cst_112 [1] : vector<24x24xf32> to vector<24xf32>
    %421 = vector.shape_cast %420 : vector<24xf32> to vector<24x1xf32>
    %422 = vector.broadcast %421 : vector<24x1xf32> to vector<24x24xf32>
    %423 = arith.subf %419, %422 : vector<24x24xf32>
    %424 = math.exp %423 : vector<24x24xf32>
    %cst_113 = arith.constant dense<0.000000e+00> : vector<24xf32>
    %425 = vector.multi_reduction <add>, %424, %cst_113 [1] : vector<24x24xf32> to vector<24xf32>
    %426 = vector.shape_cast %425 : vector<24xf32> to vector<24x1xf32>
    %427 = tpu.reciprocal %426 {approx = true} : vector<24x1xf32> -> vector<24x1xf32>
    %428 = vector.broadcast %427 : vector<24x1xf32> to vector<24x24xf32>
    %429 = arith.mulf %424, %428 : vector<24x24xf32>
    %430 = arith.truncf %429 : vector<24x24xf32> to vector<24x24xbf16>
    %cst_114 = arith.constant dense<0.000000e+00> : vector<24x8xf32>
    %431 = tpu.matmul %430, %416, %cst_114 {dimension_numbers = #tpu.dot_dimension_numbers<[1], [0], [0], [1], [0, 0, 1, 1], [], []>} : vector<24x24xbf16>, vector<24x8xbf16>, vector<24x8xf32> -> vector<24x8xf32>
    %432 = vector.extract_strided_slice %389 {offsets = [0, 16], sizes = [24, 8], strides = [1, 1]} : vector<24x96xf32> to vector<24x8xf32>
    %433 = arith.truncf %432 : vector<24x8xf32> to vector<24x8xbf16>
    %434 = vector.extract_strided_slice %389 {offsets = [0, 48], sizes = [24, 8], strides = [1, 1]} : vector<24x96xf32> to vector<24x8xf32>
    %435 = arith.truncf %434 : vector<24x8xf32> to vector<24x8xbf16>
    %436 = vector.extract_strided_slice %389 {offsets = [0, 80], sizes = [24, 8], strides = [1, 1]} : vector<24x96xf32> to vector<24x8xf32>
    %437 = arith.truncf %436 : vector<24x8xf32> to vector<24x8xbf16>
    %cst_115 = arith.constant dense<0.000000e+00> : vector<24x24xf32>
    %438 = tpu.matmul %433, %435, %cst_115 {dimension_numbers = #tpu.dot_dimension_numbers<[1], [1], [0], [0], [0, 0, 1, 0], [], []>} : vector<24x8xbf16>, vector<24x8xbf16>, vector<24x24xf32> -> vector<24x24xf32>
    %cst_116 = arith.constant -1.000000e+09 : f32
    %439 = vector.broadcast %cst_116 : f32 to vector<24x24xf32>
    %440 = arith.select %8, %438, %439 : vector<24x24xi1>, vector<24x24xf32>
    %cst_117 = arith.constant dense<0xFF800000> : vector<24xf32>
    %441 = vector.multi_reduction <maximumf>, %440, %cst_117 [1] : vector<24x24xf32> to vector<24xf32>
    %442 = vector.shape_cast %441 : vector<24xf32> to vector<24x1xf32>
    %443 = vector.broadcast %442 : vector<24x1xf32> to vector<24x24xf32>
    %444 = arith.subf %440, %443 : vector<24x24xf32>
    %445 = math.exp %444 : vector<24x24xf32>
    %cst_118 = arith.constant dense<0.000000e+00> : vector<24xf32>
    %446 = vector.multi_reduction <add>, %445, %cst_118 [1] : vector<24x24xf32> to vector<24xf32>
    %447 = vector.shape_cast %446 : vector<24xf32> to vector<24x1xf32>
    %448 = tpu.reciprocal %447 {approx = true} : vector<24x1xf32> -> vector<24x1xf32>
    %449 = vector.broadcast %448 : vector<24x1xf32> to vector<24x24xf32>
    %450 = arith.mulf %445, %449 : vector<24x24xf32>
    %451 = arith.truncf %450 : vector<24x24xf32> to vector<24x24xbf16>
    %cst_119 = arith.constant dense<0.000000e+00> : vector<24x8xf32>
    %452 = tpu.matmul %451, %437, %cst_119 {dimension_numbers = #tpu.dot_dimension_numbers<[1], [0], [0], [1], [0, 0, 1, 1], [], []>} : vector<24x24xbf16>, vector<24x8xbf16>, vector<24x8xf32> -> vector<24x8xf32>
    %453 = vector.extract_strided_slice %389 {offsets = [0, 24], sizes = [24, 8], strides = [1, 1]} : vector<24x96xf32> to vector<24x8xf32>
    %454 = arith.truncf %453 : vector<24x8xf32> to vector<24x8xbf16>
    %455 = vector.extract_strided_slice %389 {offsets = [0, 56], sizes = [24, 8], strides = [1, 1]} : vector<24x96xf32> to vector<24x8xf32>
    %456 = arith.truncf %455 : vector<24x8xf32> to vector<24x8xbf16>
    %457 = vector.extract_strided_slice %389 {offsets = [0, 88], sizes = [24, 8], strides = [1, 1]} : vector<24x96xf32> to vector<24x8xf32>
    %458 = arith.truncf %457 : vector<24x8xf32> to vector<24x8xbf16>
    %cst_120 = arith.constant dense<0.000000e+00> : vector<24x24xf32>
    %459 = tpu.matmul %454, %456, %cst_120 {dimension_numbers = #tpu.dot_dimension_numbers<[1], [1], [0], [0], [0, 0, 1, 0], [], []>} : vector<24x8xbf16>, vector<24x8xbf16>, vector<24x24xf32> -> vector<24x24xf32>
    %cst_121 = arith.constant -1.000000e+09 : f32
    %460 = vector.broadcast %cst_121 : f32 to vector<24x24xf32>
    %461 = arith.select %8, %459, %460 : vector<24x24xi1>, vector<24x24xf32>
    %cst_122 = arith.constant dense<0xFF800000> : vector<24xf32>
    %462 = vector.multi_reduction <maximumf>, %461, %cst_122 [1] : vector<24x24xf32> to vector<24xf32>
    %463 = vector.shape_cast %462 : vector<24xf32> to vector<24x1xf32>
    %464 = vector.broadcast %463 : vector<24x1xf32> to vector<24x24xf32>
    %465 = arith.subf %461, %464 : vector<24x24xf32>
    %466 = math.exp %465 : vector<24x24xf32>
    %cst_123 = arith.constant dense<0.000000e+00> : vector<24xf32>
    %467 = vector.multi_reduction <add>, %466, %cst_123 [1] : vector<24x24xf32> to vector<24xf32>
    %468 = vector.shape_cast %467 : vector<24xf32> to vector<24x1xf32>
    %469 = tpu.reciprocal %468 {approx = true} : vector<24x1xf32> -> vector<24x1xf32>
    %470 = vector.broadcast %469 : vector<24x1xf32> to vector<24x24xf32>
    %471 = arith.mulf %466, %470 : vector<24x24xf32>
    %472 = arith.truncf %471 : vector<24x24xf32> to vector<24x24xbf16>
    %cst_124 = arith.constant dense<0.000000e+00> : vector<24x8xf32>
    %473 = tpu.matmul %472, %458, %cst_124 {dimension_numbers = #tpu.dot_dimension_numbers<[1], [0], [0], [1], [0, 0, 1, 1], [], []>} : vector<24x24xbf16>, vector<24x8xbf16>, vector<24x8xf32> -> vector<24x8xf32>
    %474 = tpu.concatenate %410, %431, %452, %473 in 1 : vector<24x8xf32>, vector<24x8xf32>, vector<24x8xf32>, vector<24x8xf32> -> vector<24x32xf32>
    %475 = tpu.concatenate %388, %474 in 0 : vector<24x32xf32>, vector<24x32xf32> -> vector<48x32xf32>
    %476 = arith.truncf %475 : vector<48x32xf32> to vector<48x32xbf16>
    %c1_125 = arith.constant 1 : index
    %c0_126 = arith.constant 0 : index
    %c0_127 = arith.constant 0 : index
    %477 = vector.load %arg6[%c1_125, %c0_126, %c0_127] : memref<2x32x32xbf16, #tpu.memory_space<vmem>>, vector<1x32x32xbf16>
    %478 = vector.shape_cast %477 : vector<1x32x32xbf16> to vector<32x32xbf16>
    %cst_128 = arith.constant dense<0.000000e+00> : vector<48x32xf32>
    %479 = tpu.matmul %476, %478, %cst_128 {dimension_numbers = #tpu.dot_dimension_numbers<[1], [0], [0], [1], [0, 0, 1, 1], [], []>} : vector<48x32xbf16>, vector<32x32xbf16>, vector<48x32xf32> -> vector<48x32xf32>
    %480 = arith.addf %268, %479 : vector<48x32xf32>
    %481 = vector.broadcast %273 : vector<1x32xf32> to vector<48x32xf32>
    %482 = arith.addf %480, %481 : vector<48x32xf32>
    %cst_129 = arith.constant dense<0.000000e+00> : vector<48xf32>
    %483 = vector.multi_reduction <add>, %482, %cst_129 [1] : vector<48x32xf32> to vector<48xf32>
    %484 = vector.shape_cast %483 : vector<48xf32> to vector<48x1xf32>
    %cst_130 = arith.constant 3.200000e+01 : f32
    %485 = vector.broadcast %cst_130 : f32 to vector<48x1xf32>
    %486 = arith.divf %484, %485 : vector<48x1xf32>
    %487 = vector.broadcast %486 : vector<48x1xf32> to vector<48x32xf32>
    %488 = arith.subf %482, %487 : vector<48x32xf32>
    %489 = arith.mulf %488, %488 : vector<48x32xf32>
    %cst_131 = arith.constant dense<0.000000e+00> : vector<48xf32>
    %490 = vector.multi_reduction <add>, %489, %cst_131 [1] : vector<48x32xf32> to vector<48xf32>
    %491 = vector.shape_cast %490 : vector<48xf32> to vector<48x1xf32>
    %cst_132 = arith.constant 3.200000e+01 : f32
    %492 = vector.broadcast %cst_132 : f32 to vector<48x1xf32>
    %493 = arith.divf %491, %492 : vector<48x1xf32>
    %cst_133 = arith.constant 9.99999997E-7 : f32
    %494 = vector.broadcast %cst_133 : f32 to vector<48x1xf32>
    %495 = arith.addf %493, %494 : vector<48x1xf32>
    %496 = math.rsqrt %495 : vector<48x1xf32>
    %497 = vector.broadcast %496 : vector<48x1xf32> to vector<48x32xf32>
    %498 = arith.mulf %488, %497 : vector<48x32xf32>
    %499 = vector.broadcast %271 : vector<1x32xf32> to vector<48x32xf32>
    %500 = arith.mulf %498, %499 : vector<48x32xf32>
    %501 = vector.broadcast %272 : vector<1x32xf32> to vector<48x32xf32>
    %502 = arith.addf %500, %501 : vector<48x32xf32>
    %503 = arith.truncf %502 : vector<48x32xf32> to vector<48x32xbf16>
    %c1_134 = arith.constant 1 : index
    %c0_135 = arith.constant 0 : index
    %c0_136 = arith.constant 0 : index
    %504 = vector.load %arg7[%c1_134, %c0_135, %c0_136] : memref<2x32x128xbf16, #tpu.memory_space<vmem>>, vector<1x32x128xbf16>
    %505 = vector.shape_cast %504 : vector<1x32x128xbf16> to vector<32x128xbf16>
    %cst_137 = arith.constant dense<0.000000e+00> : vector<48x128xf32>
    %506 = tpu.matmul %503, %505, %cst_137 {dimension_numbers = #tpu.dot_dimension_numbers<[1], [0], [0], [1], [0, 0, 1, 1], [], []>} : vector<48x32xbf16>, vector<32x128xbf16>, vector<48x128xf32> -> vector<48x128xf32>
    %507 = vector.broadcast %276 : vector<1x128xf32> to vector<48x128xf32>
    %508 = arith.addf %506, %507 : vector<48x128xf32>
    %cst_138 = arith.constant 5.000000e-01 : f32
    %509 = vector.broadcast %cst_138 : f32 to vector<48x128xf32>
    %510 = arith.mulf %509, %508 : vector<48x128xf32>
    %511 = arith.mulf %508, %508 : vector<48x128xf32>
    %512 = arith.mulf %511, %508 : vector<48x128xf32>
    %cst_139 = arith.constant 4.471500e-02 : f32
    %513 = vector.broadcast %cst_139 : f32 to vector<48x128xf32>
    %514 = arith.mulf %513, %512 : vector<48x128xf32>
    %515 = arith.addf %508, %514 : vector<48x128xf32>
    %cst_140 = arith.constant 0.797884583 : f32
    %516 = vector.broadcast %cst_140 : f32 to vector<48x128xf32>
    %517 = arith.mulf %516, %515 : vector<48x128xf32>
    %518 = math.tanh %517 : vector<48x128xf32>
    %cst_141 = arith.constant 1.000000e+00 : f32
    %519 = vector.broadcast %cst_141 : f32 to vector<48x128xf32>
    %520 = arith.addf %519, %518 : vector<48x128xf32>
    %521 = arith.mulf %510, %520 : vector<48x128xf32>
    %522 = arith.truncf %521 : vector<48x128xf32> to vector<48x128xbf16>
    %c1_142 = arith.constant 1 : index
    %c0_143 = arith.constant 0 : index
    %c0_144 = arith.constant 0 : index
    %523 = vector.load %arg8[%c1_142, %c0_143, %c0_144] : memref<2x128x32xbf16, #tpu.memory_space<vmem>>, vector<1x128x32xbf16>
    %524 = vector.shape_cast %523 : vector<1x128x32xbf16> to vector<128x32xbf16>
    %cst_145 = arith.constant dense<0.000000e+00> : vector<48x32xf32>
    %525 = tpu.matmul %522, %524, %cst_145 {dimension_numbers = #tpu.dot_dimension_numbers<[1], [0], [0], [1], [0, 0, 1, 1], [], []>} : vector<48x128xbf16>, vector<128x32xbf16>, vector<48x32xf32> -> vector<48x32xf32>
    %526 = arith.addf %482, %525 : vector<48x32xf32>
    %527 = vector.broadcast %274 : vector<1x32xf32> to vector<48x32xf32>
    %528 = arith.addf %526, %527 : vector<48x32xf32>
    %529 = vector.extract_strided_slice %528 {offsets = [0, 0], sizes = [1, 32], strides = [1, 1]} : vector<48x32xf32> to vector<1x32xf32>
    %530 = vector.extract_strided_slice %528 {offsets = [24, 0], sizes = [1, 32], strides = [1, 1]} : vector<48x32xf32> to vector<1x32xf32>
    %531 = tpu.concatenate %529, %530 in 0 : vector<1x32xf32>, vector<1x32xf32> -> vector<2x32xf32>
    %532 = vector.extract_strided_slice %0 {offsets = [12, 0], sizes = [1, 32], strides = [1, 1]} : vector<20x128xf32> to vector<1x32xf32>
    %533 = vector.extract_strided_slice %0 {offsets = [13, 0], sizes = [1, 32], strides = [1, 1]} : vector<20x128xf32> to vector<1x32xf32>
    %cst_146 = arith.constant dense<0.000000e+00> : vector<2xf32>
    %534 = vector.multi_reduction <add>, %531, %cst_146 [1] : vector<2x32xf32> to vector<2xf32>
    %535 = vector.shape_cast %534 : vector<2xf32> to vector<2x1xf32>
    %cst_147 = arith.constant 3.200000e+01 : f32
    %536 = vector.broadcast %cst_147 : f32 to vector<2x1xf32>
    %537 = arith.divf %535, %536 : vector<2x1xf32>
    %538 = vector.broadcast %537 : vector<2x1xf32> to vector<2x32xf32>
    %539 = arith.subf %531, %538 : vector<2x32xf32>
    %540 = arith.mulf %539, %539 : vector<2x32xf32>
    %cst_148 = arith.constant dense<0.000000e+00> : vector<2xf32>
    %541 = vector.multi_reduction <add>, %540, %cst_148 [1] : vector<2x32xf32> to vector<2xf32>
    %542 = vector.shape_cast %541 : vector<2xf32> to vector<2x1xf32>
    %cst_149 = arith.constant 3.200000e+01 : f32
    %543 = vector.broadcast %cst_149 : f32 to vector<2x1xf32>
    %544 = arith.divf %542, %543 : vector<2x1xf32>
    %cst_150 = arith.constant 9.99999997E-7 : f32
    %545 = vector.broadcast %cst_150 : f32 to vector<2x1xf32>
    %546 = arith.addf %544, %545 : vector<2x1xf32>
    %547 = math.rsqrt %546 : vector<2x1xf32>
    %548 = vector.broadcast %547 : vector<2x1xf32> to vector<2x32xf32>
    %549 = arith.mulf %539, %548 : vector<2x32xf32>
    %550 = vector.broadcast %532 : vector<1x32xf32> to vector<2x32xf32>
    %551 = arith.mulf %549, %550 : vector<2x32xf32>
    %552 = vector.broadcast %533 : vector<1x32xf32> to vector<2x32xf32>
    %553 = arith.addf %551, %552 : vector<2x32xf32>
    %554 = arith.truncf %553 : vector<2x32xf32> to vector<2x32xbf16>
    %c0_151 = arith.constant 0 : index
    %c0_152 = arith.constant 0 : index
    %c0_153 = arith.constant 0 : index
    %555 = vector.load %arg9[%c0_151, %c0_152, %c0_153] : memref<2x32x32xbf16, #tpu.memory_space<vmem>>, vector<1x32x32xbf16>
    %556 = vector.shape_cast %555 : vector<1x32x32xbf16> to vector<32x32xbf16>
    %cst_154 = arith.constant dense<0.000000e+00> : vector<2x32xf32>
    %557 = tpu.matmul %554, %556, %cst_154 {dimension_numbers = #tpu.dot_dimension_numbers<[1], [0], [0], [1], [0, 0, 1, 1], [], []>} : vector<2x32xbf16>, vector<32x32xbf16>, vector<2x32xf32> -> vector<2x32xf32>
    %558 = vector.extract_strided_slice %0 {offsets = [14, 0], sizes = [1, 32], strides = [1, 1]} : vector<20x128xf32> to vector<1x32xf32>
    %559 = vector.broadcast %558 : vector<1x32xf32> to vector<2x32xf32>
    %560 = arith.addf %557, %559 : vector<2x32xf32>
    %cst_155 = arith.constant 0.000000e+00 : f32
    %561 = vector.broadcast %cst_155 : f32 to vector<2x32xf32>
    %562 = arith.maximumf %560, %561 : vector<2x32xf32>
    %563 = arith.truncf %562 : vector<2x32xf32> to vector<2x32xbf16>
    %c1_156 = arith.constant 1 : index
    %c0_157 = arith.constant 0 : index
    %c0_158 = arith.constant 0 : index
    %564 = vector.load %arg9[%c1_156, %c0_157, %c0_158] : memref<2x32x32xbf16, #tpu.memory_space<vmem>>, vector<1x32x32xbf16>
    %565 = vector.shape_cast %564 : vector<1x32x32xbf16> to vector<32x32xbf16>
    %cst_159 = arith.constant dense<0.000000e+00> : vector<2x32xf32>
    %566 = tpu.matmul %563, %565, %cst_159 {dimension_numbers = #tpu.dot_dimension_numbers<[1], [0], [0], [1], [0, 0, 1, 1], [], []>} : vector<2x32xbf16>, vector<32x32xbf16>, vector<2x32xf32> -> vector<2x32xf32>
    %567 = vector.extract_strided_slice %566 {offsets = [0, 0], sizes = [2, 10], strides = [1, 1]} : vector<2x32xf32> to vector<2x10xf32>
    %568 = vector.extract_strided_slice %0 {offsets = [15, 0], sizes = [1, 10], strides = [1, 1]} : vector<20x128xf32> to vector<1x10xf32>
    %569 = vector.broadcast %568 : vector<1x10xf32> to vector<2x10xf32>
    %570 = arith.addf %567, %569 : vector<2x10xf32>
    %c0_160 = arith.constant 0 : index
    %571 = memref.load %arg0[%c0_160] : memref<1xi32, #tpu.memory_space<smem>>
    %c5_i32 = arith.constant 5 : i32
    %572 = arith.muli %571, %c5_i32 : i32
    %c5_i32_161 = arith.constant 5 : i32
    %573 = arith.addi %572, %c5_i32_161 : i32
    %574 = tpu.iota {dimensions = array<i32: 1>} : vector<2x10xi32>
    %575 = vector.broadcast %572 : i32 to vector<2x10xi32>
    %576 = arith.cmpi sge, %574, %575 : vector<2x10xi32>
    %577 = vector.broadcast %573 : i32 to vector<2x10xi32>
    %578 = arith.cmpi slt, %574, %577 : vector<2x10xi32>
    %579 = arith.andi %576, %578 : vector<2x10xi1>
    %cst_162 = arith.constant -9.99999979E+10 : f32
    %580 = vector.broadcast %cst_162 : f32 to vector<2x10xf32>
    %581 = arith.select %579, %570, %580 : vector<2x10xi1>, vector<2x10xf32>
    %c0_163 = arith.constant 0 : index
    %c0_164 = arith.constant 0 : index
    %582 = vector.load %arg10[%c0_163, %c0_164] : memref<2x10xf32, #tpu.memory_space<vmem>>, vector<2x10xf32>
    tpu.vector_store %arg10[%c0_163, %c0_164], %581 {strides = array<i32>} : memref<2x10xf32, #tpu.memory_space<vmem>>, vector<2x10xf32>,
    return
  }
}

</mosaic_0001>

<bundles_post_ra>
// kernel: vit_forward.1
= control target key start
LH: loop header
LB: loop body
LE: loop exit
PB: predicated region body
PF: predicated region fallthrough
CT: control target
= control target key end

     0   :  { %v5828_v1 = vmov 0.0   ;;  %vm5829_vm0 = vmmov 0   ;;  %vm92_vm1 = vcmask 392192   ;;  %s7329_s0 = inlined_call_operand.<no memory space> [shape: s32[1], index: 0, kind: input, shape index: {}]   ;;  %s7330_s1 = inlined_call_operand.vmem [shape: bf16[48,48], index: 1, kind: input, shape index: {}]   ;;  %s7331_s2 = inlined_call_operand.vmem [shape: bf16[48,32], index: 2, kind: input, shape index: {}]   ;;  %s7332_s3 = inlined_call_operand.vmem [shape: f32[48,32], index: 3, kind: input, shape index: {}]   ;;  %s7333_s4 = inlined_call_operand.vmem [shape: f32[20,128], index: 4, kind: input, shape index: {}]   ;;  %s7334_s5 = inlined_call_operand.vmem [shape: bf16[2,32,96], index: 5, kind: input, shape index: {}]   ;;  %s7335_s6 = inlined_call_operand.vmem [shape: bf16[2,32,32], index: 6, kind: input, shape index: {}]   ;;  %s7336_s7 = inlined_call_operand.vmem [shape: bf16[2,32,128], index: 7, kind: input, shape index: {}]   ;;  %s7337_s8 = inlined_call_operand.vmem [shape: bf16[2,128,32], index: 8, kind: input, shape index: {}]   ;;  %s7338_s9 = inlined_call_operand.vmem [shape: bf16[2,32,32], index: 9, kind: input, shape index: {}]   ;;  %s7339_s10 = inlined_call_operand.hbm [shape: f32[2,10], index: 10, kind: output, shape index: {}]  }
   0x1   :  { %v5497_v0 = vld [vmem:[%s7331_s2] sm:$0xff]   ;;  %4900 = vmatprep.subr.bf16.mxu0 %v5828_v1  ;;  %4918 = vmatprep.subr.bf16.mxu1 %v5828_v1  ;;  %v5498_v2 = vld [vmem:[%s7331_s2 + $0x8] sm:$0xff]   ;;  %v5499_v3 = vld [vmem:[%s7331_s2 + $0x10] sm:$0xff]  }
   0x2   :  { %4901 = vmatpush3.bf16.msra.mxu0 %v5497_v0  ;;  %4906 = vmatprep.mubr.msk.bf16.mxu0 %vm5829_vm0, %v5828_v1  ;;  %v5500_v4 = vld [vmem:[%s7330_s1] sm:$0xff]   ;;  %v5501_v5 = vld [vmem:[%s7330_s1 + $0x8] sm:$0xff]   ;;  %v5502_v6 = vld [vmem:[%s7330_s1 + $0x10] sm:$0xff]  }
   0x3   :  { %4902 = vmatprep.subr.bf16.mxu0 %v5828_v1  ;;  %4922 = vmatprep.mubr.msk.bf16.mxu1 %vm5829_vm0, %v5828_v1 }
   0x6   :  { %4903 = vmatpush3.bf16.msra.mxu0 %v5498_v2 }
   0x7   :  { %4904 = vmatprep.subr.bf16.mxu0 %v5828_v1 }
   0xa   :  { %4905 = vmatpush3.bf16.msra.mxu0 %v5499_v3 }
   0xd   :  { %4907 = vmatmul.mubr.msk.bf16.vlgmr.msra.gmra.mrb[0].mxu0 %vm92_vm1, %v5500_v4 }
   0xe   :  { %4910 = vmatprep.mubr.msk.bf16.mxu0 %vm5829_vm0, %v5828_v1 }
  0x15   :  { %4911 = vmatmul.mubr.msk.bf16.gmra.mrb[4].mxu0 %vm92_vm1, %v5501_v5 }
  0x16   :  { %4914 = vmatprep.mubr.msk.bf16.mxu0 %vm5829_vm0, %v5828_v1 }
  0x17   :  { %16 = vsyncpa [#allocation4], 0  ;;  %v53_v7 = vld [vmem:[%s7332_s3] sm:$0xff]  ;;  %v54_v9 = vld [vmem:[%s7332_s3 + $0x8] sm:$0xff]  ;;  %vm162_vm2 = vcmask 261120   ;;  %v159_v63 = vlaneseq  ;;  %vm359_vm3 = vcmask 64512  }
  0x18   :  { %v55_v16 = vld [vmem:[%s7332_s3 + $0x10] sm:$0xff]  ;;  %v56_v19 = vld [vmem:[%s7332_s3 + $0x18] sm:$0xff]  ;;  %v57_v42 = vld [vmem:[%s7332_s3 + $0x20] sm:$0xff]  ;;  %s5830_s22 = smov 96   ;;  %vm423_vm5 = vcmask 195584   ;;  %s5831_s2 = smov 64  }
  0x19   :  { %v58_v49 = vld [vmem:[%s7332_s3 + $0x28] sm:$0xff]  ;;  %v5503_v57 = vld [vmem:[%s7334_s5] sm:$0xff]   ;;  %v6000_v4 = vshrl.u32 %v159_v63, 7  ;;  %s5832_s23 = smov 120   ;;  %s5833_s24 = smov 88   ;;  %vm470_vm6 = vcmask 1043456  }
  0x1a   :  { %4919 = vmatpush3.bf16.msra.mxu1 %v5503_v57  ;;  %v5504_v58 = vld [vmem:[%s7334_s5 + $0x8] sm:$0xff]   ;;  %s5834_s25 = smov 56   ;;  %s5835_s26 = smov 80   ;;  %vm1065_vm7 = vcmask 130048   ;;  %vm4369_vm8 = vcmask 1040384   ;;  %vm4371_vm9 = vcmask 254976  }
  0x1b   :  { %4920 = vmatprep.subr.bf16.mxu1 %v5828_v1  ;;  %s5836_s27 = smov 112   ;;  %s5837_s1 = smov 48   ;;  %vm4535_vm13 = vcmask 74752  }
  0x1c   :  { %s5838_s28 = smov 72   ;;  %s5839_s29 = smov 104  }
  0x1d   :  { %4915 = vmatmul.mubr.msk.bf16.gmra.mrb[8].mxu0 %vm92_vm1, %v5502_v6  ;;  %s5840_s30 = smov 40   ;;  %s5841_s11 = smov 8  }
  0x1e   :  { %4921 = vmatpush3.bf16.msra.mxu1 %v5504_v58  ;;  %s5842_s12 = smov 16   ;;  %s5843_s13 = smov 24  }
  0xe0   :  { %v136_v8 = vpop.f32.mrb[0].mxu0 }
  0xe1   :  { %v5936_v10 = vadd.f32 %v136_v8, %v53_v7  ;;  %v4908_v11 = vpop.f32.mrb[1].mxu0 }
  0xe2   :  { %v139_v12 = vpop.f32.mrb[2].mxu0 }
  0xe3   :  { %v5938_v13 = vadd.f32 %v139_v12, %v54_v9  ;;  %v4909_v14 = vpop.f32.mrb[3].mxu0  ;;  %v163_v15 = vsel %vm162_vm2, %v5936_v10, 0.0  ;;  %v6003_v9 = vsub.s32 0, %v6000_v4 }
  0xe4   :  { %164 = vadd.xlane.f32.xlu0 %v163_v15  ;;  %v38_v14 = vld [vmem:[%s7333_s4] sm:$0xff] }
  0xe5   :  { %v166_v17 = vsel %vm162_vm2, %v5938_v13, 0.0 }
  0xe8   :  { %167 = vadd.xlane.f32.xlu0 %v166_v17  ;;  %v144_v18 = vpop.f32.mrb[4].mxu0 }
  0xe9   :  { %v5950_v20 = vadd.f32 %v144_v18, %v55_v16  ;;  %v4912_v21 = vpop.f32.mrb[5].mxu0 }
  0xea   :  { %v147_v22 = vpop.f32.mrb[6].mxu0  ;;  %v245_v21 = vrot.slane %v38_v14, %v6003_v9 }
  0xeb   :  { %v5952_v23 = vadd.f32 %v147_v22, %v56_v19  ;;  %v4913_v24 = vpop.f32.mrb[7].mxu0  ;;  %v169_v25 = vsel %vm162_vm2, %v5950_v20, 0.0  ;;  %v6011_v22 = vsub.s32 1, %v6000_v4 }
  0xec   :  { %170 = vadd.xlane.f32.xlu1 %v169_v25 }
  0xed   :  { %v172_v26 = vsel %vm162_vm2, %v5952_v23, 0.0 }
  0xf0   :  { %173 = vadd.xlane.f32.xlu1 %v172_v26  ;;  %v152_v27 = vpop.f32.mrb[8].mxu0 }
  0xf1   :  { %v4916_v28 = vpop.f32.mrb[9].mxu0  ;;  %v5974_v48 = vadd.f32 %v152_v27, %v57_v42 }
  0xf2   :  { %v155_v29 = vpop.f32.mrb[10].mxu0 }
  0xf3   :  { %v4917_v30 = vpop.f32.mrb[11].mxu0  ;;  %v175_v53 = vsel %vm162_vm2, %v5974_v48, 0.0  ;;  %v5987_v54 = vadd.f32 %v155_v29, %v58_v49 }
  0xf5   :  { %v178_v56 = vsel %vm162_vm2, %v5987_v54, 0.0 }
 0x171   :  { %v165_v31 = vpop.xlane.xlu0 %164 }
 0x172   :  { %v182_v32 = vmul.f32 0.03125, %v165_v31  ;;  %v255_v31 = vrot.slane %v38_v14, %v6011_v22 }
 0x174   :  { %v188_v33 = vsub.f32 %v5936_v10, %v182_v32 }
 0x175   :  { %v168_v34 = vpop.xlane.xlu0 %167 }
 0x176   :  { %v183_v35 = vmul.f32 0.03125, %v168_v34  ;;  %v194_v36 = vmul.f32 %v188_v33, %v188_v33 }
 0x178   :  { %v5960_v37 = vsub.f32 %v5938_v13, %v183_v35  ;;  %v200_v38 = vsel %vm162_vm2, %v194_v36, 0.0 }
 0x179   :  { %201 = vadd.xlane.f32.xlu0 %v200_v38  ;;  %v171_v39 = vpop.xlane.xlu1 %170 }
 0x17a   :  { %v184_v40 = vmul.f32 0.03125, %v171_v39  ;;  %v195_v41 = vmul.f32 %v5960_v37, %v5960_v37 }
 0x17c   :  { %v5969_v43 = vsub.f32 %v5950_v20, %v184_v40  ;;  %v203_v44 = vsel %vm162_vm2, %v195_v41, 0.0 }
 0x17d   :  { %204 = vadd.xlane.f32.xlu1 %v203_v44  ;;  %v174_v45 = vpop.xlane.xlu1 %173 }
 0x17e   :  { %v185_v46 = vmul.f32 0.03125, %v174_v45  ;;  %v196_v47 = vmul.f32 %v5969_v43, %v5969_v43 }
 0x180   :  { %v5980_v50 = vsub.f32 %v5952_v23, %v185_v46  ;;  %v206_v51 = vsel %vm162_vm2, %v196_v47, 0.0 }
 0x181   :  { %207 = vadd.xlane.f32.xlu0 %v206_v51 }
 0x182   :  { %v197_v52 = vmul.f32 %v5980_v50, %v5980_v50 }
 0x184   :  { %v209_v55 = vsel %vm162_vm2, %v197_v52, 0.0 }
 0x185   :  { %210 = vadd.xlane.f32.xlu1 %v209_v55  ;;  %176 = vadd.xlane.f32.xlu0 %v175_v53 }
 0x189   :  { %179 = vadd.xlane.f32.xlu1 %v178_v56 }
 0x206   :  { %v202_v59 = vpop.xlane.xlu0 %201 }
 0x207   :  { %v218_v60 = vmul.f32 0.03125, %v202_v59 }
 0x209   :  { %v224_v61 = vadd.f32 1e-06, %v218_v60 }
 0x20a   :  { %v205_v62 = vpop.xlane.xlu1 %204 }
 0x20b   :  { %5535 = vrsqrt.f32 %v224_v61  ;;  %v219_v0 = vmul.f32 0.03125, %v205_v62 }
 0x20d   :  { %v225_v2 = vadd.f32 1e-06, %v219_v0 }
 0x20e   :  { %v208_v3 = vpop.xlane.xlu0 %207 }
 0x20f   :  { %5537 = vrsqrt.f32 %v225_v2  ;;  %v220_v5 = vmul.f32 0.03125, %v208_v3  ;;  %v40_v2 = vld [vmem:[%s7333_s4 + $0x10] sm:$0xf] }
 0x210   :  { %v6031_v3 = vrot.slane %v40_v2, %v6003_v9 }
 0x211   :  { %v226_v6 = vadd.f32 1e-06, %v220_v5 }
 0x212   :  { %v211_v7 = vpop.xlane.xlu1 %210  ;;  %v177_v8 = vpop.xlane.xlu0 %176 }
 0x213   :  { %5539 = vrsqrt.f32 %v226_v6  ;;  %v221_v11 = vmul.f32 0.03125, %v211_v7  ;;  %v186_v12 = vmul.f32 0.03125, %v177_v8 }
 0x215   :  { %v5536_v15 = vpop.eup %5535  ;;  %v227_v16 = vadd.f32 1e-06, %v221_v11  ;;  %v192_v17 = vsub.f32 %v5974_v48, %v186_v12 }
 0x216   :  { %v180_v18 = vpop.xlane.xlu1 %179  ;;  %v236_v19 = vmul.f32 %v5536_v15, %v188_v33 }
 0x217   :  { %5541 = vrsqrt.f32 %v227_v16  ;;  %v187_v24 = vmul.f32 0.03125, %v180_v18  ;;  %v198_v25 = vmul.f32 %v192_v17, %v192_v17 }
 0x218   :  { %v246_v30 = vmul.f32 %v245_v21, %v236_v19 }
 0x219   :  { %v5538_v26 = vpop.eup %5537  ;;  %v193_v27 = vsub.f32 %v5987_v54, %v187_v24  ;;  %v212_v28 = vsel %vm162_vm2, %v198_v25, 0.0 }
 0x21a   :  { %213 = vadd.xlane.f32.xlu0 %v212_v28  ;;  %v237_v29 = vmul.f32 %v5538_v26, %v5960_v37  ;;  %v256_v36 = vadd.f32 %v255_v31, %v246_v30 }
 0x21b   :  { %v199_v32 = vmul.f32 %v193_v27, %v193_v27 }
 0x21c   :  { %v247_v33 = vmul.f32 %v245_v21, %v237_v29 }
 0x21d   :  { %v5540_v34 = vpop.eup %5539  ;;  %v215_v35 = vsel %vm162_vm2, %v199_v32, 0.0 }
 0x21e   :  { %216 = vadd.xlane.f32.xlu1 %v215_v35  ;;  %v257_v38 = vadd.f32 %v255_v31, %v247_v33  ;;  %v238_v39 = vmul.f32 %v5540_v34, %v5969_v43  ;;  %v6059_v35 = vand.u32 127, %v159_v63 }
 0x220   :  { %v262_v40 = vpack.c.bf16 %v257_v38, %v256_v36  ;;  %v248_v37 = vmul.f32 %v245_v21, %v238_v39  ;;  %vm161_vm4 = vcmp.lt.s32.totalorder %v6059_v35, 17 }
 0x221   :  { %v5542_v41 = vpop.eup %5541 }
 0x222   :  { %4923 = vmatmul.mubr.msk.bf16.vlgmr.msra.gmra.mrb[0].mxu1 %vm162_vm2, %v262_v40  ;;  %v239_v42 = vmul.f32 %v5542_v41, %v5980_v50  ;;  %v258_v45 = vadd.f32 %v255_v31, %v248_v37 }
 0x223   :  { %4926 = vmatprep.mubr.msk.bf16.mxu1 %vm5829_vm0, %v5828_v1 }
 0x224   :  { %v249_v44 = vmul.f32 %v245_v21, %v239_v42 }
 0x226   :  { %v259_v46 = vadd.f32 %v255_v31, %v249_v44 }
 0x228   :  { %v263_v47 = vpack.c.bf16 %v259_v46, %v258_v45 }
 0x22a   :  { %4927 = vmatmul.mubr.msk.bf16.gmra.mrb[4].mxu1 %vm162_vm2, %v263_v47 }
 0x22b   :  { %4930 = vmatprep.mubr.msk.bf16.mxu1 %vm5829_vm0, %v5828_v1 }
 0x2a7   :  { %v214_v43 = vpop.xlane.xlu0 %213 }
 0x2a8   :  { %v222_v49 = vmul.f32 0.03125, %v214_v43 }
 0x2aa   :  { %v228_v51 = vadd.f32 1e-06, %v222_v49 }
 0x2ab   :  { %v217_v52 = vpop.xlane.xlu1 %216 }
 0x2ac   :  { %5543 = vrsqrt.f32 %v228_v51  ;;  %v223_v53 = vmul.f32 0.03125, %v217_v52 }
 0x2ae   :  { %v229_v50 = vadd.f32 1e-06, %v223_v53 }
 0x2b0   :  { %5545 = vrsqrt.f32 %v229_v50 }
 0x2b6   :  { %v5544_v55 = vpop.eup %5543 }
 0x2b7   :  { %v240_v56 = vmul.f32 %v5544_v55, %v192_v17 }
 0x2b9   :  { %v250_v59 = vmul.f32 %v245_v21, %v240_v56 }
 0x2ba   :  { %v5546_v57 = vpop.eup %5545 }
 0x2bb   :  { %v241_v58 = vmul.f32 %v5546_v57, %v193_v27  ;;  %v260_v61 = vadd.f32 %v255_v31, %v250_v59 }
 0x2bd   :  { %v251_v60 = vmul.f32 %v245_v21, %v241_v58 }
 0x2bf   :  { %v261_v62 = vadd.f32 %v255_v31, %v251_v60 }
 0x2c1   :  { %v264_v0 = vpack.c.bf16 %v261_v62, %v260_v61 }
 0x2c3   :  { %4931 = vmatmul.mubr.msk.bf16.gmra.mrb[8].mxu1 %vm162_vm2, %v264_v0 }
 0x2f5   :  { %v328_v5 = vpop.f32.mrb[0].mxu1 }
 0x2f6   :  { %v4924_v6 = vpop.f32.mrb[1].mxu1  ;;  %v329_v8 = vadd.f32 %v328_v5, %v6031_v3 }
 0x2f7   :  { %v331_v7 = vpop.f32.mrb[2].mxu1 }
 0x2f8   :  { %v332_v11 = vadd.f32 %v331_v7, %v6031_v3  ;;  %v4925_v12 = vpop.f32.mrb[3].mxu1 }
 0x2fa   :  { %v6035_v14 = vpack.c.bf16 %v332_v11, %v329_v8 }
 0x2fc   :  { %355 = vrot.lane.b32.xlu0 %v6035_v14, %s5830_s22  ;;  %4938 = vmatprep.mubr.msk.bf16.mxu1 %vm359_vm3, %v6035_v14 }
 0x2fd   :  { %v336_v15 = vpop.f32.mrb[4].mxu1 }
 0x2fe   :  { %v337_v16 = vadd.f32 %v336_v15, %v6031_v3  ;;  %v4928_v17 = vpop.f32.mrb[5].mxu1 }
 0x2ff   :  { %v339_v18 = vpop.f32.mrb[6].mxu1 }
 0x300   :  { %v6042_v19 = vpack.c.bf16 %v337_v16, %v337_v16  ;;  %v4929_v21 = vpop.f32.mrb[7].mxu1  ;;  %v340_v29 = vadd.f32 %v339_v18, %v6031_v3 }
 0x302   :  { %357 = vrot.lane.b32.xlu1 %v6042_v19, %s5830_s22 }
 0x36e   :  { %v356_v24 = vpop.permute.xlu0 %355 }
 0x36f   :  { %5342 = vmatprep.subr.msk.bf16.mxu1 %vm359_vm3, %v356_v24  ;;  %v367_v25 = vsel %vm359_vm3, %v356_v24, 0 }
 0x370   :  { %4935 = vmatpush3.bf16.xpose.msra.mxu1 %v367_v25 }
 0x374   :  { %v358_v26 = vpop.permute.xlu1 %357 }
 0x375   :  { %5343 = vmatprep.subr.msk.bf16.mxu1 %vm359_vm3, %v358_v26  ;;  %v370_v27 = vsel %vm359_vm3, %v358_v26, 0 }
 0x378   :  { %4937 = vmatpush3.bf16.xpose.msra.mxu1 %v370_v27 }
 0x37f   :  { %4939 = vmatmul.mubr.msk.bf16.vlgmr.msra.gmra.mrb[12].mxu1 %vm359_vm3, %v6042_v19 }
 0x396   :  { %v344_v28 = vpop.f32.mrb[8].mxu1 }
 0x397   :  { %v345_v30 = vadd.f32 %v344_v28, %v6031_v3  ;;  %v4932_v31 = vpop.f32.mrb[9].mxu1 }
 0x398   :  { %v6054_v32 = vpop.f32.mrb[10].mxu1 }
 0x399   :  { %v6056_v33 = vpack.c.bf16 %v345_v30, %v340_v29  ;;  %v4933_v34 = vpop.f32.mrb[11].mxu1 }
 0x452   :  { %v4940_v36 = vpop.f32.mrb[12].mxu1 }
 0x453   :  { %v406_v38 = vpop.f32.mrb[13].mxu1  ;;  %v422_v63 = vsel %vm161_vm4, %v4940_v36, -1e+09 }
 0x454   :  { %v420_v39 = vsel %vm161_vm4, %v406_v38, -1e+09  ;;  %v4941_v40 = vpop.f32.mrb[14].mxu1  ;;  %v430_v45 = vsel %vm423_vm5, %v422_v63, -inf }
 0x455   :  { %v409_v41 = vpop.f32.mrb[15].mxu1  ;;  %v424_v42 = vsel %vm423_vm5, %v420_v39, -inf }
 0x456   :  { %v421_v37 = vsel %vm161_vm4, %v409_v41, -1e+09  ;;  %425 = vmax.xlane.f32.xlu1 %v424_v42 }
 0x457   :  { %v427_v44 = vsel %vm423_vm5, %v421_v37, -inf }
 0x458   :  { %428 = vmax.xlane.f32.xlu0 %v427_v44 }
 0x45c   :  { %431 = vmax.xlane.f32.xlu0 %v430_v45 }
 0x4e3   :  { %v426_v46 = vpop.xlane.xlu1 %425 }
 0x4e4   :  { %v433_v49 = vsub.f32 %v420_v39, %v426_v46 }
 0x4e5   :  { %v429_v47 = vpop.xlane.xlu0 %428 }
 0x4e6   :  { %v434_v43 = vsub.f32 %v421_v37, %v429_v47  ;;  %v436_v50 = vmul.f32 1.442695, %v433_v49 }
 0x4e8   :  { %v438_v51 = vmul.f32 1.442695, %v434_v43 }
 0x4e9   :  { %v432_v52 = vpop.xlane.xlu0 %431 }
 0x4ea   :  { %5547 = vpow2.f32 %v438_v51  ;;  %v435_v53 = vsub.f32 %v422_v63, %v432_v52 }
 0x4ec   :  { %v440_v55 = vmul.f32 1.442695, %v435_v53 }
 0x4ee   :  { %5549 = vpow2.f32 %v440_v55 }
 0x4ef   :  { %5551 = vpow2.f32 %v436_v50 }
 0x4f4   :  { %v5548_v56 = vpop.eup %5547 }
 0x4f5   :  { %v445_v57 = vsel %vm423_vm5, %v5548_v56, 0.0 }
 0x4f6   :  { %446 = vadd.xlane.f32.xlu0 %v445_v57 }
 0x4f8   :  { %v5550_v58 = vpop.eup %5549 }
 0x4f9   :  { %v448_v59 = vsel %vm423_vm5, %v5550_v58, 0.0  ;;  %v5552_v60 = vpop.eup %5551 }
 0x4fa   :  { %449 = vadd.xlane.f32.xlu1 %v448_v59  ;;  %v442_v61 = vsel %vm423_vm5, %v5552_v60, 0.0 }
 0x4fe   :  { %443 = vadd.xlane.f32.xlu1 %v442_v61 }
 0x50c   :  { %459 = vrot.lane.b32.xlu0 %v6035_v14, %s5831_s2 }
 0x50f   :  { %461 = vrot.lane.b32.xlu1 %v6042_v19, %s5831_s2 }
 0x510   :  { %522 = vrot.lane.b32.xlu0 %v6035_v14, %s5832_s23 }
 0x513   :  { %526 = vrot.lane.b32.xlu1 %v6035_v14, %s5833_s24 }
 0x517   :  { %528 = vrot.lane.b32.xlu1 %v6042_v19, %s5833_s24 }
 0x51b   :  { %524 = vrot.lane.b32.xlu1 %v6042_v19, %s5832_s23 }
 0x583   :  { %v447_v62 = vpop.xlane.xlu0 %446 }
 0x587   :  { %v450_v0 = vpop.xlane.xlu1 %449  ;;  %v460_v2 = vpop.permute.xlu0 %459 }
 0x588   :  { %4942 = vmatprep.subr.bf16.mxu1 %v460_v2  ;;  %5553 = vrcp.f32 %v450_v0 }
 0x589   :  { %4943 = vmatpush3.bf16.msra.mxu1 %v460_v2  ;;  %5555 = vrcp.f32 %v447_v62 }
 0x58b   :  { %v444_v5 = vpop.xlane.xlu1 %443  ;;  %v523_v25 = vpop.permute.xlu0 %522 }
 0x58c   :  { %5557 = vrcp.f32 %v444_v5 }
 0x58f   :  { %v462_v6 = vpop.permute.xlu1 %461 }
 0x590   :  { %5344 = vmatprep.subr.msk.bf16.mxu1 %vm470_vm6, %v462_v6  ;;  %v472_v7 = vsel %vm470_vm6, %v462_v6, 0 }
 0x591   :  { %4945 = vmatpush3.bf16.msra.mxu1 %v472_v7 }
 0x592   :  { %v5554_v8 = vpop.eup %5553 }
 0x593   :  { %v527_v11 = vpop.permute.xlu1 %526  ;;  %v5556_v12 = vpop.eup %5555  ;;  %v456_v16 = vmul.f32 %v5554_v8, %v5550_v58 }
 0x594   :  { %5345 = vmatprep.subr.msk.bf16.mxu1 %vm359_vm3, %v527_v11  ;;  %v455_v18 = vmul.f32 %v5556_v12, %v5548_v56  ;;  %v537_v26 = vsel %vm359_vm3, %v527_v11, 0 }
 0x595   :  { %v458_v24 = vpack.c.bf16 %v456_v16, %v456_v16 }
 0x596   :  { %v5558_v15 = vpop.eup %5557 }
 0x597   :  { %v454_v17 = vmul.f32 %v5558_v15, %v5552_v60  ;;  %v529_v27 = vpop.permute.xlu1 %528 }
 0x598   :  { %v540_v28 = vsel %vm359_vm3, %v529_v27, 0 }
 0x599   :  { %v457_v21 = vpack.c.bf16 %v455_v18, %v454_v17 }
 0x59b   :  { %4946 = vmatprep.mubr.msk.bf16.mxu1 %vm423_vm5, %v457_v21  ;;  %v525_v29 = vpop.permute.xlu1 %524 }
 0x59c   :  { %4947 = vmatmul.mubr.msk.bf16.vlgmr.msra.gmra.mrb[16].mxu1 %vm423_vm5, %v458_v24 }
 0x59d   :  { %4951 = vmatpush3.bf16.xpose.msra.mxu1 %v537_v26  ;;  %4954 = vmatprep.mubr.msk.bf16.mxu1 %vm359_vm3, %v523_v25 }
 0x59e   :  { %5346 = vmatprep.subr.msk.bf16.mxu1 %vm359_vm3, %v529_v27 }
 0x5a5   :  { %4953 = vmatpush3.bf16.xpose.msra.mxu1 %v540_v28 }
 0x5ac   :  { %4955 = vmatmul.mubr.msk.bf16.vlgmr.msra.gmra.mrb[20].mxu1 %vm359_vm3, %v525_v29 }
 0x66f   :  { %v6096_v30 = vpop.f32.mrb[16].mxu1 }
 0x670   :  { %v6098_v31 = vpop.f32.mrb[17].mxu1 }
 0x671   :  { %v4949_v34 = vpop.f32.mrb[18].mxu1 }
 0x672   :  { %v6100_v36 = vpop.f32.mrb[19].mxu1 }
 0x67f   :  { %v4956_v38 = vpop.f32.mrb[20].mxu1 }
 0x680   :  { %v576_v39 = vpop.f32.mrb[21].mxu1  ;;  %v592_v44 = vsel %vm161_vm4, %v4956_v38, -1e+09 }
 0x681   :  { %v590_v40 = vsel %vm161_vm4, %v576_v39, -1e+09  ;;  %v4957_v41 = vpop.f32.mrb[22].mxu1  ;;  %v599_v46 = vsel %vm423_vm5, %v592_v44, -inf }
 0x682   :  { %v579_v42 = vpop.f32.mrb[23].mxu1  ;;  %v593_v37 = vsel %vm423_vm5, %v590_v40, -inf }
 0x683   :  { %v591_v63 = vsel %vm161_vm4, %v579_v42, -1e+09  ;;  %594 = vmax.xlane.f32.xlu0 %v593_v37 }
 0x684   :  { %v596_v45 = vsel %vm423_vm5, %v591_v63, -inf }
 0x685   :  { %597 = vmax.xlane.f32.xlu1 %v596_v45 }
 0x687   :  { %600 = vmax.xlane.f32.xlu0 %v599_v46 }
 0x710   :  { %v595_v47 = vpop.xlane.xlu0 %594 }
 0x711   :  { %v602_v43 = vsub.f32 %v590_v40, %v595_v47 }
 0x712   :  { %v598_v49 = vpop.xlane.xlu1 %597 }
 0x713   :  { %v605_v51 = vmul.f32 1.442695, %v602_v43  ;;  %v603_v52 = vsub.f32 %v591_v63, %v598_v49 }
 0x714   :  { %v601_v53 = vpop.xlane.xlu0 %600 }
 0x715   :  { %5559 = vpow2.f32 %v605_v51  ;;  %v607_v50 = vmul.f32 1.442695, %v603_v52  ;;  %v604_v55 = vsub.f32 %v592_v44, %v601_v53 }
 0x717   :  { %5561 = vpow2.f32 %v607_v50  ;;  %v609_v56 = vmul.f32 1.442695, %v604_v55 }
 0x719   :  { %5563 = vpow2.f32 %v609_v56 }
 0x71f   :  { %v5560_v57 = vpop.eup %5559 }
 0x720   :  { %v611_v58 = vsel %vm423_vm5, %v5560_v57, 0.0 }
 0x721   :  { %v5562_v59 = vpop.eup %5561  ;;  %612 = vadd.xlane.f32.xlu0 %v611_v58 }
 0x722   :  { %v614_v62 = vsel %vm423_vm5, %v5562_v59, 0.0 }
 0x723   :  { %v5564_v60 = vpop.eup %5563 }
 0x724   :  { %v617_v61 = vsel %vm423_vm5, %v5564_v60, 0.0 }
 0x725   :  { %618 = vadd.xlane.f32.xlu1 %v617_v61  ;;  %615 = vadd.xlane.f32.xlu0 %v614_v62 }
 0x736   :  { %630 = vrot.lane.b32.xlu1 %v6042_v19, %s5834_s25 }
 0x73a   :  { %694 = vrot.lane.b32.xlu1 %v6035_v14, %s5835_s26 }
 0x73b   :  { %628 = vrot.lane.b32.xlu0 %v6035_v14, %s5834_s25 }
 0x73e   :  { %696 = vrot.lane.b32.xlu1 %v6042_v19, %s5835_s26 }
 0x73f   :  { %690 = vrot.lane.b32.xlu0 %v6035_v14, %s5836_s27 }
 0x742   :  { %692 = vrot.lane.b32.xlu1 %v6042_v19, %s5836_s27 }
 0x7ae   :  { %v613_v0 = vpop.xlane.xlu0 %612 }
 0x7af   :  { %5565 = vrcp.f32 %v613_v0 }
 0x7b2   :  { %v616_v2 = vpop.xlane.xlu0 %615  ;;  %v619_v5 = vpop.xlane.xlu1 %618 }
 0x7b3   :  { %5567 = vrcp.f32 %v616_v2 }
 0x7b4   :  { %5569 = vrcp.f32 %v619_v5 }
 0x7b6   :  { %v629_v6 = vpop.permute.xlu0 %628  ;;  %v631_v7 = vpop.permute.xlu1 %630 }
 0x7b7   :  { %4958 = vmatprep.subr.bf16.mxu0 %v629_v6  ;;  %v640_v11 = vsel %vm470_vm6, %v631_v7, 0 }
 0x7b8   :  { %4959 = vmatpush3.bf16.msra.mxu0 %v629_v6 }
 0x7b9   :  { %5347 = vmatprep.subr.msk.bf16.mxu0 %vm470_vm6, %v631_v7  ;;  %v5566_v8 = vpop.eup %5565 }
 0x7ba   :  { %v695_v12 = vpop.permute.xlu1 %694  ;;  %v623_v17 = vmul.f32 %v5566_v8, %v5560_v57  ;;  %v691_v26 = vpop.permute.xlu0 %690 }
 0x7bb   :  { %v705_v27 = vsel %vm359_vm3, %v695_v12, 0 }
 0x7bc   :  { %4961 = vmatpush3.bf16.msra.mxu0 %v640_v11 }
 0x7bd   :  { %v5568_v15 = vpop.eup %5567  ;;  %5348 = vmatprep.subr.msk.bf16.mxu0 %vm359_vm3, %v695_v12 }
 0x7be   :  { %v5570_v16 = vpop.eup %5569  ;;  %v624_v18 = vmul.f32 %v5568_v15, %v5562_v59  ;;  %v697_v28 = vpop.permute.xlu1 %696 }
 0x7bf   :  { %v625_v21 = vmul.f32 %v5570_v16, %v5564_v60  ;;  %v708_v29 = vsel %vm359_vm3, %v697_v28, 0 }
 0x7c0   :  { %v626_v24 = vpack.c.bf16 %v624_v18, %v623_v17 }
 0x7c1   :  { %v627_v25 = vpack.c.bf16 %v625_v21, %v625_v21 }
 0x7c2   :  { %4962 = vmatprep.mubr.msk.bf16.mxu0 %vm423_vm5, %v626_v24  ;;  %v693_v34 = vpop.permute.xlu1 %692 }
 0x7c3   :  { %4963 = vmatmul.mubr.msk.bf16.vlgmr.msra.gmra.mrb[12].mxu0 %vm423_vm5, %v627_v25 }
 0x7c4   :  { %4970 = vmatprep.mubr.msk.bf16.mxu0 %vm359_vm3, %v691_v26 }
 0x7c5   :  { %4967 = vmatpush3.bf16.xpose.msra.mxu0 %v705_v27 }
 0x7c6   :  { %5349 = vmatprep.subr.msk.bf16.mxu0 %vm359_vm3, %v697_v28 }
 0x7cd   :  { %4969 = vmatpush3.bf16.xpose.msra.mxu0 %v708_v29 }
 0x7d4   :  { %4971 = vmatmul.mubr.msk.bf16.vlgmr.msra.gmra.mrb[16].mxu0 %vm359_vm3, %v693_v34 }
 0x896   :  { %v6136_v38 = vpop.f32.mrb[12].mxu0 }
 0x897   :  { %v6138_v39 = vpop.f32.mrb[13].mxu0 }
 0x898   :  { %v4965_v40 = vpop.f32.mrb[14].mxu0 }
 0x899   :  { %v6140_v41 = vpop.f32.mrb[15].mxu0 }
 0x89a   :  { %v5407_v42 = vpack.i.bf16 %v6140_v41, %v6138_v39 }
 0x8a7   :  { %v4972_v37 = vpop.f32.mrb[16].mxu0 }
 0x8a8   :  { %v744_v44 = vpop.f32.mrb[17].mxu0  ;;  %v760_v43 = vsel %vm161_vm4, %v4972_v37, -1e+09 }
 0x8a9   :  { %v758_v63 = vsel %vm161_vm4, %v744_v44, -1e+09  ;;  %v4973_v45 = vpop.f32.mrb[18].mxu0  ;;  %v767_v52 = vsel %vm423_vm5, %v760_v43, -inf }
 0x8aa   :  { %v747_v46 = vpop.f32.mrb[19].mxu0  ;;  %v761_v47 = vsel %vm423_vm5, %v758_v63, -inf }
 0x8ab   :  { %v759_v49 = vsel %vm161_vm4, %v747_v46, -1e+09  ;;  %762 = vmax.xlane.f32.xlu0 %v761_v47 }
 0x8ac   :  { %v764_v51 = vsel %vm423_vm5, %v759_v49, -inf }
 0x8ad   :  { %765 = vmax.xlane.f32.xlu1 %v764_v51 }
 0x8af   :  { %768 = vmax.xlane.f32.xlu0 %v767_v52 }
 0x938   :  { %v763_v53 = vpop.xlane.xlu0 %762 }
 0x939   :  { %v770_v50 = vsub.f32 %v758_v63, %v763_v53 }
 0x93a   :  { %v766_v55 = vpop.xlane.xlu1 %765 }
 0x93b   :  { %v773_v56 = vmul.f32 1.442695, %v770_v50  ;;  %v771_v57 = vsub.f32 %v759_v49, %v766_v55 }
 0x93c   :  { %v769_v58 = vpop.xlane.xlu0 %768 }
 0x93d   :  { %5571 = vpow2.f32 %v773_v56  ;;  %v775_v59 = vmul.f32 1.442695, %v771_v57  ;;  %v772_v60 = vsub.f32 %v760_v43, %v769_v58 }
 0x93f   :  { %5573 = vpow2.f32 %v775_v59  ;;  %v777_v61 = vmul.f32 1.442695, %v772_v60 }
 0x941   :  { %5575 = vpow2.f32 %v777_v61 }
 0x947   :  { %v5572_v62 = vpop.eup %5571 }
 0x948   :  { %v779_v0 = vsel %vm423_vm5, %v5572_v62, 0.0 }
 0x949   :  { %v5574_v2 = vpop.eup %5573  ;;  %780 = vadd.xlane.f32.xlu0 %v779_v0 }
 0x94a   :  { %v782_v7 = vsel %vm423_vm5, %v5574_v2, 0.0 }
 0x94b   :  { %v5576_v5 = vpop.eup %5575 }
 0x94c   :  { %v785_v6 = vsel %vm423_vm5, %v5576_v5, 0.0 }
 0x94d   :  { %786 = vadd.xlane.f32.xlu1 %v785_v6  ;;  %783 = vadd.xlane.f32.xlu0 %v782_v7 }
 0x95e   :  { %798 = vrot.lane.b32.xlu1 %v6042_v19, %s5837_s1 }
 0x962   :  { %862 = vrot.lane.b32.xlu1 %v6035_v14, %s5838_s28 }
 0x963   :  { %796 = vrot.lane.b32.xlu0 %v6035_v14, %s5837_s1 }
 0x966   :  { %864 = vrot.lane.b32.xlu1 %v6042_v19, %s5838_s28 }
 0x967   :  { %858 = vrot.lane.b32.xlu0 %v6035_v14, %s5839_s29 }
 0x96a   :  { %860 = vrot.lane.b32.xlu1 %v6042_v19, %s5839_s29 }
 0x9d6   :  { %v781_v8 = vpop.xlane.xlu0 %780 }
 0x9d7   :  { %5577 = vrcp.f32 %v781_v8 }
 0x9da   :  { %v784_v11 = vpop.xlane.xlu0 %783  ;;  %v787_v12 = vpop.xlane.xlu1 %786 }
 0x9db   :  { %5579 = vrcp.f32 %v784_v11 }
 0x9dc   :  { %5581 = vrcp.f32 %v787_v12 }
 0x9de   :  { %v797_v15 = vpop.permute.xlu0 %796  ;;  %v799_v16 = vpop.permute.xlu1 %798 }
 0x9df   :  { %4974 = vmatprep.subr.bf16.mxu1 %v797_v15  ;;  %v808_v18 = vsel %vm470_vm6, %v799_v16, 0 }
 0x9e0   :  { %4975 = vmatpush3.bf16.msra.mxu1 %v797_v15 }
 0x9e1   :  { %5350 = vmatprep.subr.msk.bf16.mxu1 %vm470_vm6, %v799_v16  ;;  %v5578_v17 = vpop.eup %5577 }
 0x9e2   :  { %v863_v21 = vpop.permute.xlu1 %862  ;;  %v791_v26 = vmul.f32 %v5578_v17, %v5572_v62  ;;  %v859_v40 = vpop.permute.xlu0 %858 }
 0x9e3   :  { %v873_v37 = vsel %vm359_vm3, %v863_v21, 0 }
 0x9e4   :  { %4977 = vmatpush3.bf16.msra.mxu1 %v808_v18 }
 0x9e5   :  { %v5580_v24 = vpop.eup %5579  ;;  %5351 = vmatprep.subr.msk.bf16.mxu1 %vm359_vm3, %v863_v21 }
 0x9e6   :  { %v5582_v25 = vpop.eup %5581  ;;  %v792_v27 = vmul.f32 %v5580_v24, %v5574_v2  ;;  %v865_v44 = vpop.permute.xlu1 %864 }
 0x9e7   :  { %v793_v28 = vmul.f32 %v5582_v25, %v5576_v5  ;;  %v876_v63 = vsel %vm359_vm3, %v865_v44, 0  ;;  %v348_v25 = vadd.f32 %v6054_v32, %v6031_v3 }
 0x9e8   :  { %v794_v29 = vpack.c.bf16 %v792_v27, %v791_v26 }
 0x9e9   :  { %v795_v34 = vpack.c.bf16 %v793_v28, %v793_v28  ;;  %v6206_v26 = vpack.c.bf16 %v348_v25, %v348_v25 }
 0x9ea   :  { %4978 = vmatprep.mubr.msk.bf16.mxu1 %vm423_vm5, %v794_v29  ;;  %v861_v45 = vpop.permute.xlu1 %860 }
 0x9eb   :  { %4979 = vmatmul.mubr.msk.bf16.vlgmr.msra.gmra.mrb[24].mxu1 %vm423_vm5, %v795_v34 }
 0x9ec   :  { %4986 = vmatprep.mubr.msk.bf16.mxu1 %vm359_vm3, %v859_v40 }
 0x9ed   :  { %4983 = vmatpush3.bf16.xpose.msra.mxu1 %v873_v37 }
 0x9ee   :  { %5352 = vmatprep.subr.msk.bf16.mxu1 %vm359_vm3, %v865_v44 }
 0x9f5   :  { %4985 = vmatpush3.bf16.xpose.msra.mxu1 %v876_v63 }
 0x9fc   :  { %4987 = vmatmul.mubr.msk.bf16.vlgmr.msra.gmra.mrb[28].mxu1 %vm359_vm3, %v861_v45 }
 0xabe   :  { %v6178_v46 = vpop.f32.mrb[24].mxu1 }
 0xabf   :  { %v6180_v47 = vpop.f32.mrb[25].mxu1 }
 0xac0   :  { %v4981_v43 = vpop.f32.mrb[26].mxu1 }
 0xac1   :  { %v6182_v49 = vpop.f32.mrb[27].mxu1 }
 0xac2   :  { %v5412_v51 = vpack.i.bf16 %v6182_v49, %v6180_v47 }
 0xacf   :  { %v4988_v52 = vpop.f32.mrb[28].mxu1 }
 0xad0   :  { %v912_v53 = vpop.f32.mrb[29].mxu1  ;;  %v928_v58 = vsel %vm161_vm4, %v4988_v52, -1e+09 }
 0xad1   :  { %v926_v50 = vsel %vm161_vm4, %v912_v53, -1e+09  ;;  %v4989_v55 = vpop.f32.mrb[30].mxu1  ;;  %v935_v61 = vsel %vm423_vm5, %v928_v58, -inf }
 0xad2   :  { %v915_v56 = vpop.f32.mrb[31].mxu1  ;;  %v929_v57 = vsel %vm423_vm5, %v926_v50, -inf }
 0xad3   :  { %v927_v59 = vsel %vm161_vm4, %v915_v56, -1e+09  ;;  %930 = vmax.xlane.f32.xlu0 %v929_v57 }
 0xad4   :  { %v932_v60 = vsel %vm423_vm5, %v927_v59, -inf }
 0xad5   :  { %933 = vmax.xlane.f32.xlu1 %v932_v60 }
 0xad7   :  { %936 = vmax.xlane.f32.xlu0 %v935_v61 }
 0xb60   :  { %v931_v62 = vpop.xlane.xlu0 %930 }
 0xb61   :  { %v938_v0 = vsub.f32 %v926_v50, %v931_v62 }
 0xb62   :  { %v934_v2 = vpop.xlane.xlu1 %933 }
 0xb63   :  { %v941_v5 = vmul.f32 1.442695, %v938_v0  ;;  %v939_v6 = vsub.f32 %v927_v59, %v934_v2 }
 0xb64   :  { %v937_v7 = vpop.xlane.xlu0 %936 }
 0xb65   :  { %5583 = vpow2.f32 %v941_v5  ;;  %v943_v8 = vmul.f32 1.442695, %v939_v6  ;;  %v940_v11 = vsub.f32 %v928_v58, %v937_v7 }
 0xb67   :  { %5585 = vpow2.f32 %v943_v8  ;;  %v945_v12 = vmul.f32 1.442695, %v940_v11 }
 0xb69   :  { %5587 = vpow2.f32 %v945_v12 }
 0xb6f   :  { %v5584_v15 = vpop.eup %5583 }
 0xb70   :  { %v947_v16 = vsel %vm423_vm5, %v5584_v15, 0.0 }
 0xb71   :  { %v5586_v17 = vpop.eup %5585  ;;  %948 = vadd.xlane.f32.xlu0 %v947_v16 }
 0xb72   :  { %v950_v24 = vsel %vm423_vm5, %v5586_v17, 0.0 }
 0xb73   :  { %v5588_v18 = vpop.eup %5587 }
 0xb74   :  { %v953_v21 = vsel %vm423_vm5, %v5588_v18, 0.0 }
 0xb75   :  { %954 = vadd.xlane.f32.xlu1 %v953_v21  ;;  %951 = vadd.xlane.f32.xlu0 %v950_v24 }
 0xb86   :  { %966 = vrot.lane.b32.xlu1 %v6042_v19, %s5840_s30 }
 0xb8a   :  { %1076 = vrot.lane.b32.xlu1 %v6056_v33, %s5830_s22 }
 0xb8b   :  { %964 = vrot.lane.b32.xlu0 %v6035_v14, %s5840_s30 }
 0xb8e   :  { %1078 = vrot.lane.b32.xlu1 %v6206_v26, %s5830_s22 }
 0xbfe   :  { %v949_v27 = vpop.xlane.xlu0 %948 }
 0xbff   :  { %5589 = vrcp.f32 %v949_v27 }
 0xc02   :  { %v952_v28 = vpop.xlane.xlu0 %951  ;;  %v955_v29 = vpop.xlane.xlu1 %954 }
 0xc03   :  { %5591 = vrcp.f32 %v952_v28 }
 0xc04   :  { %5593 = vrcp.f32 %v955_v29 }
 0xc06   :  { %v965_v19 = vpop.permute.xlu0 %964  ;;  %v967_v34 = vpop.permute.xlu1 %966 }
 0xc07   :  { %4990 = vmatprep.subr.bf16.mxu0 %v965_v19  ;;  %v976_v14 = vsel %vm470_vm6, %v967_v34, 0 }
 0xc08   :  { %4991 = vmatpush3.bf16.msra.mxu0 %v965_v19 }
 0xc09   :  { %5353 = vmatprep.subr.msk.bf16.mxu0 %vm470_vm6, %v967_v34  ;;  %v5590_v3 = vpop.eup %5589 }
 0xc0a   :  { %v1077_v32 = vpop.permute.xlu1 %1076  ;;  %v959_v44 = vmul.f32 %v5590_v3, %v5584_v15 }
 0xc0b   :  { %v1087_v53 = vsel %vm359_vm3, %v1077_v32, 0 }
 0xc0c   :  { %4993 = vmatpush3.bf16.msra.mxu0 %v976_v14 }
 0xc0d   :  { %v5592_v40 = vpop.eup %5591  ;;  %5354 = vmatprep.subr.msk.bf16.mxu0 %vm359_vm3, %v1077_v32 }
 0xc0e   :  { %v5594_v37 = vpop.eup %5593  ;;  %v960_v63 = vmul.f32 %v5592_v40, %v5586_v17  ;;  %v1079_v50 = vpop.permute.xlu1 %1078 }
 0xc0f   :  { %v961_v45 = vmul.f32 %v5594_v37, %v5588_v18  ;;  %v1090_v55 = vsel %vm359_vm3, %v1079_v50, 0 }
 0xc10   :  { %v962_v43 = vpack.c.bf16 %v960_v63, %v959_v44 }
 0xc11   :  { %v963_v52 = vpack.c.bf16 %v961_v45, %v961_v45 }
 0xc12   :  { %4994 = vmatprep.mubr.msk.bf16.mxu0 %vm423_vm5, %v962_v43 }
 0xc13   :  { %4995 = vmatmul.mubr.msk.bf16.vlgmr.msra.gmra.mrb[20].mxu0 %vm423_vm5, %v963_v52 }
 0xc14   :  { %5002 = vmatprep.mubr.msk.bf16.mxu0 %vm359_vm3, %v6056_v33 }
 0xc15   :  { %4999 = vmatpush3.bf16.xpose.msra.mxu0 %v1087_v53 }
 0xc16   :  { %5355 = vmatprep.subr.msk.bf16.mxu0 %vm359_vm3, %v1079_v50 }
 0xc1d   :  { %5001 = vmatpush3.bf16.xpose.msra.mxu0 %v1090_v55 }
 0xc24   :  { %5003 = vmatmul.mubr.msk.bf16.vlgmr.msra.gmra.mrb[24].mxu0 %vm359_vm3, %v6206_v26 }
 0xce6   :  { %v6222_v56 = vpop.f32.mrb[20].mxu0 }
 0xce7   :  { %v6224_v57 = vpop.f32.mrb[21].mxu0 }
 0xce8   :  { %v4997_v58 = vpop.f32.mrb[22].mxu0 }
 0xce9   :  { %v6226_v59 = vpop.f32.mrb[23].mxu0 }
 0xcea   :  { %v5417_v60 = vpack.i.bf16 %v6226_v59, %v6224_v57 }
 0xcf7   :  { %v5004_v61 = vpop.f32.mrb[24].mxu0 }
 0xcf8   :  { %v1126_v62 = vpop.f32.mrb[25].mxu0  ;;  %v1142_v7 = vsel %vm161_vm4, %v5004_v61, -1e+09 }
 0xcf9   :  { %v1140_v0 = vsel %vm161_vm4, %v1126_v62, -1e+09  ;;  %v5005_v2 = vpop.f32.mrb[26].mxu0  ;;  %v1149_v12 = vsel %vm423_vm5, %v1142_v7, -inf }
 0xcfa   :  { %v1129_v5 = vpop.f32.mrb[27].mxu0  ;;  %v1143_v6 = vsel %vm423_vm5, %v1140_v0, -inf }
 0xcfb   :  { %v1141_v8 = vsel %vm161_vm4, %v1129_v5, -1e+09  ;;  %1144 = vmax.xlane.f32.xlu0 %v1143_v6 }
 0xcfc   :  { %v1146_v11 = vsel %vm423_vm5, %v1141_v8, -inf }
 0xcfd   :  { %1147 = vmax.xlane.f32.xlu1 %v1146_v11 }
 0xcff   :  { %1150 = vmax.xlane.f32.xlu0 %v1149_v12 }
 0xd88   :  { %v1145_v15 = vpop.xlane.xlu0 %1144 }
 0xd89   :  { %v1152_v16 = vsub.f32 %v1140_v0, %v1145_v15 }
 0xd8a   :  { %v1148_v17 = vpop.xlane.xlu1 %1147 }
 0xd8b   :  { %v1155_v18 = vmul.f32 1.442695, %v1152_v16  ;;  %v1153_v21 = vsub.f32 %v1141_v8, %v1148_v17 }
 0xd8c   :  { %v1151_v24 = vpop.xlane.xlu0 %1150 }
 0xd8d   :  { %5595 = vpow2.f32 %v1155_v18  ;;  %v1157_v25 = vmul.f32 1.442695, %v1153_v21  ;;  %v1154_v27 = vsub.f32 %v1142_v7, %v1151_v24 }
 0xd8f   :  { %5597 = vpow2.f32 %v1157_v25  ;;  %v1159_v28 = vmul.f32 1.442695, %v1154_v27 }
 0xd91   :  { %5599 = vpow2.f32 %v1159_v28 }
 0xd97   :  { %v5596_v29 = vpop.eup %5595 }
 0xd98   :  { %v1161_v19 = vsel %vm423_vm5, %v5596_v29, 0.0 }
 0xd99   :  { %v5598_v34 = vpop.eup %5597  ;;  %1162 = vadd.xlane.f32.xlu0 %v1161_v19 }
 0xd9a   :  { %v1164_v32 = vsel %vm423_vm5, %v5598_v34, 0.0 }
 0xd9b   :  { %v5600_v3 = vpop.eup %5599 }
 0xd9c   :  { %v1167_v14 = vsel %vm423_vm5, %v5600_v3, 0.0 }
 0xd9d   :  { %1168 = vadd.xlane.f32.xlu1 %v1167_v14  ;;  %1165 = vadd.xlane.f32.xlu0 %v1164_v32 }
 0xdae   :  { %1180 = vrot.lane.b32.xlu1 %v6206_v26, %s5831_s2 }
 0xdb2   :  { %1244 = vrot.lane.b32.xlu1 %v6056_v33, %s5833_s24 }
 0xdb3   :  { %1178 = vrot.lane.b32.xlu0 %v6056_v33, %s5831_s2 }
 0xdb6   :  { %1246 = vrot.lane.b32.xlu1 %v6206_v26, %s5833_s24 }
 0xdb7   :  { %1240 = vrot.lane.b32.xlu0 %v6056_v33, %s5832_s23 }
 0xdba   :  { %1242 = vrot.lane.b32.xlu1 %v6206_v26, %s5832_s23 }
 0xe26   :  { %v1163_v40 = vpop.xlane.xlu0 %1162 }
 0xe27   :  { %5601 = vrcp.f32 %v1163_v40 }
 0xe2a   :  { %v1166_v37 = vpop.xlane.xlu0 %1165  ;;  %v1169_v44 = vpop.xlane.xlu1 %1168 }
 0xe2b   :  { %5603 = vrcp.f32 %v1166_v37 }
 0xe2c   :  { %5605 = vrcp.f32 %v1169_v44 }
 0xe2e   :  { %v1179_v63 = vpop.permute.xlu0 %1178  ;;  %v1181_v45 = vpop.permute.xlu1 %1180 }
 0xe2f   :  { %5006 = vmatprep.subr.bf16.mxu1 %v1179_v63  ;;  %v1190_v52 = vsel %vm470_vm6, %v1181_v45, 0 }
 0xe30   :  { %5007 = vmatpush3.bf16.msra.mxu1 %v1179_v63 }
 0xe31   :  { %5356 = vmatprep.subr.msk.bf16.mxu1 %vm470_vm6, %v1181_v45  ;;  %v5602_v43 = vpop.eup %5601 }
 0xe32   :  { %v1245_v53 = vpop.permute.xlu1 %1244  ;;  %v1173_v58 = vmul.f32 %v5602_v43, %v5596_v29  ;;  %v1241_v5 = vpop.permute.xlu0 %1240 }
 0xe33   :  { %v1255_v6 = vsel %vm359_vm3, %v1245_v53, 0 }
 0xe34   :  { %5009 = vmatpush3.bf16.msra.mxu1 %v1190_v52 }
 0xe35   :  { %v5604_v50 = vpop.eup %5603  ;;  %5357 = vmatprep.subr.msk.bf16.mxu1 %vm359_vm3, %v1245_v53 }
 0xe36   :  { %v5606_v55 = vpop.eup %5605  ;;  %v1174_v61 = vmul.f32 %v5604_v50, %v5598_v34  ;;  %v1247_v7 = vpop.permute.xlu1 %1246 }
 0xe37   :  { %v1175_v62 = vmul.f32 %v5606_v55, %v5600_v3  ;;  %v1258_v8 = vsel %vm359_vm3, %v1247_v7, 0 }
 0xe38   :  { %v1176_v0 = vpack.c.bf16 %v1174_v61, %v1173_v58 }
 0xe39   :  { %v1177_v2 = vpack.c.bf16 %v1175_v62, %v1175_v62 }
 0xe3a   :  { %5010 = vmatprep.mubr.msk.bf16.mxu1 %vm423_vm5, %v1176_v0  ;;  %v1243_v11 = vpop.permute.xlu1 %1242 }
 0xe3b   :  { %5011 = vmatmul.mubr.msk.bf16.vlgmr.msra.gmra.mrb[32].mxu1 %vm423_vm5, %v1177_v2 }
 0xe3c   :  { %5018 = vmatprep.mubr.msk.bf16.mxu1 %vm359_vm3, %v1241_v5 }
 0xe3d   :  { %5015 = vmatpush3.bf16.xpose.msra.mxu1 %v1255_v6 }
 0xe3e   :  { %5358 = vmatprep.subr.msk.bf16.mxu1 %vm359_vm3, %v1247_v7 }
 0xe45   :  { %5017 = vmatpush3.bf16.xpose.msra.mxu1 %v1258_v8 }
 0xe4c   :  { %5019 = vmatmul.mubr.msk.bf16.vlgmr.msra.gmra.mrb[36].mxu1 %vm359_vm3, %v1243_v11 }
 0xf0e   :  { %v6264_v12 = vpop.f32.mrb[32].mxu1 }
 0xf0f   :  { %v6266_v15 = vpop.f32.mrb[33].mxu1 }
 0xf10   :  { %v5013_v16 = vpop.f32.mrb[34].mxu1 }
 0xf11   :  { %v6268_v17 = vpop.f32.mrb[35].mxu1 }
 0xf1f   :  { %v5020_v18 = vpop.f32.mrb[36].mxu1 }
 0xf20   :  { %v1294_v21 = vpop.f32.mrb[37].mxu1  ;;  %v1310_v29 = vsel %vm161_vm4, %v5020_v18, -1e+09 }
 0xf21   :  { %v1308_v24 = vsel %vm161_vm4, %v1294_v21, -1e+09  ;;  %v5021_v25 = vpop.f32.mrb[38].mxu1  ;;  %v1317_v3 = vsel %vm423_vm5, %v1310_v29, -inf }
 0xf22   :  { %v1297_v27 = vpop.f32.mrb[39].mxu1  ;;  %v1311_v28 = vsel %vm423_vm5, %v1308_v24, -inf }
 0xf23   :  { %v1309_v19 = vsel %vm161_vm4, %v1297_v27, -1e+09  ;;  %1312 = vmax.xlane.f32.xlu0 %v1311_v28 }
 0xf24   :  { %v1314_v34 = vsel %vm423_vm5, %v1309_v19, -inf }
 0xf25   :  { %1315 = vmax.xlane.f32.xlu1 %v1314_v34 }
 0xf27   :  { %1318 = vmax.xlane.f32.xlu0 %v1317_v3 }
 0xfb0   :  { %v1313_v14 = vpop.xlane.xlu0 %1312 }
 0xfb1   :  { %v1320_v32 = vsub.f32 %v1308_v24, %v1313_v14 }
 0xfb2   :  { %v1316_v40 = vpop.xlane.xlu1 %1315 }
 0xfb3   :  { %v1323_v37 = vmul.f32 1.442695, %v1320_v32  ;;  %v1321_v44 = vsub.f32 %v1309_v19, %v1316_v40 }
 0xfb4   :  { %v1319_v63 = vpop.xlane.xlu0 %1318 }
 0xfb5   :  { %5607 = vpow2.f32 %v1323_v37  ;;  %v1325_v45 = vmul.f32 1.442695, %v1321_v44  ;;  %v1322_v43 = vsub.f32 %v1310_v29, %v1319_v63 }
 0xfb7   :  { %5609 = vpow2.f32 %v1325_v45  ;;  %v1327_v52 = vmul.f32 1.442695, %v1322_v43 }
 0xfb9   :  { %5611 = vpow2.f32 %v1327_v52 }
 0xfbf   :  { %v5608_v53 = vpop.eup %5607 }
 0xfc0   :  { %v1329_v50 = vsel %vm423_vm5, %v5608_v53, 0.0 }
 0xfc1   :  { %v5610_v55 = vpop.eup %5609  ;;  %1330 = vadd.xlane.f32.xlu0 %v1329_v50 }
 0xfc2   :  { %v1332_v62 = vsel %vm423_vm5, %v5610_v55, 0.0 }
 0xfc3   :  { %v5612_v58 = vpop.eup %5611 }
 0xfc4   :  { %v1335_v61 = vsel %vm423_vm5, %v5612_v58, 0.0 }
 0xfc5   :  { %1336 = vadd.xlane.f32.xlu1 %v1335_v61  ;;  %1333 = vadd.xlane.f32.xlu0 %v1332_v62 }
 0xfd6   :  { %1348 = vrot.lane.b32.xlu1 %v6206_v26, %s5834_s25 }
 0xfda   :  { %1412 = vrot.lane.b32.xlu1 %v6056_v33, %s5835_s26 }
 0xfdb   :  { %1346 = vrot.lane.b32.xlu0 %v6056_v33, %s5834_s25 }
 0xfde   :  { %1414 = vrot.lane.b32.xlu1 %v6206_v26, %s5835_s26 }
 0xfdf   :  { %1408 = vrot.lane.b32.xlu0 %v6056_v33, %s5836_s27 }
 0xfe2   :  { %1410 = vrot.lane.b32.xlu1 %v6206_v26, %s5836_s27 }
0x104e   :  { %v1331_v0 = vpop.xlane.xlu0 %1330 }
0x104f   :  { %5613 = vrcp.f32 %v1331_v0 }
0x1052   :  { %v1334_v2 = vpop.xlane.xlu0 %1333  ;;  %v1337_v5 = vpop.xlane.xlu1 %1336 }
0x1053   :  { %5615 = vrcp.f32 %v1334_v2 }
0x1054   :  { %5617 = vrcp.f32 %v1337_v5 }
0x1056   :  { %v1347_v6 = vpop.permute.xlu0 %1346  ;;  %v1349_v7 = vpop.permute.xlu1 %1348 }
0x1057   :  { %5022 = vmatprep.subr.bf16.mxu0 %v1347_v6  ;;  %v1358_v11 = vsel %vm470_vm6, %v1349_v7, 0 }
0x1058   :  { %5023 = vmatpush3.bf16.msra.mxu0 %v1347_v6 }
0x1059   :  { %5359 = vmatprep.subr.msk.bf16.mxu0 %vm470_vm6, %v1349_v7  ;;  %v5614_v8 = vpop.eup %5613 }
0x105a   :  { %v1413_v16 = vpop.permute.xlu1 %1412  ;;  %v1341_v24 = vmul.f32 %v5614_v8, %v5608_v53  ;;  %v1409_v19 = vpop.permute.xlu0 %1408 }
0x105b   :  { %v1423_v34 = vsel %vm359_vm3, %v1413_v16, 0 }
0x105c   :  { %5025 = vmatpush3.bf16.msra.mxu0 %v1358_v11 }
0x105d   :  { %v5616_v18 = vpop.eup %5615  ;;  %5360 = vmatprep.subr.msk.bf16.mxu0 %vm359_vm3, %v1413_v16 }
0x105e   :  { %v5618_v21 = vpop.eup %5617  ;;  %v1342_v25 = vmul.f32 %v5616_v18, %v5610_v55  ;;  %v1415_v3 = vpop.permute.xlu1 %1414 }
0x105f   :  { %v1343_v27 = vmul.f32 %v5618_v21, %v5612_v58  ;;  %v1426_v14 = vsel %vm359_vm3, %v1415_v3, 0 }
0x1060   :  { %v1344_v28 = vpack.c.bf16 %v1342_v25, %v1341_v24 }
0x1061   :  { %v1345_v29 = vpack.c.bf16 %v1343_v27, %v1343_v27 }
0x1062   :  { %5026 = vmatprep.mubr.msk.bf16.mxu0 %vm423_vm5, %v1344_v28  ;;  %v1411_v32 = vpop.permute.xlu1 %1410 }
0x1063   :  { %5027 = vmatmul.mubr.msk.bf16.vlgmr.msra.gmra.mrb[28].mxu0 %vm423_vm5, %v1345_v29 }
0x1064   :  { %5034 = vmatprep.mubr.msk.bf16.mxu0 %vm359_vm3, %v1409_v19 }
0x1065   :  { %5031 = vmatpush3.bf16.xpose.msra.mxu0 %v1423_v34 }
0x1066   :  { %5361 = vmatprep.subr.msk.bf16.mxu0 %vm359_vm3, %v1415_v3 }
0x106d   :  { %5033 = vmatpush3.bf16.xpose.msra.mxu0 %v1426_v14 }
0x1074   :  { %5035 = vmatmul.mubr.msk.bf16.vlgmr.msra.gmra.mrb[32].mxu0 %vm359_vm3, %v1411_v32 }
0x1136   :  { %v6304_v40 = vpop.f32.mrb[28].mxu0 }
0x1137   :  { %v6306_v37 = vpop.f32.mrb[29].mxu0 }
0x1138   :  { %v5422_v44 = vpack.i.bf16 %v6306_v37, %v6136_v38  ;;  %v5029_v63 = vpop.f32.mrb[30].mxu0 }
0x1139   :  { %v6310_v45 = vpop.f32.mrb[31].mxu0 }
0x113a   :  { %v5437_v43 = vpack.i.bf16 %v6304_v40, %v6310_v45 }
0x1147   :  { %v5036_v52 = vpop.f32.mrb[32].mxu0 }
0x1148   :  { %v1462_v53 = vpop.f32.mrb[33].mxu0  ;;  %v1478_v62 = vsel %vm161_vm4, %v5036_v52, -1e+09 }
0x1149   :  { %v1476_v50 = vsel %vm161_vm4, %v1462_v53, -1e+09  ;;  %v5037_v55 = vpop.f32.mrb[34].mxu0  ;;  %v1485_v5 = vsel %vm423_vm5, %v1478_v62, -inf }
0x114a   :  { %v1465_v58 = vpop.f32.mrb[35].mxu0  ;;  %v1479_v61 = vsel %vm423_vm5, %v1476_v50, -inf }
0x114b   :  { %v1477_v0 = vsel %vm161_vm4, %v1465_v58, -1e+09  ;;  %1480 = vmax.xlane.f32.xlu0 %v1479_v61 }
0x114c   :  { %v1482_v2 = vsel %vm423_vm5, %v1477_v0, -inf }
0x114d   :  { %1483 = vmax.xlane.f32.xlu1 %v1482_v2 }
0x114f   :  { %1486 = vmax.xlane.f32.xlu0 %v1485_v5 }
0x11d8   :  { %v1481_v6 = vpop.xlane.xlu0 %1480 }
0x11d9   :  { %v1488_v7 = vsub.f32 %v1476_v50, %v1481_v6 }
0x11da   :  { %v1484_v8 = vpop.xlane.xlu1 %1483 }
0x11db   :  { %v1491_v11 = vmul.f32 1.442695, %v1488_v7  ;;  %v1489_v16 = vsub.f32 %v1477_v0, %v1484_v8 }
0x11dc   :  { %v1487_v18 = vpop.xlane.xlu0 %1486 }
0x11dd   :  { %5619 = vpow2.f32 %v1491_v11  ;;  %v1493_v21 = vmul.f32 1.442695, %v1489_v16  ;;  %v1490_v24 = vsub.f32 %v1478_v62, %v1487_v18 }
0x11df   :  { %5621 = vpow2.f32 %v1493_v21  ;;  %v1495_v25 = vmul.f32 1.442695, %v1490_v24 }
0x11e1   :  { %5623 = vpow2.f32 %v1495_v25 }
0x11e7   :  { %v5620_v27 = vpop.eup %5619 }
0x11e8   :  { %v1497_v28 = vsel %vm423_vm5, %v5620_v27, 0.0 }
0x11e9   :  { %v5622_v29 = vpop.eup %5621  ;;  %1498 = vadd.xlane.f32.xlu0 %v1497_v28 }
0x11ea   :  { %v1500_v3 = vsel %vm423_vm5, %v5622_v29, 0.0 }
0x11eb   :  { %v5624_v19 = vpop.eup %5623 }
0x11ec   :  { %v1503_v34 = vsel %vm423_vm5, %v5624_v19, 0.0 }
0x11ed   :  { %1504 = vadd.xlane.f32.xlu1 %v1503_v34  ;;  %1501 = vadd.xlane.f32.xlu0 %v1500_v3 }
0x11fe   :  { %1516 = vrot.lane.b32.xlu1 %v6206_v26, %s5837_s1 }
0x1202   :  { %1580 = vrot.lane.b32.xlu1 %v6056_v33, %s5838_s28 }
0x1203   :  { %1514 = vrot.lane.b32.xlu0 %v6056_v33, %s5837_s1 }
0x1206   :  { %1582 = vrot.lane.b32.xlu1 %v6206_v26, %s5838_s28 }
0x1207   :  { %1576 = vrot.lane.b32.xlu0 %v6056_v33, %s5839_s29 }
0x120a   :  { %1578 = vrot.lane.b32.xlu1 %v6206_v26, %s5839_s29 }
0x1276   :  { %v1499_v14 = vpop.xlane.xlu0 %1498 }
0x1277   :  { %5625 = vrcp.f32 %v1499_v14 }
0x127a   :  { %v1502_v32 = vpop.xlane.xlu0 %1501  ;;  %v1505_v63 = vpop.xlane.xlu1 %1504 }
0x127b   :  { %5627 = vrcp.f32 %v1502_v32 }
0x127c   :  { %5629 = vrcp.f32 %v1505_v63 }
0x127e   :  { %v1515_v52 = vpop.permute.xlu0 %1514  ;;  %v1517_v53 = vpop.permute.xlu1 %1516 }
0x127f   :  { %5038 = vmatprep.subr.bf16.mxu1 %v1515_v52  ;;  %v1526_v55 = vsel %vm470_vm6, %v1517_v53, 0 }
0x1280   :  { %5039 = vmatpush3.bf16.msra.mxu1 %v1515_v52 }
0x1281   :  { %5362 = vmatprep.subr.msk.bf16.mxu1 %vm470_vm6, %v1517_v53  ;;  %v5626_v50 = vpop.eup %5625 }
0x1282   :  { %v1581_v58 = vpop.permute.xlu1 %1580  ;;  %v1509_v0 = vmul.f32 %v5626_v50, %v5620_v27  ;;  %v1577_v8 = vpop.permute.xlu0 %1576 }
0x1283   :  { %v1591_v11 = vsel %vm359_vm3, %v1581_v58, 0 }
0x1284   :  { %5041 = vmatpush3.bf16.msra.mxu1 %v1526_v55 }
0x1285   :  { %v5628_v61 = vpop.eup %5627  ;;  %5363 = vmatprep.subr.msk.bf16.mxu1 %vm359_vm3, %v1581_v58 }
0x1286   :  { %v5630_v62 = vpop.eup %5629  ;;  %v1510_v2 = vmul.f32 %v5628_v61, %v5622_v29  ;;  %v1583_v16 = vpop.permute.xlu1 %1582 }
0x1287   :  { %v1511_v5 = vmul.f32 %v5630_v62, %v5624_v19  ;;  %v1594_v18 = vsel %vm359_vm3, %v1583_v16, 0 }
0x1288   :  { %v1512_v6 = vpack.c.bf16 %v1510_v2, %v1509_v0 }
0x1289   :  { %v1513_v7 = vpack.c.bf16 %v1511_v5, %v1511_v5 }
0x128a   :  { %5042 = vmatprep.mubr.msk.bf16.mxu1 %vm423_vm5, %v1512_v6  ;;  %v1579_v21 = vpop.permute.xlu1 %1578 }
0x128b   :  { %5043 = vmatmul.mubr.msk.bf16.vlgmr.msra.gmra.mrb[40].mxu1 %vm423_vm5, %v1513_v7 }
0x128c   :  { %5050 = vmatprep.mubr.msk.bf16.mxu1 %vm359_vm3, %v1577_v8 }
0x128d   :  { %5047 = vmatpush3.bf16.xpose.msra.mxu1 %v1591_v11 }
0x128e   :  { %5364 = vmatprep.subr.msk.bf16.mxu1 %vm359_vm3, %v1583_v16 }
0x1295   :  { %5049 = vmatpush3.bf16.xpose.msra.mxu1 %v1594_v18 }
0x1296   :  { %5078 = vmatprep.subr.bf16.mxu1 %v5828_v1 }
0x129c   :  { %5051 = vmatmul.mubr.msk.bf16.vlgmr.msra.gmra.mrb[44].mxu1 %vm359_vm3, %v1579_v21 }
0x129d   :  { %5082 = vmatprep.mubr.msk.bf16.mxu1 %vm5829_vm0, %v5828_v1 }
0x135e   :  { %v6351_v24 = vpop.f32.mrb[40].mxu1 }
0x135f   :  { %v1562_v25 = vpop.f32.mrb[41].mxu1 }
0x1360   :  { %v5427_v27 = vpack.i.bf16 %v1562_v25, %v6178_v46  ;;  %v5045_v28 = vpop.f32.mrb[42].mxu1 }
0x1361   :  { %v6354_v29 = vpop.f32.mrb[43].mxu1 }
0x1362   :  { %v5442_v19 = vpack.i.bf16 %v6351_v24, %v6354_v29 }
0x136f   :  { %v5052_v34 = vpop.f32.mrb[44].mxu1 }
0x1370   :  { %v1630_v3 = vpop.f32.mrb[45].mxu1  ;;  %v1646_v53 = vsel %vm161_vm4, %v5052_v34, -1e+09 }
0x1371   :  { %v1644_v14 = vsel %vm161_vm4, %v1630_v3, -1e+09  ;;  %v5053_v32 = vpop.f32.mrb[46].mxu1  ;;  %v1653_v55 = vsel %vm423_vm5, %v1646_v53, -inf }
0x1372   :  { %v1633_v63 = vpop.f32.mrb[47].mxu1  ;;  %v1647_v52 = vsel %vm423_vm5, %v1644_v14, -inf }
0x1373   :  { %v1645_v46 = vsel %vm161_vm4, %v1633_v63, -1e+09  ;;  %1648 = vmax.xlane.f32.xlu0 %v1647_v52 }
0x1374   :  { %v1650_v50 = vsel %vm423_vm5, %v1645_v46, -inf }
0x1375   :  { %1651 = vmax.xlane.f32.xlu1 %v1650_v50  ;;  %v5505_v50 = vld [vmem:[%s7335_s6] sm:$0xff]  }
0x1377   :  { %1654 = vmax.xlane.f32.xlu0 %v1653_v55 }
0x1400   :  { %v1649_v58 = vpop.xlane.xlu0 %1648 }
0x1401   :  { %v1656_v61 = vsub.f32 %v1644_v14, %v1649_v58 }
0x1402   :  { %v1652_v62 = vpop.xlane.xlu1 %1651 }
0x1403   :  { %v1659_v0 = vmul.f32 1.442695, %v1656_v61  ;;  %v1657_v2 = vsub.f32 %v1645_v46, %v1652_v62 }
0x1404   :  { %v1655_v5 = vpop.xlane.xlu0 %1654 }
0x1405   :  { %5631 = vpow2.f32 %v1659_v0  ;;  %v1661_v6 = vmul.f32 1.442695, %v1657_v2  ;;  %v1658_v7 = vsub.f32 %v1646_v53, %v1655_v5 }
0x1407   :  { %5633 = vpow2.f32 %v1661_v6  ;;  %v1663_v8 = vmul.f32 1.442695, %v1658_v7  ;;  %v1882_v7 = vsub.s32 4, %v6000_v4 }
0x1409   :  { %5635 = vpow2.f32 %v1663_v8 }
0x140f   :  { %v5632_v11 = vpop.eup %5631 }
0x1410   :  { %v1665_v16 = vsel %vm423_vm5, %v5632_v11, 0.0 }
0x1411   :  { %v5634_v18 = vpop.eup %5633  ;;  %1666 = vadd.xlane.f32.xlu0 %v1665_v16 }
0x1412   :  { %v1668_v28 = vsel %vm423_vm5, %v5634_v18, 0.0 }
0x1413   :  { %v5636_v21 = vpop.eup %5635 }
0x1414   :  { %v1671_v25 = vsel %vm423_vm5, %v5636_v21, 0.0 }
0x1415   :  { %1672 = vadd.xlane.f32.xlu1 %v1671_v25  ;;  %1669 = vadd.xlane.f32.xlu0 %v1668_v28 }
0x1426   :  { %1684 = vrot.lane.b32.xlu1 %v6206_v26, %s5840_s30 }
0x142a   :  { %5408 = vrot.lane.b32.xlu1 %v5407_v42, %s5841_s11 }
0x142b   :  { %1682 = vrot.lane.b32.xlu0 %v6056_v33, %s5840_s30 }
0x142e   :  { %5413 = vrot.lane.b32.xlu1 %v5412_v51, %s5842_s12 }
0x142f   :  { %5418 = vrot.lane.b32.xlu0 %v5417_v60, %s5843_s13 }
0x1432   :  { %5423 = vrot.lane.b32.xlu1 %v5422_v44, %s5841_s11 }
0x1433   :  { %5428 = vrot.lane.b32.xlu0 %v5427_v27, %s5842_s12 }
0x1437   :  { %5438 = vrot.lane.b32.xlu0 %v5437_v43, %s5841_s11 }
0x149e   :  { %v1667_v33 = vpop.xlane.xlu0 %1666 }
0x149f   :  { %5637 = vrcp.f32 %v1667_v33 }
0x14a2   :  { %v1670_v39 = vpop.xlane.xlu0 %1669  ;;  %v1673_v41 = vpop.xlane.xlu1 %1672 }
0x14a3   :  { %5639 = vrcp.f32 %v1670_v39 }
0x14a4   :  { %5641 = vrcp.f32 %v1673_v41 }
0x14a6   :  { %v1683_v42 = vpop.permute.xlu0 %1682  ;;  %v1685_v47 = vpop.permute.xlu1 %1684 }
0x14a7   :  { %5054 = vmatprep.subr.bf16.mxu0 %v1683_v42  ;;  %v1694_v51 = vsel %vm470_vm6, %v1685_v47, 0 }
0x14a8   :  { %5055 = vmatpush3.bf16.msra.mxu0 %v1683_v42 }
0x14a9   :  { %5365 = vmatprep.subr.msk.bf16.mxu0 %vm470_vm6, %v1685_v47  ;;  %v5638_v49 = vpop.eup %5637 }
0x14aa   :  { %v5409_v38 = vpop.permute.xlu1 %5408  ;;  %v5419_v26 = vpop.permute.xlu0 %5418  ;;  %v1677_v44 = vmul.f32 %v5638_v49, %v5632_v11  ;;  %v6427_v11 = vld [vmem:[%s7333_s4] sm:$0xff] }
0x14ab   :  { %v5411_v57 = vunpack.i.h.bf16 %v5409_v38  ;;  %v5410_v59 = vunpack.i.l.bf16 %v5409_v38  ;;  %v5421_v43 = vunpack.i.h.bf16 %v5419_v26  ;;  %v5420_v27 = vunpack.i.l.bf16 %v5419_v26 }
0x14ac   :  { %5057 = vmatpush3.bf16.msra.mxu0 %v1694_v51  ;;  %v6432_v16 = vrot.slane %v6427_v11, %v1882_v7 }
0x14ad   :  { %v5640_v60 = vpop.eup %5639  ;;  %5062 = vmatprep.subr.bf16.mxu0 %v5828_v1  ;;  %v1063_v14 = vsel %vm359_vm3, %v6100_v36, %v5411_v57  ;;  %v1062_v32 = vsel %vm359_vm3, %v6098_v31, %v5410_v59  ;;  %v5506_v31 = vld [vmem:[%s7335_s6 + $0x8] sm:$0xff]  }
0x14ae   :  { %v5642_v40 = vpop.eup %5641  ;;  %v5414_v37 = vpop.permute.xlu1 %5413  ;;  %v1678_v45 = vmul.f32 %v5640_v60, %v5634_v18 }
0x14af   :  { %v5416_v34 = vunpack.i.h.bf16 %v5414_v37  ;;  %v5415_v3 = vunpack.i.l.bf16 %v5414_v37  ;;  %v1679_v52 = vmul.f32 %v5642_v40, %v5636_v21  ;;  %v5429_v51 = vpop.permute.xlu0 %5428 }
0x14b0   :  { %v1680_v63 = vpack.c.bf16 %v1678_v45, %v1677_v44  ;;  %v5431_v57 = vunpack.i.h.bf16 %v5429_v51  ;;  %v5430_v59 = vunpack.i.l.bf16 %v5429_v51 }
0x14b1   :  { %v1066_v53 = vsel %vm1065_vm7, %v1062_v32, %v5415_v3  ;;  %v1067_v46 = vsel %vm1065_vm7, %v1063_v14, %v5416_v34  ;;  %v1681_v36 = vpack.c.bf16 %v1679_v52, %v1679_v52 }
0x14b2   :  { %v1069_v55 = vsel %vm423_vm5, %v1066_v53, %v5420_v27  ;;  %v1070_v58 = vsel %vm423_vm5, %v1067_v46, %v5421_v43  ;;  %5058 = vmatprep.mubr.msk.bf16.mxu0 %vm423_vm5, %v1680_v63  ;;  %v5424_v47 = vpop.permute.xlu1 %5423 }
0x14b3   :  { %v1789_v61 = vpack.c.bf16 %v1070_v58, %v1069_v55  ;;  %5059 = vmatmul.mubr.msk.bf16.vlgmr.msra.gmra.mrb[36].mxu0 %vm423_vm5, %v1681_v36  ;;  %v5426_v38 = vunpack.i.h.bf16 %v5424_v47  ;;  %v5425_v49 = vunpack.i.l.bf16 %v5424_v47  ;;  %v5507_v47 = vld [vmem:[%s7336_s7] sm:$0xff]  }
0x14b4   :  { %5063 = vmatpush3.bf16.msra.mxu0 %v5505_v50  ;;  %5066 = vmatprep.mubr.msk.bf16.mxu0 %vm5829_vm0, %v5828_v1 }
0x14b5   :  { %5064 = vmatprep.subr.bf16.mxu0 %v5828_v1  ;;  %v1064_v26 = vsel %vm359_vm3, %v6096_v30, %v5425_v49  ;;  %v5439_v30 = vpop.permute.xlu0 %5438  ;;  %5079 = vmatpush3.bf16.msra.mxu1 %v5507_v47 }
0x14b6   :  { %v1068_v44 = vsel %vm1065_vm7, %v1064_v26, %v5430_v59  ;;  %v5441_v27 = vunpack.i.h.bf16 %v5439_v30  ;;  %v5440_v34 = vunpack.i.l.bf16 %v5439_v30  ;;  %5080 = vmatprep.subr.bf16.mxu1 %v5828_v1 }
0x14b8   :  { %5065 = vmatpush3.bf16.msra.mxu0 %v5506_v31  ;;  %v1782_v52 = vsel %vm359_vm3, %v6264_v12, %v5441_v27  ;;  %v1781_v53 = vsel %vm359_vm3, %v6268_v17, %v5440_v34 }
0x14b9   :  { %5094 = vmatprep.subr.bf16.mxu0 %v5828_v1 }
0x14bb   :  { %5067 = vmatmul.mubr.msk.bf16.vlgmr.msra.gmra.mrb[40].mxu0 %vm162_vm2, %v1789_v61 }
0x14bc   :  { %5070 = vmatprep.mubr.msk.bf16.mxu0 %vm5829_vm0, %v5828_v1 }
0x1586   :  { %v5060_v62 = vpop.f32.mrb[36].mxu0 }
0x1587   :  { %v1730_v0 = vpop.f32.mrb[37].mxu0 }
0x1588   :  { %v5432_v2 = vpack.i.bf16 %v1730_v0, %v6222_v56  ;;  %v5061_v5 = vpop.f32.mrb[38].mxu0 }
0x1589   :  { %v1733_v6 = vpop.f32.mrb[39].mxu0 }
0x158a   :  { %v5447_v8 = vpack.i.bf16 %v5060_v62, %v1733_v6  ;;  %5433 = vrot.lane.b32.xlu1 %v5432_v2, %s5843_s13 }
0x158e   :  { %v1851_v18 = vpop.f32.mrb[40].mxu0 }
0x158f   :  { %v1874_v56 = vadd.f32 %v1851_v18, %v5936_v10  ;;  %v5068_v21 = vpop.f32.mrb[41].mxu0 }
0x1590   :  { %v1854_v25 = vpop.f32.mrb[42].mxu0 }
0x1591   :  { %v6436_v28 = vadd.f32 %v6432_v16, %v1874_v56  ;;  %v5069_v33 = vpop.f32.mrb[43].mxu0  ;;  %v1875_v41 = vadd.f32 %v1854_v25, %v5938_v13  ;;  %v1780_v13 = vsel %vm359_vm3, %v6266_v15, %v5426_v38  ;;  %v5508_v38 = vld [vmem:[%s7336_s7 + $0x8] sm:$0xff]  }
0x1592   :  { %v1783_v24 = vsel %vm1065_vm7, %v1780_v13, %v5431_v57  ;;  %5081 = vmatpush3.bf16.msra.mxu1 %v5508_v38 }
0x1593   :  { %v1890_v39 = vsel %vm162_vm2, %v6436_v28, 0.0  ;;  %v6442_v42 = vadd.f32 %v6432_v16, %v1875_v41  ;;  %5122 = vmatprep.subr.bf16.mxu1 %v5828_v1 }
0x1594   :  { %1891 = vadd.xlane.f32.xlu0 %v1890_v39 }
0x1595   :  { %v1893_v10 = vsel %vm162_vm2, %v6442_v42, 0.0 }
0x15aa   :  { %5448 = vrot.lane.b32.xlu0 %v5447_v8, %s5843_s13 }
0x15ae   :  { %1894 = vadd.xlane.f32.xlu1 %v1893_v10 }
0x15bf   :  { %5443 = vrot.lane.b32.xlu1 %v5442_v19, %s5842_s12 }
0x15fc   :  { %v5434_v60 = vpop.permute.xlu1 %5433 }
0x15fd   :  { %v5436_v40 = vunpack.i.h.bf16 %v5434_v60  ;;  %v5435_v37 = vunpack.i.l.bf16 %v5434_v60 }
0x15ff   :  { %v1071_v29 = vsel %vm423_vm5, %v1068_v44, %v5435_v37  ;;  %v1786_v19 = vsel %vm423_vm5, %v1783_v24, %v5436_v40 }
0x1600   :  { %v1790_v45 = vpack.c.bf16 %v1786_v19, %v1071_v29 }
0x1602   :  { %5071 = vmatmul.mubr.msk.bf16.gmra.mrb[44].mxu0 %vm162_vm2, %v1790_v45 }
0x1603   :  { %5074 = vmatprep.mubr.msk.bf16.mxu0 %vm5829_vm0, %v5828_v1 }
0x1621   :  { %v1892_v15 = vpop.xlane.xlu0 %1891 }
0x1622   :  { %v1908_v12 = vmul.f32 0.03125, %v1892_v15 }
0x1624   :  { %v1914_v5 = vsub.f32 %v6436_v28, %v1908_v12 }
0x1625   :  { %v5449_v3 = vpop.permute.xlu0 %5448 }
0x1626   :  { %v5451_v46 = vunpack.i.h.bf16 %v5449_v3  ;;  %v5450_v50 = vunpack.i.l.bf16 %v5449_v3  ;;  %v1920_v39 = vmul.f32 %v1914_v5, %v1914_v5 }
0x1628   :  { %v1926_v41 = vsel %vm162_vm2, %v1920_v39, 0.0 }
0x163b   :  { %v1895_v43 = vpop.xlane.xlu1 %1894 }
0x163c   :  { %v1909_v6 = vmul.f32 0.03125, %v1895_v43 }
0x163f   :  { %v5444_v14 = vpop.permute.xlu1 %5443 }
0x1640   :  { %v5446_v32 = vunpack.i.h.bf16 %v5444_v14  ;;  %v5445_v63 = vunpack.i.l.bf16 %v5444_v14 }
0x1642   :  { %v1785_v55 = vsel %vm1065_vm7, %v1782_v52, %v5446_v32  ;;  %v1784_v58 = vsel %vm1065_vm7, %v1781_v53, %v5445_v63 }
0x1643   :  { %v1787_v36 = vsel %vm423_vm5, %v1784_v58, %v5450_v50  ;;  %v1788_v61 = vsel %vm423_vm5, %v1785_v55, %v5451_v46  ;;  %v6529_v55 = vsub.s32 3, %v6000_v4 }
0x1644   :  { %v1791_v31 = vpack.c.bf16 %v1788_v61, %v1787_v36 }
0x1646   :  { %5075 = vmatmul.mubr.msk.bf16.gmra.mrb[48].mxu0 %vm162_vm2, %v1791_v31  ;;  %v6534_v31 = vrot.slane %v6427_v11, %v6529_v55 }
0x1647   :  { %5110 = vmatprep.mubr.msk.bf16.mxu0 %vm5829_vm0, %v5828_v1 }
0x16d5   :  { %v1859_v62 = vpop.f32.mrb[44].mxu0 }
0x16d6   :  { %v1876_v17 = vadd.f32 %v1859_v62, %v5950_v20  ;;  %v5072_v0 = vpop.f32.mrb[45].mxu0  ;;  %v1915_v20 = vsub.f32 %v6442_v42, %v1909_v6  ;;  %v5511_v6 = vld [vmem:[%s7337_s8 + $0x10] sm:$0xff]  }
0x16d7   :  { %v1862_v2 = vpop.f32.mrb[46].mxu0 }
0x16d8   :  { %v6476_v8 = vadd.f32 %v6432_v16, %v1876_v17  ;;  %v1877_v18 = vadd.f32 %v1862_v2, %v5952_v23  ;;  %v5073_v56 = vpop.f32.mrb[47].mxu0  ;;  %v1921_v10 = vmul.f32 %v1915_v20, %v1915_v20  ;;  %v5509_v2 = vld [vmem:[%s7337_s8] sm:$0xff]  }
0x16d9   :  { %5095 = vmatpush3.bf16.msra.mxu0 %v5509_v2  ;;  %v5513_v56 = vld [vmem:[%s7337_s8 + $0x20] sm:$0xff]  }
0x16da   :  { %v6480_v21 = vadd.f32 %v6432_v16, %v1877_v18  ;;  %v1896_v25 = vsel %vm162_vm2, %v6476_v8, 0.0  ;;  %v1929_v23 = vsel %vm162_vm2, %v1921_v10, 0.0  ;;  %5096 = vmatprep.subr.bf16.mxu0 %v5828_v1  ;;  %v5512_v18 = vld [vmem:[%s7337_s8 + $0x18] sm:$0xff]  }
0x16db   :  { %1897 = vadd.xlane.f32.xlu1 %v1896_v25  ;;  %v5514_v25 = vld [vmem:[%s7337_s8 + $0x28] sm:$0xff]  }
0x16dc   :  { %v1899_v33 = vsel %vm162_vm2, %v6480_v21, 0.0 }
0x16dd   :  { %1900 = vadd.xlane.f32.xlu0 %v1899_v33  ;;  %v5516_v33 = vld [vmem:[%s7337_s8 + $0x38] sm:$0xff]  }
0x16e1   :  { %1927 = vadd.xlane.f32.xlu0 %v1926_v41 }
0x16e5   :  { %1930 = vadd.xlane.f32.xlu0 %v1929_v23 }
0x1719   :  { %v1867_v49 = vpop.f32.mrb[48].mxu0 }
0x171a   :  { %v5076_v51 = vpop.f32.mrb[49].mxu0  ;;  %v1878_v40 = vadd.f32 %v1867_v49, %v5974_v48 }
0x171b   :  { %v1870_v13 = vpop.f32.mrb[50].mxu0 }
0x171c   :  { %v5077_v26 = vpop.f32.mrb[51].mxu0  ;;  %v1879_v24 = vadd.f32 %v1870_v13, %v5987_v54  ;;  %v6508_v30 = vadd.f32 %v6432_v16, %v1878_v40 }
0x171e   :  { %v6514_v27 = vadd.f32 %v6432_v16, %v1879_v24  ;;  %v1902_v32 = vsel %vm162_vm2, %v6508_v30, 0.0  ;;  %v6522_v16 = vsub.s32 2, %v6000_v4 }
0x1720   :  { %v1905_v52 = vsel %vm162_vm2, %v6514_v27, 0.0  ;;  %v6526_v46 = vrot.slane %v6427_v11, %v6522_v16 }
0x1768   :  { %v1898_v57 = vpop.xlane.xlu1 %1897 }
0x1769   :  { %v1910_v59 = vmul.f32 0.03125, %v1898_v57 }
0x176a   :  { %v1901_v60 = vpop.xlane.xlu0 %1900 }
0x176b   :  { %v6499_v37 = vsub.f32 %v6476_v8, %v1910_v59  ;;  %v1911_v44 = vmul.f32 0.03125, %v1901_v60 }
0x176d   :  { %v6503_v29 = vsub.f32 %v6480_v21, %v1911_v44  ;;  %v1922_v19 = vmul.f32 %v6499_v37, %v6499_v37 }
0x176e   :  { %v1928_v45 = vpop.xlane.xlu0 %1927 }
0x176f   :  { %v1944_v15 = vmul.f32 0.03125, %v1928_v45  ;;  %v1932_v43 = vsel %vm162_vm2, %v1922_v19, 0.0  ;;  %v1923_v48 = vmul.f32 %v6503_v29, %v6503_v29 }
0x1770   :  { %1933 = vadd.xlane.f32.xlu1 %v1932_v43 }
0x1771   :  { %v1950_v54 = vadd.f32 1e-06, %v1944_v15  ;;  %v1935_v34 = vsel %vm162_vm2, %v1923_v48, 0.0 }
0x1772   :  { %1936 = vadd.xlane.f32.xlu0 %v1935_v34  ;;  %v1931_v3 = vpop.xlane.xlu0 %1930 }
0x1773   :  { %5643 = vrsqrt.f32 %v1950_v54  ;;  %v1945_v14 = vmul.f32 0.03125, %v1931_v3 }
0x1774   :  { %1903 = vadd.xlane.f32.xlu1 %v1902_v32 }
0x1775   :  { %v1951_v63 = vadd.f32 1e-06, %v1945_v14 }
0x1776   :  { %1906 = vadd.xlane.f32.xlu0 %v1905_v52 }
0x1777   :  { %5645 = vrsqrt.f32 %v1951_v63 }
0x177d   :  { %v5644_v53 = vpop.eup %5643 }
0x177e   :  { %v1962_v50 = vmul.f32 %v5644_v53, %v1914_v5  ;;  %v5510_v5 = vld [vmem:[%s7337_s8 + $0x8] sm:$0xff]  }
0x177f   :  { %5097 = vmatpush3.bf16.msra.mxu0 %v5510_v5 }
0x1780   :  { %v1972_v36 = vmul.f32 %v6526_v46, %v1962_v50  ;;  %5098 = vmatprep.subr.bf16.mxu0 %v5828_v1 }
0x1781   :  { %v5646_v58 = vpop.eup %5645 }
0x1782   :  { %v1963_v61 = vmul.f32 %v5646_v58, %v1915_v20  ;;  %v1982_v62 = vadd.f32 %v6534_v31, %v1972_v36  ;;  %v5515_v20 = vld [vmem:[%s7337_s8 + $0x30] sm:$0xff]  }
0x1783   :  { %5099 = vmatpush3.bf16.msra.mxu0 %v5511_v6 }
0x1784   :  { %v1973_v12 = vmul.f32 %v6526_v46, %v1963_v61  ;;  %5100 = vmatprep.subr.bf16.mxu0 %v5828_v1 }
0x1786   :  { %v1983_v17 = vadd.f32 %v6534_v31, %v1973_v12 }
0x1787   :  { %5101 = vmatpush3.bf16.msra.mxu0 %v5512_v18 }
0x1788   :  { %v1988_v0 = vpack.c.bf16 %v1983_v17, %v1982_v62  ;;  %5102 = vmatprep.subr.bf16.mxu0 %v5828_v1 }
0x178a   :  { %5083 = vmatmul.mubr.msk.bf16.vlgmr.msra.gmra.mrb[48].mxu1 %vm162_vm2, %v1988_v0 }
0x178b   :  { %5086 = vmatprep.mubr.msk.bf16.mxu1 %vm5829_vm0, %v5828_v1  ;;  %5103 = vmatpush3.bf16.msra.mxu0 %v5513_v56 }
0x178c   :  { %5104 = vmatprep.subr.bf16.mxu0 %v5828_v1 }
0x178f   :  { %5105 = vmatpush3.bf16.msra.mxu0 %v5514_v25 }
0x1790   :  { %5106 = vmatprep.subr.bf16.mxu0 %v5828_v1 }
0x1793   :  { %5107 = vmatpush3.bf16.msra.mxu0 %v5515_v20 }
0x1794   :  { %5108 = vmatprep.subr.bf16.mxu0 %v5828_v1 }
0x1797   :  { %5109 = vmatpush3.bf16.msra.mxu0 %v5516_v33 }
0x17fd   :  { %v1934_v39 = vpop.xlane.xlu1 %1933 }
0x17fe   :  { %v1946_v41 = vmul.f32 0.03125, %v1934_v39 }
0x17ff   :  { %v1937_v10 = vpop.xlane.xlu0 %1936 }
0x1800   :  { %v1952_v23 = vadd.f32 1e-06, %v1946_v41  ;;  %v1947_v47 = vmul.f32 0.03125, %v1937_v10 }
0x1801   :  { %v1904_v38 = vpop.xlane.xlu1 %1903 }
0x1802   :  { %5647 = vrsqrt.f32 %v1952_v23  ;;  %v1953_v49 = vadd.f32 1e-06, %v1947_v47  ;;  %v1912_v51 = vmul.f32 0.03125, %v1904_v38 }
0x1803   :  { %v1907_v13 = vpop.xlane.xlu0 %1906 }
0x1804   :  { %5649 = vrsqrt.f32 %v1953_v49  ;;  %v1918_v26 = vsub.f32 %v6508_v30, %v1912_v51  ;;  %v1913_v57 = vmul.f32 0.03125, %v1907_v13 }
0x1806   :  { %v1919_v59 = vsub.f32 %v6514_v27, %v1913_v57  ;;  %v1924_v60 = vmul.f32 %v1918_v26, %v1918_v26 }
0x1808   :  { %v1938_v40 = vsel %vm162_vm2, %v1924_v60, 0.0  ;;  %v1925_v44 = vmul.f32 %v1919_v59, %v1919_v59 }
0x1809   :  { %1939 = vadd.xlane.f32.xlu1 %v1938_v40 }
0x180a   :  { %v1941_v24 = vsel %vm162_vm2, %v1925_v44, 0.0 }
0x180b   :  { %1942 = vadd.xlane.f32.xlu0 %v1941_v24 }
0x180c   :  { %v5648_v19 = vpop.eup %5647 }
0x180d   :  { %v1964_v45 = vmul.f32 %v5648_v19, %v6499_v37  ;;  %v6589_v37 = vld [vmem:[%s7333_s4 + $0x10] sm:$0xf] }
0x180e   :  { %v5650_v15 = vpop.eup %5649 }
0x180f   :  { %v1965_v43 = vmul.f32 %v5650_v15, %v6503_v29  ;;  %v1974_v48 = vmul.f32 %v6526_v46, %v1964_v45  ;;  %v6593_v29 = vrot.slane %v6589_v37, %v6522_v16 }
0x1811   :  { %v1975_v54 = vmul.f32 %v6526_v46, %v1965_v43  ;;  %v1984_v34 = vadd.f32 %v6534_v31, %v1974_v48 }
0x1813   :  { %v1985_v3 = vadd.f32 %v6534_v31, %v1975_v54 }
0x1815   :  { %v1989_v14 = vpack.c.bf16 %v1985_v3, %v1984_v34 }
0x1817   :  { %5087 = vmatmul.mubr.msk.bf16.gmra.mrb[52].mxu1 %vm162_vm2, %v1989_v14 }
0x1818   :  { %5090 = vmatprep.mubr.msk.bf16.mxu1 %vm5829_vm0, %v5828_v1 }
0x185d   :  { %v2054_v32 = vpop.f32.mrb[48].mxu1 }
0x185e   :  { %v2055_v63 = vadd.f32 %v2054_v32, %v6593_v29  ;;  %v5084_v52 = vpop.f32.mrb[49].mxu1 }
0x185f   :  { %v2057_v53 = vpop.f32.mrb[50].mxu1 }
0x1860   :  { %v2083_v50 = vmul.f32 %v2055_v63, %v2055_v63  ;;  %v2058_v58 = vadd.f32 %v2057_v53, %v6593_v29  ;;  %v5085_v36 = vpop.f32.mrb[51].mxu1  ;;  %v2077_v33 = vmul.f32 0.5, %v2055_v63 }
0x1862   :  { %v2089_v61 = vmul.f32 %v2083_v50, %v2055_v63  ;;  %v2084_v12 = vmul.f32 %v2058_v58, %v2058_v58  ;;  %v2078_v39 = vmul.f32 0.5, %v2058_v58 }
0x1864   :  { %v2095_v62 = vmul.f32 0.044715, %v2089_v61  ;;  %v2090_v17 = vmul.f32 %v2084_v12, %v2058_v58 }
0x1866   :  { %v2101_v0 = vadd.f32 %v2095_v62, %v2055_v63  ;;  %v2096_v2 = vmul.f32 0.044715, %v2090_v17 }
0x1868   :  { %v2107_v5 = vmul.f32 0.7978846, %v2101_v0  ;;  %v2102_v6 = vadd.f32 %v2096_v2, %v2058_v58 }
0x186a   :  { %5651 = vtanh.f32 %v2107_v5  ;;  %v2108_v18 = vmul.f32 0.7978846, %v2102_v6 }
0x186c   :  { %5653 = vtanh.f32 %v2108_v18 }
0x1874   :  { %v5652_v56 = vpop.eup %5651 }
0x1875   :  { %v2119_v25 = vadd.f32 1.0, %v5652_v56 }
0x1876   :  { %v5654_v20 = vpop.eup %5653 }
0x1877   :  { %v2120_v41 = vadd.f32 1.0, %v5654_v20  ;;  %v2125_v10 = vmul.f32 %v2119_v25, %v2077_v33  ;;  %v2263_v20 = vsub.s32 5, %v6000_v4 }
0x1879   :  { %v2126_v23 = vmul.f32 %v2120_v41, %v2078_v39  ;;  %v6614_v33 = vrot.slane %v6427_v11, %v2263_v20 }
0x187b   :  { %v2131_v47 = vpack.c.bf16 %v2126_v23, %v2125_v10 }
0x187d   :  { %5111 = vmatmul.mubr.bf16.vlgmr.msra.gmra.mrb[52].mxu0 %v2131_v47 }
0x187e   :  { %5114 = vmatprep.mubr.msk.bf16.mxu0 %vm5829_vm0, %v5828_v1 }
0x1896   :  { %v1940_v38 = vpop.xlane.xlu1 %1939 }
0x1897   :  { %v1948_v49 = vmul.f32 0.03125, %v1940_v38 }
0x1898   :  { %v1943_v51 = vpop.xlane.xlu0 %1942 }
0x1899   :  { %v1954_v13 = vadd.f32 1e-06, %v1948_v49  ;;  %v1949_v57 = vmul.f32 0.03125, %v1943_v51 }
0x189b   :  { %5655 = vrsqrt.f32 %v1954_v13  ;;  %v1955_v60 = vadd.f32 1e-06, %v1949_v57 }
0x189d   :  { %5657 = vrsqrt.f32 %v1955_v60 }
0x18a5   :  { %v5656_v40 = vpop.eup %5655 }
0x18a6   :  { %v1966_v44 = vmul.f32 %v5656_v40, %v1918_v26 }
0x18a7   :  { %v5658_v24 = vpop.eup %5657 }
0x18a8   :  { %v1967_v19 = vmul.f32 %v5658_v24, %v1919_v59  ;;  %v1976_v45 = vmul.f32 %v6526_v46, %v1966_v44 }
0x18aa   :  { %v1977_v15 = vmul.f32 %v6526_v46, %v1967_v19  ;;  %v1986_v43 = vadd.f32 %v6534_v31, %v1976_v45 }
0x18ac   :  { %v1987_v48 = vadd.f32 %v6534_v31, %v1977_v15 }
0x18ae   :  { %v1990_v54 = vpack.c.bf16 %v1987_v48, %v1986_v43 }
0x18b0   :  { %5091 = vmatmul.mubr.msk.bf16.gmra.mrb[56].mxu1 %vm162_vm2, %v1990_v54 }
0x18b1   :  { %5126 = vmatprep.mubr.msk.bf16.mxu1 %vm5829_vm0, %v5828_v1 }
0x18ea   :  { %v2062_v34 = vpop.f32.mrb[52].mxu1 }
0x18eb   :  { %v2063_v3 = vadd.f32 %v2062_v34, %v6593_v29  ;;  %v5088_v26 = vpop.f32.mrb[53].mxu1 }
0x18ec   :  { %v2065_v14 = vpop.f32.mrb[54].mxu1 }
0x18ed   :  { %v2085_v59 = vmul.f32 %v2063_v3, %v2063_v3  ;;  %v2066_v32 = vadd.f32 %v2065_v14, %v6593_v29  ;;  %v5089_v63 = vpop.f32.mrb[55].mxu1  ;;  %v2079_v2 = vmul.f32 0.5, %v2063_v3 }
0x18ef   :  { %v2091_v46 = vmul.f32 %v2085_v59, %v2063_v3  ;;  %v2086_v52 = vmul.f32 %v2066_v32, %v2066_v32  ;;  %v2080_v5 = vmul.f32 0.5, %v2066_v32 }
0x18f1   :  { %v2097_v53 = vmul.f32 0.044715, %v2091_v46  ;;  %v2092_v50 = vmul.f32 %v2086_v52, %v2066_v32 }
0x18f3   :  { %v2103_v31 = vadd.f32 %v2097_v53, %v2063_v3  ;;  %v2098_v58 = vmul.f32 0.044715, %v2092_v50 }
0x18f5   :  { %v2109_v36 = vmul.f32 0.7978846, %v2103_v31  ;;  %v2104_v61 = vadd.f32 %v2098_v58, %v2066_v32 }
0x18f7   :  { %5659 = vtanh.f32 %v2109_v36  ;;  %v2110_v12 = vmul.f32 0.7978846, %v2104_v61 }
0x18f9   :  { %5661 = vtanh.f32 %v2110_v12 }
0x1901   :  { %v5660_v62 = vpop.eup %5659 }
0x1902   :  { %v2121_v17 = vadd.f32 1.0, %v5660_v62 }
0x1903   :  { %v5662_v0 = vpop.eup %5661 }
0x1904   :  { %v2122_v6 = vadd.f32 1.0, %v5662_v0  ;;  %v2127_v18 = vmul.f32 %v2121_v17, %v2079_v2 }
0x1906   :  { %v2128_v56 = vmul.f32 %v2122_v6, %v2080_v5 }
0x1908   :  { %v2132_v25 = vpack.c.bf16 %v2128_v56, %v2127_v18 }
0x190a   :  { %5115 = vmatmul.mubr.bf16.gmra.mrb[56].mxu0 %v2132_v25 }
0x190b   :  { %5118 = vmatprep.mubr.msk.bf16.mxu0 %vm5829_vm0, %v5828_v1 }
0x1950   :  { %v2232_v39 = vpop.f32.mrb[52].mxu0 }
0x1951   :  { %v2255_v41 = vadd.f32 %v2232_v39, %v6436_v28  ;;  %v5112_v10 = vpop.f32.mrb[53].mxu0 }
0x1952   :  { %v2235_v23 = vpop.f32.mrb[54].mxu0 }
0x1953   :  { %v6618_v47 = vadd.f32 %v6614_v33, %v2255_v41  ;;  %v2256_v38 = vadd.f32 %v2235_v23, %v6442_v42  ;;  %v5113_v49 = vpop.f32.mrb[55].mxu0 }
0x1954   :  { %v5517_v49 = vld [vmem:[%s7334_s5 + $0x10] sm:$0xff]  }
0x1955   :  { %v6622_v51 = vadd.f32 %v6614_v33, %v2256_v38  ;;  %v2271_v13 = vsel %vm162_vm2, %v6618_v47, 0.0  ;;  %5123 = vmatpush3.bf16.msra.mxu1 %v5517_v49 }
0x1956   :  { %2272 = vadd.xlane.f32.xlu1 %v2271_v13  ;;  %5124 = vmatprep.subr.bf16.mxu1 %v5828_v1  ;;  %v5518_v13 = vld [vmem:[%s7334_s5 + $0x18] sm:$0xff]  }
0x1957   :  { %v2274_v57 = vsel %vm162_vm2, %v6622_v51, 0.0 }
0x1958   :  { %2275 = vadd.xlane.f32.xlu0 %v2274_v57 }
0x1959   :  { %5125 = vmatpush3.bf16.msra.mxu1 %v5518_v13 }
0x1983   :  { %v2070_v28 = vpop.f32.mrb[56].mxu1 }
0x1984   :  { %v2071_v60 = vadd.f32 %v2070_v28, %v6593_v29  ;;  %v5092_v40 = vpop.f32.mrb[57].mxu1 }
0x1985   :  { %v2073_v44 = vpop.f32.mrb[58].mxu1 }
0x1986   :  { %v2087_v24 = vmul.f32 %v2071_v60, %v2071_v60  ;;  %v2074_v42 = vadd.f32 %v2073_v44, %v6593_v29  ;;  %v5093_v19 = vpop.f32.mrb[59].mxu1  ;;  %v2081_v46 = vmul.f32 0.5, %v2071_v60 }
0x1988   :  { %v2093_v45 = vmul.f32 %v2087_v24, %v2071_v60  ;;  %v2088_v15 = vmul.f32 %v2074_v42, %v2074_v42  ;;  %v2082_v52 = vmul.f32 0.5, %v2074_v42 }
0x198a   :  { %v2099_v43 = vmul.f32 0.044715, %v2093_v45  ;;  %v2094_v48 = vmul.f32 %v2088_v15, %v2074_v42 }
0x198c   :  { %v2105_v54 = vadd.f32 %v2099_v43, %v2071_v60  ;;  %v2100_v34 = vmul.f32 0.044715, %v2094_v48 }
0x198e   :  { %v2111_v3 = vmul.f32 0.7978846, %v2105_v54  ;;  %v2106_v26 = vadd.f32 %v2100_v34, %v2074_v42 }
0x1990   :  { %5663 = vtanh.f32 %v2111_v3  ;;  %v2112_v14 = vmul.f32 0.7978846, %v2106_v26 }
0x1992   :  { %5665 = vtanh.f32 %v2112_v14 }
0x199a   :  { %v5664_v59 = vpop.eup %5663 }
0x199b   :  { %v2123_v32 = vadd.f32 1.0, %v5664_v59 }
0x199c   :  { %v5666_v63 = vpop.eup %5665 }
0x199d   :  { %v2124_v53 = vadd.f32 1.0, %v5666_v63  ;;  %v2129_v50 = vmul.f32 %v2123_v32, %v2081_v46 }
0x199f   :  { %v2130_v29 = vmul.f32 %v2124_v53, %v2082_v52 }
0x19a1   :  { %v2133_v31 = vpack.c.bf16 %v2130_v29, %v2129_v50 }
0x19a3   :  { %5119 = vmatmul.mubr.bf16.gmra.mrb[60].mxu0 %v2133_v31 }
0x19dd   :  { %v2240_v58 = vpop.f32.mrb[56].mxu0 }
0x19de   :  { %v2257_v36 = vadd.f32 %v2240_v58, %v6476_v8  ;;  %v5116_v61 = vpop.f32.mrb[57].mxu0 }
0x19df   :  { %v2243_v12 = vpop.f32.mrb[58].mxu0 }
0x19e0   :  { %v6632_v62 = vadd.f32 %v6614_v33, %v2257_v36  ;;  %v2258_v17 = vadd.f32 %v2243_v12, %v6480_v21  ;;  %v5117_v0 = vpop.f32.mrb[59].mxu0 }
0x19e2   :  { %v6636_v2 = vadd.f32 %v6614_v33, %v2258_v17  ;;  %v2277_v5 = vsel %vm162_vm2, %v6632_v62, 0.0 }
0x19e3   :  { %v2273_v6 = vpop.xlane.xlu1 %2272  ;;  %2278 = vadd.xlane.f32.xlu1 %v2277_v5 }
0x19e4   :  { %v2289_v18 = vmul.f32 0.03125, %v2273_v6  ;;  %v2280_v8 = vsel %vm162_vm2, %v6636_v2, 0.0 }
0x19e5   :  { %v2276_v56 = vpop.xlane.xlu0 %2275  ;;  %2281 = vadd.xlane.f32.xlu0 %v2280_v8 }
0x19e6   :  { %v2295_v25 = vsub.f32 %v6618_v47, %v2289_v18  ;;  %v2290_v39 = vmul.f32 0.03125, %v2276_v56 }
0x19e8   :  { %v2296_v21 = vsub.f32 %v6622_v51, %v2290_v39  ;;  %v2301_v41 = vmul.f32 %v2295_v25, %v2295_v25 }
0x19ea   :  { %v2307_v10 = vsel %vm162_vm2, %v2301_v41, 0.0  ;;  %v2302_v23 = vmul.f32 %v2296_v21, %v2296_v21 }
0x19eb   :  { %2308 = vadd.xlane.f32.xlu1 %v2307_v10 }
0x19ec   :  { %v2310_v38 = vsel %vm162_vm2, %v2302_v23, 0.0 }
0x19ed   :  { %2311 = vadd.xlane.f32.xlu0 %v2310_v38 }
0x1a70   :  { %v2279_v57 = vpop.xlane.xlu1 %2278 }
0x1a71   :  { %v2291_v28 = vmul.f32 0.03125, %v2279_v57 }
0x1a72   :  { %v2282_v60 = vpop.xlane.xlu0 %2281 }
0x1a73   :  { %v6654_v40 = vsub.f32 %v6632_v62, %v2291_v28  ;;  %v2292_v44 = vmul.f32 0.03125, %v2282_v60 }
0x1a75   :  { %v6657_v24 = vsub.f32 %v6636_v2, %v2292_v44  ;;  %v2303_v42 = vmul.f32 %v6654_v40, %v6654_v40 }
0x1a76   :  { %v2248_v19 = vpop.f32.mrb[60].mxu0 }
0x1a77   :  { %v2259_v45 = vadd.f32 %v2248_v19, %v6508_v30  ;;  %v5120_v15 = vpop.f32.mrb[61].mxu0  ;;  %v2313_v43 = vsel %vm162_vm2, %v2303_v42, 0.0  ;;  %v2304_v48 = vmul.f32 %v6657_v24, %v6657_v24 }
0x1a78   :  { %2314 = vadd.xlane.f32.xlu1 %v2313_v43  ;;  %v2309_v54 = vpop.xlane.xlu1 %2308  ;;  %v2251_v34 = vpop.f32.mrb[62].mxu0 }
0x1a79   :  { %v6666_v3 = vadd.f32 %v6614_v33, %v2259_v45  ;;  %v2325_v26 = vmul.f32 0.03125, %v2309_v54  ;;  %v2260_v14 = vadd.f32 %v2251_v34, %v6514_v27  ;;  %v5121_v59 = vpop.f32.mrb[63].mxu0  ;;  %v2316_v32 = vsel %vm162_vm2, %v2304_v48, 0.0 }
0x1a7a   :  { %2317 = vadd.xlane.f32.xlu0 %v2316_v32  ;;  %v2312_v30 = vpop.xlane.xlu0 %2311  ;;  %v2351_v27 = vsub.s32 6, %v6000_v4 }
0x1a7b   :  { %v2331_v63 = vadd.f32 1e-06, %v2325_v26  ;;  %v6671_v46 = vadd.f32 %v6614_v33, %v2260_v14  ;;  %v2326_v52 = vmul.f32 0.03125, %v2312_v30  ;;  %v2283_v53 = vsel %vm162_vm2, %v6666_v3, 0.0 }
0x1a7c   :  { %2284 = vadd.xlane.f32.xlu1 %v2283_v53  ;;  %v6681_v31 = vrot.slane %v6427_v11, %v2351_v27  ;;  %v2361_v33 = vsub.s32 7, %v6000_v4 }
0x1a7d   :  { %5667 = vrsqrt.f32 %v2331_v63  ;;  %v2332_v50 = vadd.f32 1e-06, %v2326_v52  ;;  %v2286_v29 = vsel %vm162_vm2, %v6671_v46, 0.0 }
0x1a7e   :  { %2287 = vadd.xlane.f32.xlu0 %v2286_v29  ;;  %v6687_v12 = vrot.slane %v6427_v11, %v2361_v33 }
0x1a7f   :  { %5669 = vrsqrt.f32 %v2332_v50 }
0x1a87   :  { %v5668_v58 = vpop.eup %5667 }
0x1a88   :  { %v2343_v36 = vmul.f32 %v5668_v58, %v2295_v25 }
0x1a89   :  { %v5670_v61 = vpop.eup %5669 }
0x1a8a   :  { %v2353_v17 = vmul.f32 %v6681_v31, %v2343_v36  ;;  %v2344_v0 = vmul.f32 %v5670_v61, %v2296_v21 }
0x1a8c   :  { %v2354_v5 = vmul.f32 %v6681_v31, %v2344_v0  ;;  %v2363_v6 = vadd.f32 %v6687_v12, %v2353_v17 }
0x1a8e   :  { %v2364_v18 = vadd.f32 %v6687_v12, %v2354_v5 }
0x1a90   :  { %v2369_v8 = vpack.c.bf16 %v2364_v18, %v2363_v6 }
0x1a92   :  { %5127 = vmatmul.mubr.msk.bf16.vlgmr.msra.gmra.mrb[60].mxu1 %vm162_vm2, %v2369_v8 }
0x1a93   :  { %5130 = vmatprep.mubr.msk.bf16.mxu1 %vm5829_vm0, %v5828_v1 }
0x1b05   :  { %v2315_v56 = vpop.xlane.xlu1 %2314 }
0x1b06   :  { %v2327_v25 = vmul.f32 0.03125, %v2315_v56 }
0x1b07   :  { %v2318_v39 = vpop.xlane.xlu0 %2317 }
0x1b08   :  { %v2333_v11 = vadd.f32 1e-06, %v2327_v25  ;;  %v2328_v41 = vmul.f32 0.03125, %v2318_v39 }
0x1b09   :  { %v2285_v10 = vpop.xlane.xlu1 %2284 }
0x1b0a   :  { %5671 = vrsqrt.f32 %v2333_v11  ;;  %v2334_v21 = vadd.f32 1e-06, %v2328_v41  ;;  %v2293_v23 = vmul.f32 0.03125, %v2285_v10 }
0x1b0b   :  { %v2288_v38 = vpop.xlane.xlu0 %2287 }
0x1b0c   :  { %5673 = vrsqrt.f32 %v2334_v21  ;;  %v2299_v49 = vsub.f32 %v6666_v3, %v2293_v23  ;;  %v2294_v13 = vmul.f32 0.03125, %v2288_v38 }
0x1b0e   :  { %v2300_v57 = vsub.f32 %v6671_v46, %v2294_v13  ;;  %v2305_v28 = vmul.f32 %v2299_v49, %v2299_v49 }
0x1b10   :  { %v2319_v60 = vsel %vm162_vm2, %v2305_v28, 0.0  ;;  %v2306_v44 = vmul.f32 %v2300_v57, %v2300_v57 }
0x1b11   :  { %2320 = vadd.xlane.f32.xlu1 %v2319_v60 }
0x1b12   :  { %v2322_v42 = vsel %vm162_vm2, %v2306_v44, 0.0 }
0x1b13   :  { %2323 = vadd.xlane.f32.xlu0 %v2322_v42 }
0x1b14   :  { %v5672_v19 = vpop.eup %5671 }
0x1b15   :  { %v2345_v45 = vmul.f32 %v5672_v19, %v6654_v40  ;;  %v6711_v40 = vrot.slane %v6589_v37, %v6011_v22 }
0x1b16   :  { %v5674_v15 = vpop.eup %5673 }
0x1b17   :  { %v2346_v43 = vmul.f32 %v5674_v15, %v6657_v24  ;;  %v2355_v48 = vmul.f32 %v6681_v31, %v2345_v45 }
0x1b19   :  { %v2356_v54 = vmul.f32 %v6681_v31, %v2346_v43  ;;  %v2365_v34 = vadd.f32 %v6687_v12, %v2355_v48 }
0x1b1b   :  { %v2366_v26 = vadd.f32 %v6687_v12, %v2356_v54 }
0x1b1d   :  { %v2370_v14 = vpack.c.bf16 %v2366_v26, %v2365_v34 }
0x1b1f   :  { %5131 = vmatmul.mubr.msk.bf16.gmra.mrb[64].mxu1 %vm162_vm2, %v2370_v14 }
0x1b20   :  { %5134 = vmatprep.mubr.msk.bf16.mxu1 %vm5829_vm0, %v5828_v1 }
0x1b65   :  { %v2436_v59 = vpop.f32.mrb[60].mxu1 }
0x1b66   :  { %v5128_v24 = vpop.f32.mrb[61].mxu1  ;;  %v2437_v30 = vadd.f32 %v2436_v59, %v6711_v40 }
0x1b67   :  { %v2439_v32 = vpop.f32.mrb[62].mxu1 }
0x1b68   :  { %v2440_v63 = vadd.f32 %v2439_v32, %v6711_v40  ;;  %v5129_v52 = vpop.f32.mrb[63].mxu1 }
0x1b6a   :  { %v6715_v53 = vpack.c.bf16 %v2440_v63, %v2437_v30 }
0x1b6c   :  { %2463 = vrot.lane.b32.xlu1 %v6715_v53, %s5830_s22 }
0x1b70   :  { %2631 = vrot.lane.b32.xlu1 %v6715_v53, %s5833_s24 }
0x1b9e   :  { %v2321_v50 = vpop.xlane.xlu1 %2320 }
0x1b9f   :  { %v2329_v29 = vmul.f32 0.03125, %v2321_v50 }
0x1ba0   :  { %v2324_v37 = vpop.xlane.xlu0 %2323 }
0x1ba1   :  { %v2335_v58 = vadd.f32 1e-06, %v2329_v29  ;;  %v2330_v36 = vmul.f32 0.03125, %v2324_v37 }
0x1ba3   :  { %5675 = vrsqrt.f32 %v2335_v58  ;;  %v2336_v61 = vadd.f32 1e-06, %v2330_v36 }
0x1ba5   :  { %5677 = vrsqrt.f32 %v2336_v61 }
0x1bad   :  { %v5676_v17 = vpop.eup %5675 }
0x1bae   :  { %v2347_v0 = vmul.f32 %v5676_v17, %v2299_v49 }
0x1baf   :  { %v5678_v5 = vpop.eup %5677 }
0x1bb0   :  { %v2348_v6 = vmul.f32 %v5678_v5, %v2300_v57  ;;  %v2357_v18 = vmul.f32 %v6681_v31, %v2347_v0 }
0x1bb2   :  { %v2358_v8 = vmul.f32 %v6681_v31, %v2348_v6  ;;  %v2367_v56 = vadd.f32 %v6687_v12, %v2357_v18 }
0x1bb4   :  { %v2368_v25 = vadd.f32 %v6687_v12, %v2358_v8 }
0x1bb6   :  { %v2371_v39 = vpack.c.bf16 %v2368_v25, %v2367_v56 }
0x1bb8   :  { %5135 = vmatmul.mubr.msk.bf16.gmra.mrb[68].mxu1 %vm162_vm2, %v2371_v39 }
0x1bb9   :  { %5142 = vmatprep.mubr.msk.bf16.mxu1 %vm359_vm3, %v6715_v53 }
0x1bde   :  { %v2464_v11 = vpop.permute.xlu1 %2463 }
0x1bdf   :  { %5366 = vmatprep.subr.msk.bf16.mxu1 %vm359_vm3, %v2464_v11  ;;  %v2474_v41 = vsel %vm359_vm3, %v2464_v11, 0 }
0x1be0   :  { %5139 = vmatpush3.bf16.xpose.msra.mxu1 %v2474_v41 }
0x1be2   :  { %v2632_v49 = vpop.permute.xlu1 %2631 }
0x1be3   :  { %v2642_v44 = vsel %vm359_vm3, %v2632_v49, 0 }
0x1bf2   :  { %v2444_v10 = vpop.f32.mrb[64].mxu1 }
0x1bf3   :  { %v2445_v21 = vadd.f32 %v2444_v10, %v6711_v40  ;;  %v5132_v31 = vpop.f32.mrb[65].mxu1 }
0x1bf4   :  { %v2447_v23 = vpop.f32.mrb[66].mxu1 }
0x1bf5   :  { %v6731_v38 = vpack.c.bf16 %v2445_v21, %v2445_v21  ;;  %v5133_v12 = vpop.f32.mrb[67].mxu1  ;;  %v2448_v15 = vadd.f32 %v2447_v23, %v6711_v40 }
0x1bf7   :  { %2633 = vrot.lane.b32.xlu1 %v6731_v38, %s5833_s24  ;;  %2465 = vrot.lane.b32.xlu0 %v6731_v38, %s5830_s22 }
0x1bfb   :  { %2627 = vrot.lane.b32.xlu1 %v6715_v53, %s5832_s23  ;;  %2629 = vrot.lane.b32.xlu0 %v6731_v38, %s5832_s23 }
0x1c69   :  { %v2466_v13 = vpop.permute.xlu0 %2465  ;;  %v2634_v28 = vpop.permute.xlu1 %2633 }
0x1c6a   :  { %5367 = vmatprep.subr.msk.bf16.mxu1 %vm359_vm3, %v2466_v13  ;;  %v2477_v57 = vsel %vm359_vm3, %v2466_v13, 0  ;;  %v2645_v42 = vsel %vm359_vm3, %v2634_v28, 0 }
0x1c6b   :  { %5141 = vmatpush3.bf16.xpose.msra.mxu1 %v2477_v57 }
0x1c6c   :  { %5369 = vmatprep.subr.msk.bf16.mxu1 %vm359_vm3, %v2632_v49 }
0x1c6d   :  { %v2628_v60 = vpop.permute.xlu1 %2627  ;;  %v2630_v19 = vpop.permute.xlu0 %2629 }
0x1c72   :  { %5143 = vmatmul.mubr.msk.bf16.vlgmr.msra.gmra.mrb[72].mxu1 %vm359_vm3, %v6731_v38 }
0x1c73   :  { %5155 = vmatpush3.bf16.xpose.msra.mxu1 %v2642_v44  ;;  %5158 = vmatprep.mubr.msk.bf16.mxu1 %vm359_vm3, %v2628_v60 }
0x1c74   :  { %5370 = vmatprep.subr.msk.bf16.mxu1 %vm359_vm3, %v2634_v28 }
0x1c7b   :  { %5157 = vmatpush3.bf16.xpose.msra.mxu1 %v2645_v42 }
0x1c82   :  { %5159 = vmatmul.mubr.msk.bf16.vlgmr.msra.gmra.mrb[76].mxu1 %vm359_vm3, %v2630_v19 }
0x1c8b   :  { %v2452_v45 = vpop.f32.mrb[68].mxu1 }
0x1c8c   :  { %v2453_v43 = vadd.f32 %v2452_v45, %v6711_v40  ;;  %v5136_v48 = vpop.f32.mrb[69].mxu1 }
0x1c8d   :  { %v6753_v54 = vpop.f32.mrb[70].mxu1 }
0x1c8e   :  { %v6755_v34 = vpack.c.bf16 %v2453_v43, %v2448_v15  ;;  %v5137_v26 = vpop.f32.mrb[71].mxu1 }
0x1d45   :  { %v5144_v14 = vpop.f32.mrb[72].mxu1 }
0x1d46   :  { %v2513_v59 = vpop.f32.mrb[73].mxu1  ;;  %v2529_v29 = vsel %vm161_vm4, %v5144_v14, -1e+09 }
0x1d47   :  { %v2527_v24 = vsel %vm161_vm4, %v2513_v59, -1e+09  ;;  %v5145_v32 = vpop.f32.mrb[74].mxu1  ;;  %v2536_v37 = vsel %vm423_vm5, %v2529_v29, -inf }
0x1d48   :  { %v2530_v30 = vsel %vm423_vm5, %v2527_v24, -inf  ;;  %v2516_v63 = vpop.f32.mrb[75].mxu1 }
0x1d49   :  { %v2528_v52 = vsel %vm161_vm4, %v2516_v63, -1e+09  ;;  %2531 = vmax.xlane.f32.xlu1 %v2530_v30 }
0x1d4a   :  { %v2533_v50 = vsel %vm423_vm5, %v2528_v52, -inf }
0x1d4b   :  { %2534 = vmax.xlane.f32.xlu0 %v2533_v50 }
0x1d4f   :  { %2537 = vmax.xlane.f32.xlu0 %v2536_v37 }
0x1d55   :  { %v5160_v58 = vpop.f32.mrb[76].mxu1 }
0x1d56   :  { %v2681_v36 = vpop.f32.mrb[77].mxu1  ;;  %v2697_v6 = vsel %vm161_vm4, %v5160_v58, -1e+09 }
0x1d57   :  { %v2695_v61 = vsel %vm161_vm4, %v2681_v36, -1e+09  ;;  %v5161_v17 = vpop.f32.mrb[78].mxu1  ;;  %v2704_v56 = vsel %vm423_vm5, %v2697_v6, -inf }
0x1d58   :  { %v2698_v0 = vsel %vm423_vm5, %v2695_v61, -inf  ;;  %v2684_v5 = vpop.f32.mrb[79].mxu1 }
0x1d59   :  { %v2696_v18 = vsel %vm161_vm4, %v2684_v5, -1e+09  ;;  %2699 = vmax.xlane.f32.xlu0 %v2698_v0 }
0x1d5a   :  { %v2701_v8 = vsel %vm423_vm5, %v2696_v18, -inf }
0x1d5b   :  { %2702 = vmax.xlane.f32.xlu1 %v2701_v8 }
0x1d5d   :  { %2705 = vmax.xlane.f32.xlu0 %v2704_v56 }
0x1d6c   :  { %2565 = vrot.lane.b32.xlu1 %v6715_v53, %s5831_s2 }
0x1dd6   :  { %v2532_v25 = vpop.xlane.xlu1 %2531 }
0x1dd7   :  { %v2539_v41 = vsub.f32 %v2527_v24, %v2532_v25 }
0x1dd8   :  { %v2535_v39 = vpop.xlane.xlu0 %2534 }
0x1dd9   :  { %v2540_v11 = vsub.f32 %v2528_v52, %v2535_v39  ;;  %v2542_v23 = vmul.f32 1.442695, %v2539_v41 }
0x1ddb   :  { %v2544_v10 = vmul.f32 1.442695, %v2540_v11 }
0x1ddc   :  { %v2538_v21 = vpop.xlane.xlu0 %2537 }
0x1ddd   :  { %5679 = vpow2.f32 %v2544_v10  ;;  %v2541_v31 = vsub.f32 %v2529_v29, %v2538_v21 }
0x1ddf   :  { %v2546_v12 = vmul.f32 1.442695, %v2541_v31 }
0x1de1   :  { %5681 = vpow2.f32 %v2546_v12 }
0x1de2   :  { %5683 = vpow2.f32 %v2542_v23 }
0x1de6   :  { %v2700_v49 = vpop.xlane.xlu0 %2699 }
0x1de7   :  { %v5680_v13 = vpop.eup %5679  ;;  %v2707_v60 = vsub.f32 %v2695_v61, %v2700_v49 }
0x1de8   :  { %v2703_v57 = vpop.xlane.xlu1 %2702  ;;  %v2551_v28 = vsel %vm423_vm5, %v5680_v13, 0.0 }
0x1de9   :  { %2552 = vadd.xlane.f32.xlu0 %v2551_v28  ;;  %v2710_v48 = vmul.f32 1.442695, %v2707_v60  ;;  %v2708_v63 = vsub.f32 %v2696_v18, %v2703_v57 }
0x1dea   :  { %v2706_v44 = vpop.xlane.xlu0 %2705 }
0x1deb   :  { %v5682_v42 = vpop.eup %5681  ;;  %v2709_v19 = vsub.f32 %v2697_v6, %v2706_v44  ;;  %v2712_v52 = vmul.f32 1.442695, %v2708_v63 }
0x1dec   :  { %v2566_v45 = vpop.permute.xlu1 %2565  ;;  %v2554_v15 = vsel %vm423_vm5, %v5682_v42, 0.0  ;;  %v5684_v43 = vpop.eup %5683 }
0x1ded   :  { %v2714_v26 = vmul.f32 1.442695, %v2709_v19  ;;  %5146 = vmatprep.subr.bf16.mxu0 %v2566_v45  ;;  %2555 = vadd.xlane.f32.xlu1 %v2554_v15  ;;  %v2548_v14 = vsel %vm423_vm5, %v5684_v43, 0.0 }
0x1dee   :  { %5147 = vmatpush3.bf16.msra.mxu0 %v2566_v45 }
0x1def   :  { %5685 = vpow2.f32 %v2714_v26 }
0x1df0   :  { %5687 = vpow2.f32 %v2710_v48 }
0x1df1   :  { %2549 = vadd.xlane.f32.xlu1 %v2548_v14  ;;  %5689 = vpow2.f32 %v2712_v52 }
0x1df9   :  { %v5686_v59 = vpop.eup %5685 }
0x1dfa   :  { %v2722_v24 = vsel %vm423_vm5, %v5686_v59, 0.0  ;;  %v5688_v32 = vpop.eup %5687 }
0x1dfb   :  { %2723 = vadd.xlane.f32.xlu0 %v2722_v24  ;;  %v2716_v30 = vsel %vm423_vm5, %v5688_v32, 0.0  ;;  %v5690_v50 = vpop.eup %5689 }
0x1dfc   :  { %v2719_v29 = vsel %vm423_vm5, %v5690_v50, 0.0 }
0x1dff   :  { %2717 = vadd.xlane.f32.xlu0 %v2716_v30 }
0x1e02   :  { %2733 = vrot.lane.b32.xlu1 %v6715_v53, %s5834_s25 }
0x1e06   :  { %2735 = vrot.lane.b32.xlu1 %v6731_v38, %s5834_s25 }
0x1e15   :  { %2567 = vrot.lane.b32.xlu0 %v6731_v38, %s5831_s2 }
0x1e19   :  { %2801 = vrot.lane.b32.xlu0 %v6731_v38, %s5835_s26 }
0x1e1d   :  { %2797 = vrot.lane.b32.xlu0 %v6731_v38, %s5836_s27 }
0x1e2a   :  { %2720 = vadd.xlane.f32.xlu1 %v2719_v29 }
0x1e3b   :  { %2799 = vrot.lane.b32.xlu1 %v6715_v53, %s5835_s26 }
0x1e3f   :  { %2795 = vrot.lane.b32.xlu1 %v6715_v53, %s5836_s27 }
0x1e76   :  { %v2553_v37 = vpop.xlane.xlu0 %2552 }
0x1e77   :  { %5691 = vrcp.f32 %v2553_v37 }
0x1e7a   :  { %v2556_v58 = vpop.xlane.xlu1 %2555 }
0x1e7e   :  { %v2550_v36 = vpop.xlane.xlu1 %2549 }
0x1e7f   :  { %5693 = vrcp.f32 %v2550_v36 }
0x1e80   :  { %5695 = vrcp.f32 %v2556_v58 }
0x1e81   :  { %v5692_v61 = vpop.eup %5691 }
0x1e82   :  { %v2561_v6 = vmul.f32 %v5692_v61, %v5680_v13  ;;  %v2734_v39 = vpop.permute.xlu1 %2733 }
0x1e86   :  { %v2736_v21 = vpop.permute.xlu1 %2735 }
0x1e87   :  { %v2745_v31 = vsel %vm470_vm6, %v2736_v21, 0 }
0x1e88   :  { %v2724_v17 = vpop.xlane.xlu0 %2723 }
0x1e89   :  { %v5694_v0 = vpop.eup %5693  ;;  %5697 = vrcp.f32 %v2724_v17 }
0x1e8a   :  { %v2560_v5 = vmul.f32 %v5694_v0, %v5684_v43  ;;  %v5696_v18 = vpop.eup %5695 }
0x1e8b   :  { %v2562_v25 = vmul.f32 %v5696_v18, %v5682_v42 }
0x1e8c   :  { %v2718_v8 = vpop.xlane.xlu0 %2717  ;;  %v2563_v56 = vpack.c.bf16 %v2561_v6, %v2560_v5 }
0x1e8d   :  { %v2564_v10 = vpack.c.bf16 %v2562_v25, %v2562_v25  ;;  %5699 = vrcp.f32 %v2718_v8 }
0x1e8e   :  { %5150 = vmatprep.mubr.msk.bf16.mxu0 %vm423_vm5, %v2563_v56 }
0x1e90   :  { %v2568_v11 = vpop.permute.xlu0 %2567 }
0x1e91   :  { %v2577_v41 = vsel %vm470_vm6, %v2568_v11, 0  ;;  %5368 = vmatprep.subr.msk.bf16.mxu0 %vm470_vm6, %v2568_v11 }
0x1e92   :  { %5149 = vmatpush3.bf16.msra.mxu0 %v2577_v41 }
0x1e93   :  { %5162 = vmatprep.subr.bf16.mxu0 %v2734_v39  ;;  %v5698_v49 = vpop.eup %5697 }
0x1e94   :  { %v2730_v28 = vmul.f32 %v5698_v49, %v5686_v59  ;;  %v2802_v43 = vpop.permute.xlu0 %2801 }
0x1e95   :  { %5151 = vmatmul.mubr.msk.bf16.vlgmr.msra.gmra.mrb[64].mxu0 %vm423_vm5, %v2564_v10  ;;  %v2813_v48 = vsel %vm359_vm3, %v2802_v43, 0 }
0x1e96   :  { %5163 = vmatpush3.bf16.msra.mxu0 %v2734_v39  ;;  %v2732_v19 = vpack.c.bf16 %v2730_v28, %v2730_v28 }
0x1e97   :  { %5371 = vmatprep.subr.msk.bf16.mxu0 %vm470_vm6, %v2736_v21  ;;  %v5700_v13 = vpop.eup %5699 }
0x1e98   :  { %v2728_v60 = vmul.f32 %v5700_v13, %v5688_v32  ;;  %v2798_v26 = vpop.permute.xlu0 %2797 }
0x1e9a   :  { %5165 = vmatpush3.bf16.msra.mxu0 %v2745_v31 }
0x1eb7   :  { %v2721_v23 = vpop.xlane.xlu1 %2720 }
0x1eb8   :  { %5701 = vrcp.f32 %v2721_v23 }
0x1ebb   :  { %v2800_v12 = vpop.permute.xlu1 %2799 }
0x1ebc   :  { %5372 = vmatprep.subr.msk.bf16.mxu0 %vm359_vm3, %v2800_v12  ;;  %v2810_v45 = vsel %vm359_vm3, %v2800_v12, 0 }
0x1ebf   :  { %v2796_v15 = vpop.permute.xlu1 %2795 }
0x1ec2   :  { %v5702_v57 = vpop.eup %5701 }
0x1ec3   :  { %v2729_v44 = vmul.f32 %v5702_v57, %v5690_v50 }
0x1ec5   :  { %v2731_v42 = vpack.c.bf16 %v2729_v44, %v2728_v60 }
0x1ec7   :  { %5166 = vmatprep.mubr.msk.bf16.mxu0 %vm423_vm5, %v2731_v42 }
0x1ec8   :  { %5167 = vmatmul.mubr.msk.bf16.vlgmr.msra.gmra.mrb[68].mxu0 %vm423_vm5, %v2732_v19 }
0x1ec9   :  { %5171 = vmatpush3.bf16.xpose.msra.mxu0 %v2810_v45  ;;  %5174 = vmatprep.mubr.msk.bf16.mxu0 %vm359_vm3, %v2796_v15 }
0x1eca   :  { %5373 = vmatprep.subr.msk.bf16.mxu0 %vm359_vm3, %v2802_v43 }
0x1ed1   :  { %5173 = vmatpush3.bf16.xpose.msra.mxu0 %v2813_v48 }
0x1ed8   :  { %5175 = vmatmul.mubr.msk.bf16.vlgmr.msra.gmra.mrb[72].mxu0 %vm359_vm3, %v2798_v26 }
0x1f68   :  { %v6811_v14 = vpop.f32.mrb[64].mxu0 }
0x1f69   :  { %v6813_v59 = vpop.f32.mrb[65].mxu0 }
0x1f6a   :  { %v5153_v24 = vpop.f32.mrb[66].mxu0 }
0x1f6b   :  { %v6815_v32 = vpop.f32.mrb[67].mxu0 }
0x1f9b   :  { %v6817_v30 = vpop.f32.mrb[68].mxu0 }
0x1f9c   :  { %v6819_v63 = vpop.f32.mrb[69].mxu0 }
0x1f9d   :  { %v5169_v52 = vpop.f32.mrb[70].mxu0 }
0x1f9e   :  { %v6821_v50 = vpop.f32.mrb[71].mxu0 }
0x1f9f   :  { %v5452_v29 = vpack.i.bf16 %v6821_v50, %v6819_v63 }
0x1fab   :  { %v5176_v37 = vpop.f32.mrb[72].mxu0 }
0x1fac   :  { %v2849_v58 = vpop.f32.mrb[73].mxu0  ;;  %v2865_v18 = vsel %vm161_vm4, %v5176_v37, -1e+09 }
0x1fad   :  { %v2863_v36 = vsel %vm161_vm4, %v2849_v58, -1e+09  ;;  %v5177_v61 = vpop.f32.mrb[74].mxu0  ;;  %v2872_v8 = vsel %vm423_vm5, %v2865_v18, -inf }
0x1fae   :  { %v2866_v17 = vsel %vm423_vm5, %v2863_v36, -inf  ;;  %v2852_v0 = vpop.f32.mrb[75].mxu0 }
0x1faf   :  { %v2864_v5 = vsel %vm161_vm4, %v2852_v0, -1e+09  ;;  %2867 = vmax.xlane.f32.xlu1 %v2866_v17 }
0x1fb0   :  { %v2869_v6 = vsel %vm423_vm5, %v2864_v5, -inf }
0x1fb1   :  { %2870 = vmax.xlane.f32.xlu0 %v2869_v6 }
0x1fb5   :  { %2873 = vmax.xlane.f32.xlu0 %v2872_v8 }
0x1fc0   :  { %2901 = vrot.lane.b32.xlu1 %v6715_v53, %s5837_s1 }
0x203c   :  { %v2868_v56 = vpop.xlane.xlu1 %2867 }
0x203d   :  { %v2875_v41 = vsub.f32 %v2863_v36, %v2868_v56 }
0x203e   :  { %v2871_v25 = vpop.xlane.xlu0 %2870 }
0x203f   :  { %v2876_v39 = vsub.f32 %v2864_v5, %v2871_v25  ;;  %v2878_v23 = vmul.f32 1.442695, %v2875_v41 }
0x2040   :  { %v2902_v11 = vpop.permute.xlu1 %2901 }
0x2041   :  { %v2880_v10 = vmul.f32 1.442695, %v2876_v39  ;;  %5178 = vmatprep.subr.bf16.mxu1 %v2902_v11 }
0x2042   :  { %5179 = vmatpush3.bf16.msra.mxu1 %v2902_v11  ;;  %v2874_v21 = vpop.xlane.xlu0 %2873 }
0x2043   :  { %5703 = vpow2.f32 %v2880_v10  ;;  %v2877_v31 = vsub.f32 %v2865_v18, %v2874_v21 }
0x2045   :  { %v2882_v12 = vmul.f32 1.442695, %v2877_v31 }
0x2047   :  { %5705 = vpow2.f32 %v2882_v12 }
0x2048   :  { %5707 = vpow2.f32 %v2878_v23 }
0x204d   :  { %v5704_v49 = vpop.eup %5703 }
0x204e   :  { %v2887_v13 = vsel %vm423_vm5, %v5704_v49, 0.0 }
0x204f   :  { %2888 = vadd.xlane.f32.xlu1 %v2887_v13 }
0x2051   :  { %v5706_v57 = vpop.eup %5705 }
0x2052   :  { %v2890_v28 = vsel %vm423_vm5, %v5706_v57, 0.0  ;;  %v5708_v60 = vpop.eup %5707 }
0x2053   :  { %2891 = vadd.xlane.f32.xlu0 %v2890_v28  ;;  %v2884_v44 = vsel %vm423_vm5, %v5708_v60, 0.0 }
0x2057   :  { %2885 = vadd.xlane.f32.xlu0 %v2884_v44 }
0x2060   :  { %2967 = vrot.lane.b32.xlu1 %v6715_v53, %s5838_s28 }
0x2064   :  { %2969 = vrot.lane.b32.xlu1 %v6731_v38, %s5838_s28 }
0x2068   :  { %2963 = vrot.lane.b32.xlu1 %v6715_v53, %s5839_s29 }
0x206d   :  { %2903 = vrot.lane.b32.xlu0 %v6731_v38, %s5837_s1 }
0x2071   :  { %2965 = vrot.lane.b32.xlu0 %v6731_v38, %s5839_s29 }
0x20dc   :  { %v2889_v42 = vpop.xlane.xlu1 %2888 }
0x20e0   :  { %v2892_v19 = vpop.xlane.xlu0 %2891  ;;  %v2968_v43 = vpop.permute.xlu1 %2967 }
0x20e1   :  { %5709 = vrcp.f32 %v2892_v19  ;;  %v2978_v5 = vsel %vm359_vm3, %v2968_v43, 0 }
0x20e2   :  { %5711 = vrcp.f32 %v2889_v42 }
0x20e4   :  { %v2886_v45 = vpop.xlane.xlu0 %2885  ;;  %v2970_v58 = vpop.permute.xlu1 %2969 }
0x20e5   :  { %5713 = vrcp.f32 %v2886_v45  ;;  %v2981_v18 = vsel %vm359_vm3, %v2970_v58, 0 }
0x20e8   :  { %v2904_v15 = vpop.permute.xlu0 %2903  ;;  %v2964_v6 = vpop.permute.xlu1 %2963 }
0x20e9   :  { %v2913_v48 = vsel %vm470_vm6, %v2904_v15, 0  ;;  %5374 = vmatprep.subr.msk.bf16.mxu1 %vm470_vm6, %v2904_v15 }
0x20ea   :  { %5181 = vmatpush3.bf16.msra.mxu1 %v2913_v48 }
0x20eb   :  { %5375 = vmatprep.subr.msk.bf16.mxu1 %vm359_vm3, %v2968_v43  ;;  %v5710_v26 = vpop.eup %5709 }
0x20ec   :  { %v5712_v24 = vpop.eup %5711  ;;  %v2898_v37 = vmul.f32 %v5710_v26, %v5706_v57  ;;  %v2966_v8 = vpop.permute.xlu0 %2965 }
0x20ed   :  { %v2897_v61 = vmul.f32 %v5712_v24, %v5704_v49 }
0x20ee   :  { %v2900_v0 = vpack.c.bf16 %v2898_v37, %v2898_v37 }
0x20ef   :  { %v5714_v52 = vpop.eup %5713 }
0x20f0   :  { %v2896_v36 = vmul.f32 %v5714_v52, %v5708_v60 }
0x20f2   :  { %v2899_v17 = vpack.c.bf16 %v2897_v61, %v2896_v36 }
0x20f4   :  { %5182 = vmatprep.mubr.msk.bf16.mxu1 %vm423_vm5, %v2899_v17 }
0x20f5   :  { %5183 = vmatmul.mubr.msk.bf16.vlgmr.msra.gmra.mrb[80].mxu1 %vm423_vm5, %v2900_v0  ;;  %v2456_v0 = vadd.f32 %v6753_v54, %v6711_v40 }
0x20f6   :  { %5187 = vmatpush3.bf16.xpose.msra.mxu1 %v2978_v5  ;;  %5190 = vmatprep.mubr.msk.bf16.mxu1 %vm359_vm3, %v2964_v6 }
0x20f7   :  { %5376 = vmatprep.subr.msk.bf16.mxu1 %vm359_vm3, %v2970_v58  ;;  %v6885_v5 = vpack.c.bf16 %v2456_v0, %v2456_v0 }
0x20fe   :  { %5189 = vmatpush3.bf16.xpose.msra.mxu1 %v2981_v18 }
0x2105   :  { %5191 = vmatmul.mubr.msk.bf16.vlgmr.msra.gmra.mrb[84].mxu1 %vm359_vm3, %v2966_v8 }
0x21c8   :  { %v6859_v56 = vpop.f32.mrb[80].mxu1 }
0x21c9   :  { %v6861_v25 = vpop.f32.mrb[81].mxu1 }
0x21ca   :  { %v5185_v39 = vpop.f32.mrb[82].mxu1 }
0x21cb   :  { %v6863_v11 = vpop.f32.mrb[83].mxu1 }
0x21cc   :  { %v5457_v41 = vpack.i.bf16 %v6863_v11, %v6861_v25 }
0x21d8   :  { %v5192_v10 = vpop.f32.mrb[84].mxu1 }
0x21d9   :  { %v3017_v21 = vpop.f32.mrb[85].mxu1  ;;  %v3033_v28 = vsel %vm161_vm4, %v5192_v10, -1e+09 }
0x21da   :  { %v3031_v31 = vsel %vm161_vm4, %v3017_v21, -1e+09  ;;  %v5193_v23 = vpop.f32.mrb[86].mxu1  ;;  %v3040_v60 = vsel %vm423_vm5, %v3033_v28, -inf }
0x21db   :  { %v3034_v12 = vsel %vm423_vm5, %v3031_v31, -inf  ;;  %v3020_v49 = vpop.f32.mrb[87].mxu1 }
0x21dc   :  { %v3032_v13 = vsel %vm161_vm4, %v3020_v49, -1e+09  ;;  %3035 = vmax.xlane.f32.xlu1 %v3034_v12 }
0x21dd   :  { %v3037_v57 = vsel %vm423_vm5, %v3032_v13, -inf }
0x21de   :  { %3038 = vmax.xlane.f32.xlu0 %v3037_v57 }
0x21e2   :  { %3041 = vmax.xlane.f32.xlu0 %v3040_v60 }
0x21ed   :  { %3069 = vrot.lane.b32.xlu1 %v6715_v53, %s5840_s30 }
0x2269   :  { %v3036_v44 = vpop.xlane.xlu1 %3035 }
0x226a   :  { %v3043_v15 = vsub.f32 %v3031_v31, %v3036_v44 }
0x226b   :  { %v3039_v42 = vpop.xlane.xlu0 %3038 }
0x226c   :  { %v3044_v19 = vsub.f32 %v3032_v13, %v3039_v42  ;;  %v3046_v24 = vmul.f32 1.442695, %v3043_v15 }
0x226d   :  { %v3070_v45 = vpop.permute.xlu1 %3069 }
0x226e   :  { %v3048_v43 = vmul.f32 1.442695, %v3044_v19  ;;  %5194 = vmatprep.subr.bf16.mxu0 %v3070_v45 }
0x226f   :  { %5195 = vmatpush3.bf16.msra.mxu0 %v3070_v45  ;;  %v3042_v48 = vpop.xlane.xlu0 %3041 }
0x2270   :  { %5715 = vpow2.f32 %v3048_v43  ;;  %v3045_v26 = vsub.f32 %v3033_v28, %v3042_v48 }
0x2272   :  { %v3050_v52 = vmul.f32 1.442695, %v3045_v26 }
0x2274   :  { %5717 = vpow2.f32 %v3050_v52 }
0x2275   :  { %5719 = vpow2.f32 %v3046_v24 }
0x227a   :  { %v5716_v37 = vpop.eup %5715 }
0x227b   :  { %v3055_v58 = vsel %vm423_vm5, %v5716_v37, 0.0 }
0x227c   :  { %3056 = vadd.xlane.f32.xlu1 %v3055_v58 }
0x227e   :  { %v5718_v53 = vpop.eup %5717 }
0x227f   :  { %v3058_v36 = vsel %vm423_vm5, %v5718_v53, 0.0  ;;  %v5720_v61 = vpop.eup %5719 }
0x2280   :  { %3059 = vadd.xlane.f32.xlu0 %v3058_v36  ;;  %v3052_v17 = vsel %vm423_vm5, %v5720_v61, 0.0 }
0x2284   :  { %3053 = vadd.xlane.f32.xlu0 %v3052_v17 }
0x228d   :  { %3180 = vrot.lane.b32.xlu1 %v6755_v34, %s5830_s22 }
0x2291   :  { %3182 = vrot.lane.b32.xlu1 %v6885_v5, %s5830_s22 }
0x229a   :  { %3071 = vrot.lane.b32.xlu0 %v6731_v38, %s5840_s30 }
0x2309   :  { %v3057_v6 = vpop.xlane.xlu1 %3056 }
0x230d   :  { %v3060_v18 = vpop.xlane.xlu0 %3059  ;;  %v3181_v54 = vpop.permute.xlu1 %3180 }
0x230e   :  { %5721 = vrcp.f32 %v3060_v18  ;;  %v3191_v57 = vsel %vm359_vm3, %v3181_v54, 0 }
0x230f   :  { %5723 = vrcp.f32 %v3057_v6 }
0x2311   :  { %v3054_v8 = vpop.xlane.xlu0 %3053  ;;  %v3183_v28 = vpop.permute.xlu1 %3182 }
0x2312   :  { %5725 = vrcp.f32 %v3054_v8  ;;  %v3194_v60 = vsel %vm359_vm3, %v3183_v28, 0 }
0x2315   :  { %v3072_v39 = vpop.permute.xlu0 %3071 }
0x2316   :  { %v3081_v40 = vsel %vm470_vm6, %v3072_v39, 0  ;;  %5377 = vmatprep.subr.msk.bf16.mxu0 %vm470_vm6, %v3072_v39 }
0x2317   :  { %5197 = vmatpush3.bf16.msra.mxu0 %v3081_v40 }
0x2318   :  { %5378 = vmatprep.subr.msk.bf16.mxu0 %vm359_vm3, %v3181_v54  ;;  %v5722_v10 = vpop.eup %5721 }
0x2319   :  { %v5724_v21 = vpop.eup %5723  ;;  %v3066_v23 = vmul.f32 %v5722_v10, %v5718_v53 }
0x231a   :  { %v3065_v12 = vmul.f32 %v5724_v21, %v5716_v37 }
0x231b   :  { %v3068_v13 = vpack.c.bf16 %v3066_v23, %v3066_v23 }
0x231c   :  { %v5726_v31 = vpop.eup %5725 }
0x231d   :  { %v3064_v38 = vmul.f32 %v5726_v31, %v5720_v61 }
0x231f   :  { %v3067_v49 = vpack.c.bf16 %v3065_v12, %v3064_v38 }
0x2321   :  { %5198 = vmatprep.mubr.msk.bf16.mxu0 %vm423_vm5, %v3067_v49 }
0x2322   :  { %5199 = vmatmul.mubr.msk.bf16.vlgmr.msra.gmra.mrb[76].mxu0 %vm423_vm5, %v3068_v13 }
0x2323   :  { %5203 = vmatpush3.bf16.xpose.msra.mxu0 %v3191_v57  ;;  %5206 = vmatprep.mubr.msk.bf16.mxu0 %vm359_vm3, %v6755_v34 }
0x2324   :  { %5379 = vmatprep.subr.msk.bf16.mxu0 %vm359_vm3, %v3183_v28 }
0x232b   :  { %5205 = vmatpush3.bf16.xpose.msra.mxu0 %v3194_v60 }
0x2332   :  { %5207 = vmatmul.mubr.msk.bf16.vlgmr.msra.gmra.mrb[80].mxu0 %vm359_vm3, %v6885_v5 }
0x23f5   :  { %v6903_v44 = vpop.f32.mrb[76].mxu0 }
0x23f6   :  { %v6905_v42 = vpop.f32.mrb[77].mxu0 }
0x23f7   :  { %v5201_v19 = vpop.f32.mrb[78].mxu0 }
0x23f8   :  { %v6907_v45 = vpop.f32.mrb[79].mxu0 }
0x23f9   :  { %v5462_v15 = vpack.i.bf16 %v6907_v45, %v6905_v42 }
0x2405   :  { %v5208_v43 = vpop.f32.mrb[80].mxu0 }
0x2406   :  { %v3230_v48 = vpop.f32.mrb[81].mxu0  ;;  %v3246_v36 = vsel %vm161_vm4, %v5208_v43, -1e+09 }
0x2407   :  { %v3244_v26 = vsel %vm161_vm4, %v3230_v48, -1e+09  ;;  %v5209_v24 = vpop.f32.mrb[82].mxu0  ;;  %v3253_v61 = vsel %vm423_vm5, %v3246_v36, -inf }
0x2408   :  { %v3247_v52 = vsel %vm423_vm5, %v3244_v26, -inf  ;;  %v3233_v37 = vpop.f32.mrb[83].mxu0 }
0x2409   :  { %v3245_v58 = vsel %vm161_vm4, %v3233_v37, -1e+09  ;;  %3248 = vmax.xlane.f32.xlu1 %v3247_v52 }
0x240a   :  { %v3250_v53 = vsel %vm423_vm5, %v3245_v58, -inf }
0x240b   :  { %3251 = vmax.xlane.f32.xlu0 %v3250_v53 }
0x240f   :  { %3254 = vmax.xlane.f32.xlu0 %v3253_v61 }
0x241a   :  { %3282 = vrot.lane.b32.xlu1 %v6755_v34, %s5831_s2 }
0x2496   :  { %v3249_v17 = vpop.xlane.xlu1 %3248 }
0x2497   :  { %v3256_v8 = vsub.f32 %v3244_v26, %v3249_v17 }
0x2498   :  { %v3252_v0 = vpop.xlane.xlu0 %3251 }
0x2499   :  { %v3257_v6 = vsub.f32 %v3245_v58, %v3252_v0  ;;  %v3259_v10 = vmul.f32 1.442695, %v3256_v8 }
0x249a   :  { %v3283_v18 = vpop.permute.xlu1 %3282 }
0x249b   :  { %v3261_v39 = vmul.f32 1.442695, %v3257_v6  ;;  %5210 = vmatprep.subr.bf16.mxu1 %v3283_v18 }
0x249c   :  { %5211 = vmatpush3.bf16.msra.mxu1 %v3283_v18  ;;  %v3255_v40 = vpop.xlane.xlu0 %3254 }
0x249d   :  { %5727 = vpow2.f32 %v3261_v39  ;;  %v3258_v54 = vsub.f32 %v3246_v36, %v3255_v40 }
0x249f   :  { %v3263_v21 = vmul.f32 1.442695, %v3258_v54 }
0x24a1   :  { %5729 = vpow2.f32 %v3263_v21 }
0x24a2   :  { %5731 = vpow2.f32 %v3259_v10 }
0x24a7   :  { %v5728_v31 = vpop.eup %5727 }
0x24a8   :  { %v3268_v23 = vsel %vm423_vm5, %v5728_v31, 0.0 }
0x24a9   :  { %3269 = vadd.xlane.f32.xlu1 %v3268_v23 }
0x24ab   :  { %v5730_v38 = vpop.eup %5729 }
0x24ac   :  { %v3271_v12 = vsel %vm423_vm5, %v5730_v38, 0.0  ;;  %v5732_v49 = vpop.eup %5731 }
0x24ad   :  { %3272 = vadd.xlane.f32.xlu0 %v3271_v12  ;;  %v3265_v13 = vsel %vm423_vm5, %v5732_v49, 0.0 }
0x24b1   :  { %3266 = vadd.xlane.f32.xlu0 %v3265_v13 }
0x24ba   :  { %3348 = vrot.lane.b32.xlu1 %v6755_v34, %s5833_s24 }
0x24be   :  { %3350 = vrot.lane.b32.xlu1 %v6885_v5, %s5833_s24 }
0x24c2   :  { %3344 = vrot.lane.b32.xlu1 %v6755_v34, %s5832_s23 }
0x24c7   :  { %3284 = vrot.lane.b32.xlu0 %v6885_v5, %s5831_s2 }
0x24cb   :  { %3346 = vrot.lane.b32.xlu0 %v6885_v5, %s5832_s23 }
0x2536   :  { %v3270_v57 = vpop.xlane.xlu1 %3269 }
0x253a   :  { %v3273_v28 = vpop.xlane.xlu0 %3272  ;;  %v3349_v43 = vpop.permute.xlu1 %3348 }
0x253b   :  { %5733 = vrcp.f32 %v3273_v28  ;;  %v3359_v0 = vsel %vm359_vm3, %v3349_v43, 0 }
0x253c   :  { %5735 = vrcp.f32 %v3270_v57 }
0x253e   :  { %v3267_v60 = vpop.xlane.xlu0 %3266  ;;  %v3351_v58 = vpop.permute.xlu1 %3350 }
0x253f   :  { %5737 = vrcp.f32 %v3267_v60  ;;  %v3362_v18 = vsel %vm359_vm3, %v3351_v58, 0 }
0x2542   :  { %v3285_v19 = vpop.permute.xlu0 %3284  ;;  %v3345_v6 = vpop.permute.xlu1 %3344 }
0x2543   :  { %v3294_v48 = vsel %vm470_vm6, %v3285_v19, 0  ;;  %5380 = vmatprep.subr.msk.bf16.mxu1 %vm470_vm6, %v3285_v19 }
0x2544   :  { %5213 = vmatpush3.bf16.msra.mxu1 %v3294_v48 }
0x2545   :  { %5381 = vmatprep.subr.msk.bf16.mxu1 %vm359_vm3, %v3349_v43  ;;  %v5734_v26 = vpop.eup %5733 }
0x2546   :  { %v5736_v24 = vpop.eup %5735  ;;  %v3279_v37 = vmul.f32 %v5734_v26, %v5730_v38  ;;  %v3347_v8 = vpop.permute.xlu0 %3346 }
0x2547   :  { %v3278_v36 = vmul.f32 %v5736_v24, %v5728_v31 }
0x2548   :  { %v3281_v17 = vpack.c.bf16 %v3279_v37, %v3279_v37 }
0x2549   :  { %v5738_v52 = vpop.eup %5737 }
0x254a   :  { %v3277_v53 = vmul.f32 %v5738_v52, %v5732_v49 }
0x254c   :  { %v3280_v61 = vpack.c.bf16 %v3278_v36, %v3277_v53 }
0x254e   :  { %5214 = vmatprep.mubr.msk.bf16.mxu1 %vm423_vm5, %v3280_v61 }
0x254f   :  { %5215 = vmatmul.mubr.msk.bf16.vlgmr.msra.gmra.mrb[88].mxu1 %vm423_vm5, %v3281_v17 }
0x2550   :  { %5219 = vmatpush3.bf16.xpose.msra.mxu1 %v3359_v0  ;;  %5222 = vmatprep.mubr.msk.bf16.mxu1 %vm359_vm3, %v3345_v6 }
0x2551   :  { %5382 = vmatprep.subr.msk.bf16.mxu1 %vm359_vm3, %v3351_v58 }
0x2558   :  { %5221 = vmatpush3.bf16.xpose.msra.mxu1 %v3362_v18 }
0x255f   :  { %5223 = vmatmul.mubr.msk.bf16.vlgmr.msra.gmra.mrb[92].mxu1 %vm359_vm3, %v3347_v8 }
0x2622   :  { %v6945_v39 = vpop.f32.mrb[88].mxu1 }
0x2623   :  { %v6947_v40 = vpop.f32.mrb[89].mxu1 }
0x2624   :  { %v5217_v54 = vpop.f32.mrb[90].mxu1 }
0x2625   :  { %v6949_v10 = vpop.f32.mrb[91].mxu1 }
0x2632   :  { %v5224_v21 = vpop.f32.mrb[92].mxu1 }
0x2633   :  { %v3398_v31 = vpop.f32.mrb[93].mxu1  ;;  %v3414_v28 = vsel %vm161_vm4, %v5224_v21, -1e+09 }
0x2634   :  { %v3412_v23 = vsel %vm161_vm4, %v3398_v31, -1e+09  ;;  %v5225_v38 = vpop.f32.mrb[94].mxu1  ;;  %v3421_v60 = vsel %vm423_vm5, %v3414_v28, -inf }
0x2635   :  { %v3415_v12 = vsel %vm423_vm5, %v3412_v23, -inf  ;;  %v3401_v49 = vpop.f32.mrb[95].mxu1 }
0x2636   :  { %v3413_v13 = vsel %vm161_vm4, %v3401_v49, -1e+09  ;;  %3416 = vmax.xlane.f32.xlu1 %v3415_v12 }
0x2637   :  { %v3418_v57 = vsel %vm423_vm5, %v3413_v13, -inf }
0x2638   :  { %3419 = vmax.xlane.f32.xlu0 %v3418_v57 }
0x263c   :  { %3422 = vmax.xlane.f32.xlu0 %v3421_v60 }
0x2647   :  { %3450 = vrot.lane.b32.xlu1 %v6755_v34, %s5834_s25 }
0x26c3   :  { %v3417_v19 = vpop.xlane.xlu1 %3416 }
0x26c4   :  { %v3424_v24 = vsub.f32 %v3412_v23, %v3417_v19 }
0x26c5   :  { %v3420_v43 = vpop.xlane.xlu0 %3419 }
0x26c6   :  { %v3425_v48 = vsub.f32 %v3413_v13, %v3420_v43  ;;  %v3427_v53 = vmul.f32 1.442695, %v3424_v24 }
0x26c7   :  { %v3451_v26 = vpop.permute.xlu1 %3450 }
0x26c8   :  { %v3429_v52 = vmul.f32 1.442695, %v3425_v48  ;;  %5226 = vmatprep.subr.bf16.mxu0 %v3451_v26 }
0x26c9   :  { %5227 = vmatpush3.bf16.msra.mxu0 %v3451_v26  ;;  %v3423_v37 = vpop.xlane.xlu0 %3422 }
0x26ca   :  { %5739 = vpow2.f32 %v3429_v52  ;;  %v3426_v58 = vsub.f32 %v3414_v28, %v3423_v37 }
0x26cc   :  { %v3431_v36 = vmul.f32 1.442695, %v3426_v58 }
0x26ce   :  { %5741 = vpow2.f32 %v3431_v36 }
0x26cf   :  { %5743 = vpow2.f32 %v3427_v53 }
0x26d4   :  { %v5740_v61 = vpop.eup %5739 }
0x26d5   :  { %v3436_v17 = vsel %vm423_vm5, %v5740_v61, 0.0 }
0x26d6   :  { %3437 = vadd.xlane.f32.xlu1 %v3436_v17 }
0x26d8   :  { %v5742_v0 = vpop.eup %5741 }
0x26d9   :  { %v3439_v6 = vsel %vm423_vm5, %v5742_v0, 0.0  ;;  %v5744_v18 = vpop.eup %5743 }
0x26da   :  { %3440 = vadd.xlane.f32.xlu0 %v3439_v6  ;;  %v3433_v8 = vsel %vm423_vm5, %v5744_v18, 0.0 }
0x26de   :  { %3434 = vadd.xlane.f32.xlu0 %v3433_v8 }
0x26e7   :  { %3516 = vrot.lane.b32.xlu1 %v6755_v34, %s5835_s26 }
0x26eb   :  { %3518 = vrot.lane.b32.xlu1 %v6885_v5, %s5835_s26 }
0x26ef   :  { %3512 = vrot.lane.b32.xlu1 %v6755_v34, %s5836_s27 }
0x26f4   :  { %3452 = vrot.lane.b32.xlu0 %v6885_v5, %s5834_s25 }
0x26f8   :  { %3514 = vrot.lane.b32.xlu0 %v6885_v5, %s5836_s27 }
0x2763   :  { %v3438_v54 = vpop.xlane.xlu1 %3437 }
0x2767   :  { %v3441_v21 = vpop.xlane.xlu0 %3440  ;;  %v3517_v38 = vpop.permute.xlu1 %3516 }
0x2768   :  { %5745 = vrcp.f32 %v3441_v21  ;;  %v3527_v24 = vsel %vm359_vm3, %v3517_v38, 0 }
0x2769   :  { %5747 = vrcp.f32 %v3438_v54 }
0x276b   :  { %v3435_v31 = vpop.xlane.xlu0 %3434  ;;  %v3519_v60 = vpop.permute.xlu1 %3518 }
0x276c   :  { %5749 = vrcp.f32 %v3435_v31  ;;  %v3530_v37 = vsel %vm359_vm3, %v3519_v60, 0 }
0x276f   :  { %v3453_v23 = vpop.permute.xlu0 %3452  ;;  %v3513_v52 = vpop.permute.xlu1 %3512 }
0x2770   :  { %v3462_v12 = vsel %vm470_vm6, %v3453_v23, 0  ;;  %5383 = vmatprep.subr.msk.bf16.mxu0 %vm470_vm6, %v3453_v23 }
0x2771   :  { %5229 = vmatpush3.bf16.msra.mxu0 %v3462_v12 }
0x2772   :  { %5384 = vmatprep.subr.msk.bf16.mxu0 %vm359_vm3, %v3517_v38  ;;  %v5746_v49 = vpop.eup %5745 }
0x2773   :  { %v5748_v13 = vpop.eup %5747  ;;  %v3447_v28 = vmul.f32 %v5746_v49, %v5742_v0  ;;  %v3515_v58 = vpop.permute.xlu0 %3514 }
0x2774   :  { %v3446_v43 = vmul.f32 %v5748_v13, %v5740_v61 }
0x2775   :  { %v3449_v26 = vpack.c.bf16 %v3447_v28, %v3447_v28 }
0x2776   :  { %v5750_v57 = vpop.eup %5749 }
0x2777   :  { %v3445_v19 = vmul.f32 %v5750_v57, %v5744_v18 }
0x2779   :  { %v3448_v48 = vpack.c.bf16 %v3446_v43, %v3445_v19 }
0x277b   :  { %5230 = vmatprep.mubr.msk.bf16.mxu0 %vm423_vm5, %v3448_v48 }
0x277c   :  { %5231 = vmatmul.mubr.msk.bf16.vlgmr.msra.gmra.mrb[84].mxu0 %vm423_vm5, %v3449_v26 }
0x277d   :  { %5235 = vmatpush3.bf16.xpose.msra.mxu0 %v3527_v24  ;;  %5238 = vmatprep.mubr.msk.bf16.mxu0 %vm359_vm3, %v3513_v52 }
0x277e   :  { %5385 = vmatprep.subr.msk.bf16.mxu0 %vm359_vm3, %v3519_v60 }
0x2785   :  { %5237 = vmatpush3.bf16.xpose.msra.mxu0 %v3530_v37 }
0x278c   :  { %5239 = vmatmul.mubr.msk.bf16.vlgmr.msra.gmra.mrb[88].mxu0 %vm359_vm3, %v3515_v58 }
0x284f   :  { %v6985_v53 = vpop.f32.mrb[84].mxu0 }
0x2850   :  { %v6987_v36 = vpop.f32.mrb[85].mxu0 }
0x2851   :  { %v5467_v61 = vpack.i.bf16 %v6987_v36, %v6817_v30  ;;  %v5233_v17 = vpop.f32.mrb[86].mxu0 }
0x2852   :  { %v6991_v0 = vpop.f32.mrb[87].mxu0 }
0x2853   :  { %v5482_v6 = vpack.i.bf16 %v6985_v53, %v6991_v0  ;;  %v5524_v53 = vld [vmem:[%s7337_s8 + $0x48] sm:$0xff]   ;;  %v5525_v0 = vld [vmem:[%s7337_s8 + $0x50] sm:$0xff]  }
0x285f   :  { %v5240_v18 = vpop.f32.mrb[88].mxu0 }
0x2860   :  { %v3566_v8 = vpop.f32.mrb[89].mxu0  ;;  %v3582_v49 = vsel %vm161_vm4, %v5240_v18, -1e+09 }
0x2861   :  { %v3580_v54 = vsel %vm161_vm4, %v3566_v8, -1e+09  ;;  %v5241_v21 = vpop.f32.mrb[90].mxu0  ;;  %v3589_v13 = vsel %vm423_vm5, %v3582_v49, -inf }
0x2862   :  { %v3583_v31 = vsel %vm423_vm5, %v3580_v54, -inf  ;;  %v3569_v23 = vpop.f32.mrb[91].mxu0 }
0x2863   :  { %v3581_v38 = vsel %vm161_vm4, %v3569_v23, -1e+09  ;;  %3584 = vmax.xlane.f32.xlu1 %v3583_v31 }
0x2864   :  { %v3586_v12 = vsel %vm423_vm5, %v3581_v38, -inf }
0x2865   :  { %3587 = vmax.xlane.f32.xlu0 %v3586_v12 }
0x2869   :  { %3590 = vmax.xlane.f32.xlu0 %v3589_v13 }
0x2874   :  { %3618 = vrot.lane.b32.xlu1 %v6755_v34, %s5837_s1 }
0x28f0   :  { %v3585_v57 = vpop.xlane.xlu1 %3584 }
0x28f1   :  { %v3592_v43 = vsub.f32 %v3580_v54, %v3585_v57 }
0x28f2   :  { %v3588_v28 = vpop.xlane.xlu0 %3587 }
0x28f3   :  { %v3593_v60 = vsub.f32 %v3581_v38, %v3588_v28  ;;  %v3595_v52 = vmul.f32 1.442695, %v3592_v43 }
0x28f4   :  { %v3619_v19 = vpop.permute.xlu1 %3618 }
0x28f5   :  { %v3597_v48 = vmul.f32 1.442695, %v3593_v60  ;;  %5242 = vmatprep.subr.bf16.mxu1 %v3619_v19 }
0x28f6   :  { %5243 = vmatpush3.bf16.msra.mxu1 %v3619_v19  ;;  %v3591_v26 = vpop.xlane.xlu0 %3590 }
0x28f7   :  { %5751 = vpow2.f32 %v3597_v48  ;;  %v3594_v24 = vsub.f32 %v3582_v49, %v3591_v26 }
0x28f9   :  { %v3599_v37 = vmul.f32 1.442695, %v3594_v24 }
0x28fb   :  { %5753 = vpow2.f32 %v3599_v37 }
0x28fc   :  { %5755 = vpow2.f32 %v3595_v52 }
0x2901   :  { %v5752_v58 = vpop.eup %5751 }
0x2902   :  { %v3604_v17 = vsel %vm423_vm5, %v5752_v58, 0.0 }
0x2903   :  { %3605 = vadd.xlane.f32.xlu1 %v3604_v17 }
0x2905   :  { %v5754_v18 = vpop.eup %5753 }
0x2906   :  { %v3607_v8 = vsel %vm423_vm5, %v5754_v18, 0.0  ;;  %v5756_v21 = vpop.eup %5755 }
0x2907   :  { %3608 = vadd.xlane.f32.xlu0 %v3607_v8  ;;  %v3601_v54 = vsel %vm423_vm5, %v5756_v21, 0.0 }
0x290b   :  { %3602 = vadd.xlane.f32.xlu0 %v3601_v54 }
0x2914   :  { %3684 = vrot.lane.b32.xlu1 %v6755_v34, %s5838_s28 }
0x2918   :  { %3686 = vrot.lane.b32.xlu1 %v6885_v5, %s5838_s28  ;;  %s5844_s28 = smov [#allocation3]  }
0x291c   :  { %3680 = vrot.lane.b32.xlu1 %v6755_v34, %s5839_s29 }
0x2921   :  { %3620 = vrot.lane.b32.xlu0 %v6885_v5, %s5837_s1  ;;  %s4527_s1 = smul.u32 5, %s7329_s0 }
0x2925   :  { %3682 = vrot.lane.b32.xlu0 %v6885_v5, %s5839_s29  ;;  %s4543_s29 = sshll.u32 %s5844_s28, 4  ;;  %s4544_s29 = int_to_ptr.vmem [resolvable:$true] %s4543_s29 }
0x2926   :  { %s5804_s0 = scalar_lea.vmem %s4544_s29, 32  ;;  %p5809_p1 = scmp.lt.s32.totalorder %s4544_s29, %s4544_s29 }
0x2927   :  { %p5805_p0 = scmp.ne.s32.totalorder %s4544_s29, %s5804_s0  ;;  %p5810_p2 = scmp.lt.s32.totalorder %s5804_s0, %s5804_s0 }
0x2929   :  { %p5811_p3 = por %p5810_p2, %p5809_p1 }
0x292b   :  { %p5812_p4 = pnand %p5811_p3, %p5805_p0 }
0x2990   :  { %v3606_v31 = vpop.xlane.xlu1 %3605 }
0x2994   :  { %v3609_v23 = vpop.xlane.xlu0 %3608  ;;  %v3685_v49 = vpop.permute.xlu1 %3684 }
0x2995   :  { %5757 = vrcp.f32 %v3609_v23  ;;  %v3695_v37 = vsel %vm359_vm3, %v3685_v49, 0 }
0x2996   :  { %5759 = vrcp.f32 %v3606_v31 }
0x2998   :  { %v3603_v38 = vpop.xlane.xlu0 %3602  ;;  %v3687_v43 = vpop.permute.xlu1 %3686 }
0x2999   :  { %5761 = vrcp.f32 %v3603_v38  ;;  %v3698_v8 = vsel %vm359_vm3, %v3687_v43, 0 }
0x299c   :  { %v3621_v12 = vpop.permute.xlu0 %3620  ;;  %v3681_v17 = vpop.permute.xlu1 %3680 }
0x299d   :  { %v3630_v13 = vsel %vm470_vm6, %v3621_v12, 0  ;;  %5386 = vmatprep.subr.msk.bf16.mxu1 %vm470_vm6, %v3621_v12 }
0x299e   :  { %5245 = vmatpush3.bf16.msra.mxu1 %v3630_v13 }
0x299f   :  { %5387 = vmatprep.subr.msk.bf16.mxu1 %vm359_vm3, %v3685_v49  ;;  %v5758_v57 = vpop.eup %5757 }
0x29a0   :  { %v5760_v28 = vpop.eup %5759  ;;  %v3615_v19 = vmul.f32 %v5758_v57, %v5754_v18 }
0x29a1   :  { %v3614_v26 = vmul.f32 %v5760_v28, %v5752_v58  ;;  %v3683_v58 = vpop.permute.xlu0 %3682 }
0x29a2   :  { %v3617_v52 = vpack.c.bf16 %v3615_v19, %v3615_v19 }
0x29a3   :  { %v5762_v60 = vpop.eup %5761 }
0x29a4   :  { %v3613_v48 = vmul.f32 %v5762_v60, %v5756_v21 }
0x29a6   :  { %v3616_v24 = vpack.c.bf16 %v3614_v26, %v3613_v48 }
0x29a8   :  { %5246 = vmatprep.mubr.msk.bf16.mxu1 %vm423_vm5, %v3616_v24 }
0x29a9   :  { %5247 = vmatmul.mubr.msk.bf16.vlgmr.msra.gmra.mrb[96].mxu1 %vm423_vm5, %v3617_v52 }
0x29aa   :  { %5251 = vmatpush3.bf16.xpose.msra.mxu1 %v3695_v37  ;;  %5254 = vmatprep.mubr.msk.bf16.mxu1 %vm359_vm3, %v3681_v17 }
0x29ab   :  { %5388 = vmatprep.subr.msk.bf16.mxu1 %vm359_vm3, %v3687_v43 }
0x29b2   :  { %5253 = vmatpush3.bf16.xpose.msra.mxu1 %v3698_v8 }
0x29b3   :  { %5282 = vmatprep.subr.bf16.mxu1 %v5828_v1 }
0x29b9   :  { %5255 = vmatmul.mubr.msk.bf16.vlgmr.msra.gmra.mrb[100].mxu1 %vm359_vm3, %v3683_v58 }
0x29ba   :  { %5286 = vmatprep.mubr.msk.bf16.mxu1 %vm5829_vm0, %v5828_v1 }
0x2a7c   :  { %v7032_v18 = vpop.f32.mrb[96].mxu1 }
0x2a7d   :  { %v3666_v21 = vpop.f32.mrb[97].mxu1 }
0x2a7e   :  { %v5472_v54 = vpack.i.bf16 %v3666_v21, %v6859_v56  ;;  %v5249_v31 = vpop.f32.mrb[98].mxu1 }
0x2a7f   :  { %v7035_v23 = vpop.f32.mrb[99].mxu1 }
0x2a80   :  { %v5487_v38 = vpack.i.bf16 %v7032_v18, %v7035_v23  ;;  %v5527_v18 = vld [vmem:[%s7337_s8 + $0x60] sm:$0xff]   ;;  %v5528_v23 = vld [vmem:[%s7337_s8 + $0x68] sm:$0xff]  }
0x2a8c   :  { %v5256_v12 = vpop.f32.mrb[100].mxu1 }
0x2a8d   :  { %v3734_v49 = vpop.f32.mrb[101].mxu1  ;;  %v3750_v43 = vsel %vm161_vm4, %v5256_v12, -1e+09 }
0x2a8e   :  { %v3748_v13 = vsel %vm161_vm4, %v3734_v49, -1e+09  ;;  %v5257_v57 = vpop.f32.mrb[102].mxu1  ;;  %v3757_v48 = vsel %vm423_vm5, %v3750_v43, -inf }
0x2a8f   :  { %v3751_v28 = vsel %vm423_vm5, %v3748_v13, -inf  ;;  %v3737_v60 = vpop.f32.mrb[103].mxu1 }
0x2a90   :  { %v3749_v19 = vsel %vm161_vm4, %v3737_v60, -1e+09  ;;  %3752 = vmax.xlane.f32.xlu1 %v3751_v28 }
0x2a91   :  { %v3754_v56 = vsel %vm423_vm5, %v3749_v19, -inf }
0x2a92   :  { %3755 = vmax.xlane.f32.xlu0 %v3754_v56 }
0x2a96   :  { %3758 = vmax.xlane.f32.xlu0 %v3757_v48 }
0x2b1d   :  { %v3753_v26 = vpop.xlane.xlu1 %3752 }
0x2b1e   :  { %v3760_v37 = vsub.f32 %v3748_v13, %v3753_v26 }
0x2b1f   :  { %v3756_v24 = vpop.xlane.xlu0 %3755 }
0x2b20   :  { %v3761_v52 = vsub.f32 %v3749_v19, %v3756_v24  ;;  %v3763_v21 = vmul.f32 1.442695, %v3760_v37 }
0x2b22   :  { %v3765_v17 = vmul.f32 1.442695, %v3761_v52 }
0x2b23   :  { %v3759_v8 = vpop.xlane.xlu0 %3758 }
0x2b24   :  { %5763 = vpow2.f32 %v3765_v17  ;;  %v3762_v58 = vsub.f32 %v3750_v43, %v3759_v8 }
0x2b26   :  { %v3767_v31 = vmul.f32 1.442695, %v3762_v58 }
0x2b28   :  { %5765 = vpow2.f32 %v3767_v31 }
0x2b29   :  { %5767 = vpow2.f32 %v3763_v21 }
0x2b2e   :  { %v5764_v49 = vpop.eup %5763 }
0x2b2f   :  { %v3772_v57 = vsel %vm423_vm5, %v5764_v49, 0.0 }
0x2b30   :  { %3773 = vadd.xlane.f32.xlu1 %v3772_v57 }
0x2b32   :  { %v5766_v12 = vpop.eup %5765 }
0x2b33   :  { %v3775_v28 = vsel %vm423_vm5, %v5766_v12, 0.0  ;;  %v5768_v60 = vpop.eup %5767 }
0x2b34   :  { %3776 = vadd.xlane.f32.xlu0 %v3775_v28  ;;  %v3769_v19 = vsel %vm423_vm5, %v5768_v60, 0.0 }
0x2b38   :  { %3770 = vadd.xlane.f32.xlu0 %v3769_v19 }
0x2b41   :  { %3786 = vrot.lane.b32.xlu1 %v6755_v34, %s5840_s30 }
0x2b45   :  { %5453 = vrot.lane.b32.xlu1 %v5452_v29, %s5841_s11 }
0x2b49   :  { %5458 = vrot.lane.b32.xlu1 %v5457_v41, %s5842_s12 }
0x2b4d   :  { %5463 = vrot.lane.b32.xlu1 %v5462_v15, %s5843_s13 }
0x2b4e   :  { %3788 = vrot.lane.b32.xlu0 %v6885_v5, %s5840_s30 }
0x2b51   :  { %5473 = vrot.lane.b32.xlu1 %v5472_v54, %s5842_s12 }
0x2b52   :  { %5468 = vrot.lane.b32.xlu0 %v5467_v61, %s5841_s11 }
0x2bbd   :  { %v3774_v34 = vpop.xlane.xlu1 %3773 }
0x2bc1   :  { %v3787_v63 = vpop.permute.xlu1 %3786  ;;  %v3777_v50 = vpop.xlane.xlu0 %3776 }
0x2bc2   :  { %5258 = vmatprep.subr.bf16.mxu0 %v3787_v63  ;;  %5769 = vrcp.f32 %v3777_v50  ;;  %v7109_v50 = vld [vmem:[%s7333_s4 + $0x8] sm:$0xff] }
0x2bc3   :  { %5259 = vmatpush3.bf16.msra.mxu0 %v3787_v63  ;;  %5771 = vrcp.f32 %v3774_v34 }
0x2bc5   :  { %v5454_v29 = vpop.permute.xlu1 %5453  ;;  %v3771_v25 = vpop.xlane.xlu0 %3770 }
0x2bc6   :  { %5773 = vrcp.f32 %v3771_v25  ;;  %v5456_v5 = vunpack.i.h.bf16 %v5454_v29  ;;  %v5455_v42 = vunpack.i.l.bf16 %v5454_v29  ;;  %v7113_v29 = vrot.slane %v7109_v50, %v6522_v16 }
0x2bc8   :  { %v3168_v13 = vsel %vm359_vm3, %v6815_v32, %v5456_v5  ;;  %v3167_v56 = vsel %vm359_vm3, %v6813_v59, %v5455_v42  ;;  %v5519_v59 = vld [vmem:[%s7335_s6 + $0x10] sm:$0xff]  }
0x2bc9   :  { %v5459_v11 = vpop.permute.xlu1 %5458  ;;  %v3789_v41 = vpop.permute.xlu0 %3788 }
0x2bca   :  { %v3798_v45 = vsel %vm470_vm6, %v3789_v41, 0  ;;  %5389 = vmatprep.subr.msk.bf16.mxu0 %vm470_vm6, %v3789_v41  ;;  %v5461_v30 = vunpack.i.h.bf16 %v5459_v11  ;;  %v5460_v15 = vunpack.i.l.bf16 %v5459_v11 }
0x2bcb   :  { %5261 = vmatpush3.bf16.msra.mxu0 %v3798_v45 }
0x2bcc   :  { %5266 = vmatprep.subr.bf16.mxu0 %v5828_v1  ;;  %v5770_v36 = vpop.eup %5769  ;;  %v3170_v26 = vsel %vm1065_vm7, %v3167_v56, %v5460_v15  ;;  %v3171_v24 = vsel %vm1065_vm7, %v3168_v13, %v5461_v30 }
0x2bcd   :  { %v5464_v61 = vpop.permute.xlu1 %5463  ;;  %v5772_v54 = vpop.eup %5771  ;;  %v3783_v37 = vmul.f32 %v5770_v36, %v5766_v12  ;;  %v5520_v12 = vld [vmem:[%s7335_s6 + $0x18] sm:$0xff]  }
0x2bce   :  { %v5466_v43 = vunpack.i.h.bf16 %v5464_v61  ;;  %v5465_v48 = vunpack.i.l.bf16 %v5464_v61  ;;  %v3782_v31 = vmul.f32 %v5772_v54, %v5764_v49  ;;  %v5469_v36 = vpop.permute.xlu0 %5468 }
0x2bcf   :  { %v3785_v32 = vpack.c.bf16 %v3783_v37, %v3783_v37  ;;  %v5470_v54 = vunpack.i.l.bf16 %v5469_v36 }
0x2bd0   :  { %v5774_v52 = vpop.eup %5773  ;;  %v3173_v17 = vsel %vm423_vm5, %v3170_v26, %v5465_v48  ;;  %v3174_v8 = vsel %vm423_vm5, %v3171_v24, %v5466_v43 }
0x2bd1   :  { %v3893_v58 = vpack.c.bf16 %v3174_v8, %v3173_v17  ;;  %v3781_v21 = vmul.f32 %v5774_v52, %v5768_v60  ;;  %v5474_v61 = vpop.permute.xlu1 %5473  ;;  %v3169_v26 = vsel %vm359_vm3, %v6811_v14, %v5470_v54 }
0x2bd2   :  { %v5476_v13 = vunpack.i.h.bf16 %v5474_v61  ;;  %v5475_v56 = vunpack.i.l.bf16 %v5474_v61 }
0x2bd3   :  { %v3784_v57 = vpack.c.bf16 %v3782_v31, %v3781_v21 }
0x2bd4   :  { %v3172_v52 = vsel %vm1065_vm7, %v3169_v26, %v5475_v56 }
0x2bd5   :  { %5262 = vmatprep.mubr.msk.bf16.mxu0 %vm423_vm5, %v3784_v57 }
0x2bd6   :  { %5263 = vmatmul.mubr.msk.bf16.vlgmr.msra.gmra.mrb[92].mxu0 %vm423_vm5, %v3785_v32 }
0x2bd7   :  { %5267 = vmatpush3.bf16.msra.mxu0 %v5519_v59  ;;  %5270 = vmatprep.mubr.msk.bf16.mxu0 %vm5829_vm0, %v5828_v1 }
0x2bd8   :  { %5268 = vmatprep.subr.bf16.mxu0 %v5828_v1 }
0x2bdb   :  { %5269 = vmatpush3.bf16.msra.mxu0 %v5520_v12 }
0x2bdc   :  { %5298 = vmatprep.subr.bf16.mxu0 %v5828_v1 }
0x2bde   :  { %5271 = vmatmul.mubr.msk.bf16.vlgmr.msra.gmra.mrb[96].mxu0 %vm162_vm2, %v3893_v58 }
0x2bdf   :  { %5274 = vmatprep.mubr.msk.bf16.mxu0 %vm5829_vm0, %v5828_v1 }
0x2ca9   :  { %v7098_v49 = vpop.f32.mrb[92].mxu0 }
0x2caa   :  { %v3834_v28 = vpop.f32.mrb[93].mxu0 }
0x2cab   :  { %v5477_v60 = vpack.i.bf16 %v3834_v28, %v6903_v44  ;;  %v5265_v19 = vpop.f32.mrb[94].mxu0 }
0x2cac   :  { %v7101_v34 = vpop.f32.mrb[95].mxu0 }
0x2cad   :  { %v5492_v63 = vpack.i.bf16 %v7098_v49, %v7101_v34  ;;  %5478 = vrot.lane.b32.xlu0 %v5477_v60, %s5843_s13  ;;  %v5530_v49 = vld [vmem:[%s7337_s8 + $0x78] sm:$0xff]  }
0x2cb1   :  { %v3956_v25 = vpop.f32.mrb[96].mxu0 }
0x2cb2   :  { %v3979_v44 = vadd.f32 %v3956_v25, %v6618_v47  ;;  %v5272_v11 = vpop.f32.mrb[97].mxu0  ;;  %v5471_v47 = vunpack.i.h.bf16 %v5469_v36 }
0x2cb3   :  { %v3959_v41 = vpop.f32.mrb[98].mxu0 }
0x2cb4   :  { %v7117_v5 = vadd.f32 %v7113_v29, %v3979_v44  ;;  %v5273_v42 = vpop.f32.mrb[99].mxu0  ;;  %v3980_v30 = vadd.f32 %v3959_v41, %v6622_v51  ;;  %v3884_v48 = vsel %vm359_vm3, %v6947_v40, %v5471_v47 }
0x2cb5   :  { %v3887_v37 = vsel %vm1065_vm7, %v3884_v48, %v5476_v13 }
0x2cb6   :  { %v3995_v45 = vsel %vm162_vm2, %v7117_v5, 0.0  ;;  %v3990_v15 = vadd.f32 %v7113_v29, %v3980_v30 }
0x2cb7   :  { %3996 = vadd.xlane.f32.xlu1 %v3995_v45 }
0x2cb8   :  { %v3998_v16 = vsel %vm162_vm2, %v3990_v15, 0.0 }
0x2ccc   :  { %3999 = vadd.xlane.f32.xlu0 %v3998_v16 }
0x2d1f   :  { %v5479_v43 = vpop.permute.xlu0 %5478 }
0x2d20   :  { %v5481_v24 = vunpack.i.h.bf16 %v5479_v43  ;;  %v5480_v51 = vunpack.i.l.bf16 %v5479_v43 }
0x2d22   :  { %v3175_v17 = vsel %vm423_vm5, %v3172_v52, %v5480_v51  ;;  %v3890_v8 = vsel %vm423_vm5, %v3887_v37, %v5481_v24 }
0x2d23   :  { %v3894_v58 = vpack.c.bf16 %v3890_v8, %v3175_v17 }
0x2d25   :  { %5275 = vmatmul.mubr.msk.bf16.gmra.mrb[100].mxu0 %vm162_vm2, %v3894_v58 }
0x2d26   :  { %5278 = vmatprep.mubr.msk.bf16.mxu0 %vm5829_vm0, %v5828_v1 }
0x2d44   :  { %v3997_v40 = vpop.xlane.xlu1 %3996 }
0x2d45   :  { %v4013_v21 = vmul.f32 0.03125, %v3997_v40 }
0x2d47   :  { %v4019_v14 = vsub.f32 %v7117_v5, %v4013_v21  ;;  %v7168_v21 = vrot.slane %v7109_v50, %v6003_v9 }
0x2d49   :  { %v4025_v31 = vmul.f32 %v4019_v14, %v4019_v14 }
0x2d4b   :  { %v4031_v57 = vsel %vm162_vm2, %v4025_v31, 0.0 }
0x2d4c   :  { %4032 = vadd.xlane.f32.xlu1 %v4031_v57 }
0x2d59   :  { %v4000_v59 = vpop.xlane.xlu0 %3999 }
0x2d5a   :  { %v4014_v12 = vmul.f32 0.03125, %v4000_v59 }
0x2d5c   :  { %v4020_v41 = vsub.f32 %v3990_v15, %v4014_v12  ;;  %v5522_v15 = vld [vmem:[%s7336_s7 + $0x18] sm:$0xff]   ;;  %v7173_v12 = vrot.slane %v7109_v50, %v6011_v22  ;;  %v5523_v22 = vld [vmem:[%s7337_s8 + $0x40] sm:$0xff]  }
0x2d5d   :  { %5299 = vmatpush3.bf16.msra.mxu0 %v5523_v22 }
0x2d5e   :  { %v4026_v16 = vmul.f32 %v4020_v41, %v4020_v41  ;;  %5300 = vmatprep.subr.bf16.mxu0 %v5828_v1 }
0x2d61   :  { %5301 = vmatpush3.bf16.msra.mxu0 %v5524_v53 }
0x2d62   :  { %5302 = vmatprep.subr.bf16.mxu0 %v5828_v1 }
0x2d65   :  { %5303 = vmatpush3.bf16.msra.mxu0 %v5525_v0 }
0x2d66   :  { %5304 = vmatprep.subr.bf16.mxu0 %v5828_v1 }
0x2dd9   :  { %v4033_v36 = vpop.xlane.xlu1 %4032 }
0x2dda   :  { %v4049_v61 = vmul.f32 0.03125, %v4033_v36 }
0x2ddc   :  { %v4055_v13 = vadd.f32 1e-06, %v4049_v61 }
0x2dde   :  { %5775 = vrsqrt.f32 %v4055_v13 }
0x2de8   :  { %v5776_v40 = vpop.eup %5775 }
0x2de9   :  { %v4067_v31 = vmul.f32 %v5776_v40, %v4019_v14 }
0x2deb   :  { %v4077_v59 = vmul.f32 %v7168_v21, %v4067_v31 }
0x2df8   :  { %v3964_v32 = vpop.f32.mrb[100].mxu0 }
0x2df9   :  { %v3981_v28 = vadd.f32 %v3964_v32, %v6632_v62  ;;  %v5276_v60 = vpop.f32.mrb[101].mxu0  ;;  %v4034_v62 = vsel %vm162_vm2, %v4026_v16, 0.0 }
0x2dfa   :  { %v3967_v19 = vpop.f32.mrb[102].mxu0  ;;  %v4087_v60 = vadd.f32 %v7173_v12, %v4077_v59 }
0x2dfb   :  { %v3991_v25 = vadd.f32 %v7113_v29, %v3981_v28  ;;  %v3982_v44 = vadd.f32 %v3967_v19, %v6636_v2  ;;  %v5277_v11 = vpop.f32.mrb[103].mxu0  ;;  %v5521_v2 = vld [vmem:[%s7336_s7 + $0x10] sm:$0xff]   ;;  %s4528_s7 = sadd.s32 5, %s4527_s1 }
0x2dfc   :  { %5283 = vmatpush3.bf16.msra.mxu1 %v5521_v2 }
0x2dfd   :  { %v7141_v42 = vadd.f32 %v7113_v29, %v3982_v44  ;;  %v4001_v45 = vsel %vm162_vm2, %v3991_v25, 0.0  ;;  %5284 = vmatprep.subr.bf16.mxu1 %v5828_v1 }
0x2dfe   :  { %4002 = vadd.xlane.f32.xlu0 %v4001_v45 }
0x2dff   :  { %v4004_v30 = vsel %vm162_vm2, %v7141_v42, 0.0 }
0x2e00   :  { %5285 = vmatpush3.bf16.msra.mxu1 %v5522_v15 }
0x2e01   :  { %5326 = vmatprep.subr.bf16.mxu1 %v5828_v1 }
0x2e02   :  { %4005 = vadd.xlane.f32.xlu0 %v4004_v30 }
0x2e06   :  { %4035 = vadd.xlane.f32.xlu0 %v4034_v62 }
0x2e8b   :  { %v4003_v47 = vpop.xlane.xlu0 %4002 }
0x2e8c   :  { %v4015_v54 = vmul.f32 0.03125, %v4003_v47 }
0x2e8e   :  { %v7155_v56 = vsub.f32 %v3991_v25, %v4015_v54 }
0x2e8f   :  { %v4006_v43 = vpop.xlane.xlu0 %4005 }
0x2e90   :  { %v4016_v48 = vmul.f32 0.03125, %v4006_v43  ;;  %v4027_v26 = vmul.f32 %v7155_v56, %v7155_v56 }
0x2e92   :  { %v7160_v24 = vsub.f32 %v7141_v42, %v4016_v48  ;;  %v4037_v51 = vsel %vm162_vm2, %v4027_v26, 0.0 }
0x2e93   :  { %4038 = vadd.xlane.f32.xlu1 %v4037_v51  ;;  %v4036_v52 = vpop.xlane.xlu0 %4035 }
0x2e94   :  { %v4050_v37 = vmul.f32 0.03125, %v4036_v52  ;;  %v4028_v17 = vmul.f32 %v7160_v24, %v7160_v24 }
0x2e96   :  { %v4056_v8 = vadd.f32 1e-06, %v4050_v37  ;;  %v4040_v58 = vsel %vm162_vm2, %v4028_v17, 0.0 }
0x2e97   :  { %4041 = vadd.xlane.f32.xlu0 %v4040_v58 }
0x2e98   :  { %5777 = vrsqrt.f32 %v4056_v8 }
0x2ea2   :  { %v5778_v57 = vpop.eup %5777 }
0x2ea3   :  { %v4068_v32 = vmul.f32 %v5778_v57, %v4020_v41 }
0x2ea4   :  { %5483 = vrot.lane.b32.xlu1 %v5482_v6, %s5841_s11  ;;  %v5526_v6 = vld [vmem:[%s7337_s8 + $0x58] sm:$0xff]  }
0x2ea5   :  { %v4078_v28 = vmul.f32 %v7168_v21, %v4068_v32  ;;  %5305 = vmatpush3.bf16.msra.mxu0 %v5526_v6 }
0x2ea6   :  { %5306 = vmatprep.subr.bf16.mxu0 %v5828_v1 }
0x2ea7   :  { %v4088_v9 = vadd.f32 %v7173_v12, %v4078_v28 }
0x2ea8   :  { %5493 = vrot.lane.b32.xlu1 %v5492_v63, %s5843_s13 }
0x2ea9   :  { %v4093_v14 = vpack.c.bf16 %v4088_v9, %v4087_v60  ;;  %5307 = vmatpush3.bf16.msra.mxu0 %v5527_v18 }
0x2eaa   :  { %5308 = vmatprep.subr.bf16.mxu0 %v5828_v1 }
0x2eab   :  { %5287 = vmatmul.mubr.msk.bf16.vlgmr.msra.gmra.mrb[104].mxu1 %vm162_vm2, %v4093_v14 }
0x2eac   :  { %5290 = vmatprep.mubr.msk.bf16.mxu1 %vm5829_vm0, %v5828_v1 }
0x2ead   :  { %5488 = vrot.lane.b32.xlu0 %v5487_v38, %s5842_s12  ;;  %5309 = vmatpush3.bf16.msra.mxu0 %v5528_v23  ;;  %v5529_v38 = vld [vmem:[%s7337_s8 + $0x70] sm:$0xff]  }
0x2eae   :  { %5310 = vmatprep.subr.bf16.mxu0 %v5828_v1 }
0x2eb1   :  { %5311 = vmatpush3.bf16.msra.mxu0 %v5529_v38 }
0x2eb2   :  { %5312 = vmatprep.subr.bf16.mxu0 %v5828_v1 }
0x2eb5   :  { %5313 = vmatpush3.bf16.msra.mxu0 %v5530_v49 }
0x2f20   :  { %v4039_v34 = vpop.xlane.xlu1 %4038 }
0x2f21   :  { %v4051_v63 = vmul.f32 0.03125, %v4039_v34 }
0x2f23   :  { %v4057_v19 = vadd.f32 1e-06, %v4051_v63 }
0x2f24   :  { %v5484_v25 = vpop.permute.xlu1 %5483  ;;  %v4042_v44 = vpop.xlane.xlu0 %4041 }
0x2f25   :  { %5779 = vrsqrt.f32 %v4057_v19  ;;  %v4052_v11 = vmul.f32 0.03125, %v4042_v44  ;;  %v5486_v41 = vunpack.i.h.bf16 %v5484_v25  ;;  %v5485_v45 = vunpack.i.l.bf16 %v5484_v25 }
0x2f27   :  { %v4058_v30 = vadd.f32 1e-06, %v4052_v11  ;;  %v3886_v61 = vsel %vm359_vm3, %v6945_v39, %v5486_v41  ;;  %v3885_v54 = vsel %vm359_vm3, %v6949_v10, %v5485_v45 }
0x2f28   :  { %v5494_v16 = vpop.permute.xlu1 %5493  ;;  %v5489_v62 = vpop.permute.xlu0 %5488 }
0x2f29   :  { %5781 = vrsqrt.f32 %v4058_v30  ;;  %v5496_v2 = vunpack.i.h.bf16 %v5494_v16  ;;  %v5495_v15 = vunpack.i.l.bf16 %v5494_v16  ;;  %v5491_v36 = vunpack.i.h.bf16 %v5489_v62 }
0x2f2a   :  { %v5490_v47 = vunpack.i.l.bf16 %v5489_v62 }
0x2f2b   :  { %v3889_v13 = vsel %vm1065_vm7, %v3886_v61, %v5491_v36 }
0x2f2c   :  { %v3888_v43 = vsel %vm1065_vm7, %v3885_v54, %v5490_v47  ;;  %v3892_v48 = vsel %vm423_vm5, %v3889_v13, %v5496_v2 }
0x2f2d   :  { %v3891_v26 = vsel %vm423_vm5, %v3888_v43, %v5495_v15 }
0x2f2e   :  { %v3895_v51 = vpack.c.bf16 %v3892_v48, %v3891_v26 }
0x2f2f   :  { %v5780_v52 = vpop.eup %5779 }
0x2f30   :  { %v4069_v37 = vmul.f32 %v5780_v52, %v7155_v56  ;;  %5279 = vmatmul.mubr.msk.bf16.gmra.mrb[104].mxu0 %vm162_vm2, %v3895_v51  ;;  %v5803_v56 = vld [vmem:[%s7333_s4 + $0x10] sm:$0xf] }
0x2f31   :  { %5314 = vmatprep.mubr.msk.bf16.mxu0 %vm5829_vm0, %v5828_v1 }
0x2f32   :  { %v4079_v17 = vmul.f32 %v7168_v21, %v4069_v37 }
0x2f33   :  { %v5782_v39 = vpop.eup %5781 }
0x2f34   :  { %v4070_v10 = vmul.f32 %v5782_v39, %v7160_v24  ;;  %v4089_v58 = vadd.f32 %v7173_v12, %v4079_v17  ;;  %v7248_v24 = vrot.slane %v5803_v56, %v6529_v55 }
0x2f36   :  { %v4080_v8 = vmul.f32 %v7168_v21, %v4070_v10 }
0x2f38   :  { %v4090_v40 = vadd.f32 %v7173_v12, %v4080_v8 }
0x2f3a   :  { %v4094_v31 = vpack.c.bf16 %v4090_v40, %v4089_v58 }
0x2f3c   :  { %5291 = vmatmul.mubr.msk.bf16.gmra.mrb[108].mxu1 %vm162_vm2, %v4094_v31 }
0x2f3d   :  { %5294 = vmatprep.mubr.msk.bf16.mxu1 %vm5829_vm0, %v5828_v1 }
0x2f7e   :  { %v4160_v57 = vpop.f32.mrb[104].mxu1 }
0x2f7f   :  { %v4161_v59 = vadd.f32 %v4160_v57, %v7248_v24  ;;  %v5288_v32 = vpop.f32.mrb[105].mxu1 }
0x2f80   :  { %v4163_v28 = vpop.f32.mrb[106].mxu1 }
0x2f81   :  { %v4189_v60 = vmul.f32 %v4161_v59, %v4161_v59  ;;  %v4164_v9 = vadd.f32 %v4163_v28, %v7248_v24  ;;  %v5289_v14 = vpop.f32.mrb[107].mxu1  ;;  %v4183_v44 = vmul.f32 0.5, %v4161_v59 }
0x2f83   :  { %v4195_v22 = vmul.f32 %v4189_v60, %v4161_v59  ;;  %v4190_v53 = vmul.f32 %v4164_v9, %v4164_v9  ;;  %v4184_v11 = vmul.f32 0.5, %v4164_v9 }
0x2f85   :  { %v4201_v0 = vmul.f32 0.044715, %v4195_v22  ;;  %v4196_v6 = vmul.f32 %v4190_v53, %v4164_v9 }
0x2f87   :  { %v4207_v18 = vadd.f32 %v4201_v0, %v4161_v59  ;;  %v4202_v23 = vmul.f32 0.044715, %v4196_v6 }
0x2f89   :  { %v4213_v38 = vmul.f32 0.7978846, %v4207_v18  ;;  %v4208_v49 = vadd.f32 %v4202_v23, %v4164_v9 }
0x2f8b   :  { %5783 = vtanh.f32 %v4213_v38  ;;  %v4214_v34 = vmul.f32 0.7978846, %v4208_v49 }
0x2f8d   :  { %5785 = vtanh.f32 %v4214_v34 }
0x2f95   :  { %v5784_v63 = vpop.eup %5783 }
0x2f96   :  { %v4225_v19 = vadd.f32 1.0, %v5784_v63 }
0x2f97   :  { %v5786_v25 = vpop.eup %5785 }
0x2f98   :  { %v4226_v41 = vadd.f32 1.0, %v5786_v25  ;;  %v4231_v45 = vmul.f32 %v4225_v19, %v4183_v44 }
0x2f9a   :  { %v4232_v30 = vmul.f32 %v4226_v41, %v4184_v11 }
0x2f9c   :  { %v4237_v16 = vpack.c.bf16 %v4232_v30, %v4231_v45 }
0x2f9e   :  { %5315 = vmatmul.mubr.bf16.vlgmr.msra.gmra.mrb[108].mxu0 %v4237_v16 }
0x2f9f   :  { %5318 = vmatprep.mubr.msk.bf16.mxu0 %vm5829_vm0, %v5828_v1 }
0x3003   :  { %v3972_v62 = vpop.f32.mrb[104].mxu0 }
0x3004   :  { %v3983_v2 = vadd.f32 %v3972_v62, %v6666_v3  ;;  %v5280_v15 = vpop.f32.mrb[105].mxu0  ;;  %v4363_v62 = vrot.slane %v7109_v50, %v6529_v55 }
0x3005   :  { %v3975_v36 = vpop.f32.mrb[106].mxu0 }
0x3006   :  { %v3993_v61 = vadd.f32 %v7113_v29, %v3983_v2  ;;  %v3984_v47 = vadd.f32 %v3975_v36, %v6671_v46  ;;  %v5281_v54 = vpop.f32.mrb[107].mxu0 }
0x3008   :  { %v3994_v13 = vadd.f32 %v7113_v29, %v3984_v47  ;;  %v4007_v43 = vsel %vm162_vm2, %v3993_v61, 0.0 }
0x3009   :  { %4008 = vadd.xlane.f32.xlu1 %v4007_v43 }
0x300a   :  { %v4010_v48 = vsel %vm162_vm2, %v3994_v13, 0.0 }
0x300b   :  { %4011 = vadd.xlane.f32.xlu0 %v4010_v48 }
0x300f   :  { %v4168_v26 = vpop.f32.mrb[108].mxu1 }
0x3010   :  { %v4169_v51 = vadd.f32 %v4168_v26, %v7248_v24  ;;  %v5292_v52 = vpop.f32.mrb[109].mxu1 }
0x3011   :  { %v4171_v3 = vpop.f32.mrb[110].mxu1 }
0x3012   :  { %v4191_v37 = vmul.f32 %v4169_v51, %v4169_v51  ;;  %v4172_v39 = vadd.f32 %v4171_v3, %v7248_v24  ;;  %v5293_v10 = vpop.f32.mrb[111].mxu1  ;;  %v4185_v60 = vmul.f32 0.5, %v4169_v51 }
0x3014   :  { %v4197_v17 = vmul.f32 %v4191_v37, %v4169_v51  ;;  %v4192_v46 = vmul.f32 %v4172_v39, %v4172_v39  ;;  %v4186_v9 = vmul.f32 0.5, %v4172_v39 }
0x3016   :  { %v4203_v8 = vmul.f32 0.044715, %v4197_v17  ;;  %v4198_v58 = vmul.f32 %v4192_v46, %v4172_v39 }
0x3018   :  { %v4209_v29 = vadd.f32 %v4203_v8, %v4169_v51  ;;  %v4204_v40 = vmul.f32 0.044715, %v4198_v58 }
0x301a   :  { %v4215_v31 = vmul.f32 0.7978846, %v4209_v29  ;;  %v4210_v56 = vadd.f32 %v4204_v40, %v4172_v39 }
0x301c   :  { %5787 = vtanh.f32 %v4215_v31  ;;  %v4216_v57 = vmul.f32 0.7978846, %v4210_v56 }
0x301e   :  { %5789 = vtanh.f32 %v4216_v57 }
0x3026   :  { %v5788_v59 = vpop.eup %5787 }
0x3027   :  { %v4227_v32 = vadd.f32 1.0, %v5788_v59 }
0x3028   :  { %v5790_v28 = vpop.eup %5789 }
0x3029   :  { %v4228_v14 = vadd.f32 1.0, %v5790_v28  ;;  %v4233_v22 = vmul.f32 %v4227_v32, %v4185_v60  ;;  %v5531_v28 = vld [vmem:[%s7338_s9] sm:$0xff]  }
0x302a   :  { %5327 = vmatpush3.bf16.msra.mxu1 %v5531_v28 }
0x302b   :  { %v4234_v53 = vmul.f32 %v4228_v14, %v4186_v9  ;;  %5328 = vmatprep.subr.bf16.mxu1 %v5828_v1  ;;  %v4388_v14 = vrot.slane %v7109_v50, %v1882_v7 }
0x302d   :  { %v4238_v0 = vpack.c.bf16 %v4234_v53, %v4233_v22  ;;  %v4393_v53 = vrot.slane %v7109_v50, %v2263_v20 }
0x302f   :  { %5319 = vmatmul.mubr.bf16.gmra.mrb[112].mxu0 %v4238_v0 }
0x3030   :  { %5322 = vmatprep.mubr.msk.bf16.mxu0 %vm5829_vm0, %v5828_v1 }
0x3071   :  { %v4339_v6 = vpop.f32.mrb[108].mxu0 }
0x3072   :  { %v5316_v18 = vpop.f32.mrb[109].mxu0  ;;  %v4358_v16 = vadd.f32 %v4339_v6, %v7117_v5 }
0x3073   :  { %v4342_v23 = vpop.f32.mrb[110].mxu0 }
0x3074   :  { %v5317_v38 = vpop.f32.mrb[111].mxu0 }
0x3096   :  { %v4009_v49 = vpop.xlane.xlu1 %4008 }
0x3097   :  { %v4017_v34 = vmul.f32 0.03125, %v4009_v49 }
0x3098   :  { %v4012_v44 = vpop.xlane.xlu0 %4011 }
0x3099   :  { %v4023_v63 = vsub.f32 %v3993_v61, %v4017_v34  ;;  %v4018_v45 = vmul.f32 0.03125, %v4012_v44  ;;  %v4364_v61 = vadd.f32 %v4363_v62, %v4358_v16 }
0x309b   :  { %v4029_v19 = vmul.f32 %v4023_v63, %v4023_v63  ;;  %v4024_v47 = vsub.f32 %v3994_v13, %v4018_v45 }
0x309d   :  { %v4043_v25 = vsel %vm162_vm2, %v4029_v19, 0.0  ;;  %v4030_v26 = vmul.f32 %v4024_v47, %v4024_v47 }
0x309e   :  { %4044 = vadd.xlane.f32.xlu1 %v4043_v25 }
0x309f   :  { %v4046_v51 = vsel %vm162_vm2, %v4030_v26, 0.0 }
0x3102   :  { %v4346_v11 = vpop.f32.mrb[112].mxu0 }
0x3103   :  { %v5320_v41 = vpop.f32.mrb[113].mxu0 }
0x3104   :  { %v4348_v30 = vpop.f32.mrb[114].mxu0 }
0x3105   :  { %v4359_v2 = vadd.f32 %v4348_v30, %v7141_v42  ;;  %v5321_v15 = vpop.f32.mrb[115].mxu0 }
0x3106   :  { %v5533_v15 = vld [vmem:[%s7338_s9 + $0x10] sm:$0xff]  }
0x3107   :  { %v4365_v36 = vadd.f32 %v4363_v62, %v4359_v2 }
0x3109   :  { %v4367_v54 = vrot.slane %v4365_v36, 7 }
0x310b   :  { %v4370_v43 = vsel %vm4369_vm8, %v4364_v61, %v4367_v54 }
0x310c   :  { %v4372_v48 = vsel %vm4371_vm9, %v4370_v43, 0.0 }
0x310d   :  { %4373 = vadd.xlane.f32.xlu0 %v4372_v48 }
0x3111   :  { %4047 = vadd.xlane.f32.xlu0 %v4046_v51 }
0x312b   :  { %v4045_v5 = vpop.xlane.xlu1 %4044 }
0x312c   :  { %v4053_v52 = vmul.f32 0.03125, %v4045_v5 }
0x312e   :  { %v4059_v55 = vadd.f32 1e-06, %v4053_v52  ;;  %v4403_v52 = vrot.slane %v7109_v50, %v2351_v27  ;;  %v4531_v27 = vstv %s4528_s7 }
0x312f   :  { %vm4532_vm11 = vcmp.lt.s32.totalorder %v6059_v35, %v4531_v27 }
0x3130   :  { %5791 = vrsqrt.f32 %v4059_v55 }
0x313a   :  { %v5792_v8 = vpop.eup %5791 }
0x313b   :  { %v4071_v58 = vmul.f32 %v5792_v8, %v4023_v63 }
0x313d   :  { %v4081_v31 = vmul.f32 %v7168_v21, %v4071_v58  ;;  %v4529_v58 = vstv %s4527_s1 }
0x313e   :  { %vm4530_vm10 = vcmp.ge.s32.totalorder %v6059_v35, %v4529_v58 }
0x313f   :  { %v4091_v57 = vadd.f32 %v7173_v12, %v4081_v31  ;;  %vm4533_vm12 = vmand %vm4530_vm10, %vm4532_vm11 }
0x319a   :  { %v4374_v3 = vpop.xlane.xlu0 %4373 }
0x319b   :  { %v4375_v42 = vmul.f32 0.03125, %v4374_v3 }
0x319d   :  { %v4376_v37 = vsub.f32 %v4370_v43, %v4375_v42 }
0x319e   :  { %v4048_v13 = vpop.xlane.xlu0 %4047 }
0x319f   :  { %v4054_v39 = vmul.f32 0.03125, %v4048_v13  ;;  %v4377_v10 = vmul.f32 %v4376_v37, %v4376_v37 }
0x31a1   :  { %v4060_v17 = vadd.f32 1e-06, %v4054_v39  ;;  %v4378_v46 = vsel %vm4371_vm9, %v4377_v10, 0.0 }
0x31a2   :  { %4379 = vadd.xlane.f32.xlu1 %v4378_v46 }
0x31a3   :  { %5793 = vrsqrt.f32 %v4060_v17 }
0x31ad   :  { %v5794_v29 = vpop.eup %5793 }
0x31ae   :  { %v4072_v40 = vmul.f32 %v5794_v29, %v4024_v47  ;;  %v4524_v29 = vrot.slane %v7109_v50, %v2361_v33 }
0x31b0   :  { %v4082_v56 = vmul.f32 %v7168_v21, %v4072_v40  ;;  %v5532_v21 = vld [vmem:[%s7338_s9 + $0x8] sm:$0xff]  }
0x31b1   :  { %5329 = vmatpush3.bf16.msra.mxu1 %v5532_v21 }
0x31b2   :  { %v4092_v59 = vadd.f32 %v7173_v12, %v4082_v56  ;;  %5334 = vmatprep.subr.bf16.mxu1 %v5828_v1 }
0x31b4   :  { %v4095_v32 = vpack.c.bf16 %v4092_v59, %v4091_v57 }
0x31b6   :  { %5295 = vmatmul.mubr.msk.bf16.gmra.mrb[112].mxu1 %vm162_vm2, %v4095_v32 }
0x31b7   :  { %5330 = vmatprep.mubr.msk.bf16.mxu1 %vm5829_vm0, %v5828_v1 }
0x322f   :  { %v4380_v12 = vpop.xlane.xlu1 %4379 }
0x3230   :  { %v4381_v60 = vmul.f32 0.03125, %v4380_v12 }
0x3232   :  { %v4382_v9 = vadd.f32 1e-06, %v4381_v60 }
0x3234   :  { %5795 = vrsqrt.f32 %v4382_v9 }
0x323e   :  { %v5796_v22 = vpop.eup %5795 }
0x323f   :  { %v4384_v0 = vmul.f32 %v5796_v22, %v4376_v37 }
0x3241   :  { %v4389_v6 = vmul.f32 %v4388_v14, %v4384_v0 }
0x3243   :  { %v4394_v18 = vadd.f32 %v4393_v53, %v4389_v6 }
0x3245   :  { %v4395_v23 = vpack.c.bf16 %v4394_v18, %v4394_v18 }
0x3247   :  { %5331 = vmatmul.mubr.msk.bf16.vlgmr.msra.gmra.mrb[116].mxu1 %vm162_vm2, %v4395_v23 }
0x3248   :  { %5338 = vmatprep.mubr.msk.bf16.mxu1 %vm5829_vm0, %v5828_v1  ;;  %5335 = vmatpush3.bf16.msra.mxu1 %v5533_v15 }
0x3249   :  { %5336 = vmatprep.subr.bf16.mxu1 %v5828_v1 }
0x3289   :  { %v4176_v38 = vpop.f32.mrb[112].mxu1 }
0x328a   :  { %v4177_v49 = vadd.f32 %v4176_v38, %v7248_v24  ;;  %v5296_v34 = vpop.f32.mrb[113].mxu1 }
0x328b   :  { %v4179_v63 = vpop.f32.mrb[114].mxu1 }
0x328c   :  { %v4193_v7 = vmul.f32 %v4177_v49, %v4177_v49  ;;  %v4180_v19 = vadd.f32 %v4179_v63, %v7248_v24  ;;  %v5297_v25 = vpop.f32.mrb[115].mxu1  ;;  %v5534_v24 = vld [vmem:[%s7338_s9 + $0x18] sm:$0xff]   ;;  %v4187_v54 = vmul.f32 0.5, %v4177_v49 }
0x328d   :  { %5337 = vmatpush3.bf16.msra.mxu1 %v5534_v24 }
0x328e   :  { %v4199_v44 = vmul.f32 %v4193_v7, %v4177_v49  ;;  %v4194_v20 = vmul.f32 %v4180_v19, %v4180_v19  ;;  %v4188_v43 = vmul.f32 0.5, %v4180_v19 }
0x3290   :  { %v4205_v11 = vmul.f32 0.044715, %v4199_v44  ;;  %v4200_v41 = vmul.f32 %v4194_v20, %v4180_v19 }
0x3292   :  { %v4211_v45 = vadd.f32 %v4205_v11, %v4177_v49  ;;  %v4206_v30 = vmul.f32 0.044715, %v4200_v41 }
0x3294   :  { %v4217_v16 = vmul.f32 0.7978846, %v4211_v45  ;;  %v4212_v62 = vadd.f32 %v4206_v30, %v4180_v19 }
0x3296   :  { %5797 = vtanh.f32 %v4217_v16  ;;  %v4218_v2 = vmul.f32 0.7978846, %v4212_v62 }
0x3298   :  { %5799 = vtanh.f32 %v4218_v2 }
0x32a0   :  { %v5798_v36 = vpop.eup %5797 }
0x32a1   :  { %v4229_v47 = vadd.f32 1.0, %v5798_v36 }
0x32a2   :  { %v5800_v61 = vpop.eup %5799 }
0x32a3   :  { %v4230_v48 = vadd.f32 1.0, %v5800_v61  ;;  %v4235_v26 = vmul.f32 %v4229_v47, %v4187_v54 }
0x32a5   :  { %v4236_v51 = vmul.f32 %v4230_v48, %v4188_v43 }
0x32a7   :  { %v4239_v5 = vpack.c.bf16 %v4236_v51, %v4235_v26 }
0x32a9   :  { %5323 = vmatmul.mubr.bf16.gmra.mrb[116].mxu0 %v4239_v5 }
0x331a   :  { %v4453_v1 = vpop.f32.mrb[116].mxu1 }
0x331b   :  { %v4454_v55 = vadd.f32 %v4453_v1, %v4403_v52  ;;  %v5332_v3 = vpop.f32.mrb[117].mxu1 }
0x331c   :  { %v4456_v42 = vpop.f32.mrb[118].mxu1 }
0x331d   :  { %v4459_v37 = vmax.f32 %v4454_v55, 0.0  ;;  %v5333_v13 = vpop.f32.mrb[119].mxu1 }
0x331f   :  { %v4460_v39 = vpack.c.bf16 %v4459_v37, %v4459_v37 }
0x3321   :  { %5339 = vmatmul.mubr.msk.bf16.vlgmr.msra.gmra.mrb[120].mxu1 %vm162_vm2, %v4460_v39 }
0x337c   :  { %v4353_v10 = vpop.f32.mrb[116].mxu0 }
0x337d   :  { %v5324_v17 = vpop.f32.mrb[117].mxu0 }
0x337e   :  { %v4355_v46 = vpop.f32.mrb[118].mxu0 }
0x337f   :  { %v5325_v8 = vpop.f32.mrb[119].mxu0 }
0x33f4   :  { %v4515_v40 = vpop.f32.mrb[120].mxu1 }
0x33f5   :  { %v4525_v31 = vadd.f32 %v4524_v29, %v4515_v40  ;;  %v5340_v56 = vpop.f32.mrb[121].mxu1 }
0x33f6   :  { %v4518_v57 = vpop.f32.mrb[122].mxu1 }
0x33f7   :  { %v4534_v59 = vsel %vm4533_vm12, %v4525_v31, -1e+11  ;;  %v5341_v32 = vpop.f32.mrb[123].mxu1 }
0x33f8   :  { %4536 = vst.msk [vmem:[#allocation3] sm:$0x3] %vm4535_vm13, %v4534_v59 }
0x33f9   :  { %5815 = shalt.err (!%p5812_p4)
}
0x33fa   :  { %s5816_s13 = scalar_lea.hbm %s7339_s10, 32 }
0x33fb   :  { %p5817_p5 = scmp.ne.s32.totalorder %s7339_s10, %s5816_s13  ;;  %p5820_p6 = scmp.lt.u32.totalorder %s5816_s13, %s7339_s10 }
0x33fd   :  { %p5822_p7 = pnand %p5820_p6, %p5817_p5 }
0x33ff   :  { %5825 = shalt.err (!%p5822_p7)
}
0x3400   :  { %4546 = dma.vmem_to_hbm [thread:$0]  %s4544_s29, 32, %s7339_s10, [#allocation4]  }
0x3401   :  { %5826 = dma.done.wait [#allocation4], 32  }
0x3402   :  { %5827 = vsyncadd [#allocation4], 4294967264 }
0x3403   :  { %4550 = vsyncpa [#allocation4], 1 }

</bundles_post_ra>
